<compile_context>
chip_gen: v6e
topology: v6e:2x2x1
jax: 0.10.0
libtpu: 0.0.40
codegen_flags: <defaults>
</compile_context>

<pallas_src>
import jax
import jax.numpy as jnp
from jax.experimental import pallas as pl
from jax.experimental.pallas import tpu as pltpu

_BN_EPS = 1e-5
_VMEM_LIMIT = 32 * 1024 * 1024


# ---------------------------------------------------------------------------
# Pallas kernels
# ---------------------------------------------------------------------------
def _conv_stats_kernel(x_ref, w_ref, o_ref, stats_ref):
    """x_ref: (TM, K) bf16 im2col tile; w_ref: (K, C) bf16 (VMEM-resident);
    o_ref: (TM, C) bf16 raw conv; stats_ref: (1, 2, C) f32 per-tile [sum, sum_sq]."""
    acc = jnp.dot(x_ref[...], w_ref[...], preferred_element_type=jnp.float32)
    o_ref[...] = acc.astype(o_ref.dtype)
    stats_ref[0, 0:1, :] = jnp.sum(acc, axis=0, keepdims=True)
    stats_ref[0, 1:2, :] = jnp.sum(acc * acc, axis=0, keepdims=True)


def _bn_relu_pool_kernel(x4_ref, scale_ref, shift_ref, o_ref):
    """x4_ref: (4, TM, CW) bf16 raw conv, 2x2-pool-candidate-major, lane-dense CW view.
    Applies BN (precomputed per-channel scale/shift tiled to CW) + ReLU per candidate,
    then elementwise max over candidates (the 2x2 max-pool).  o_ref: (TM, CW) bf16."""
    s = scale_ref[...]
    t = shift_ref[...]

    def bn_relu(v):
        return jnp.maximum(v.astype(jnp.float32) * s + t, 0.0)

    p = jnp.maximum(jnp.maximum(bn_relu(x4_ref[0]), bn_relu(x4_ref[1])),
                    jnp.maximum(bn_relu(x4_ref[2]), bn_relu(x4_ref[3])))
    o_ref[...] = p.astype(o_ref.dtype)


def _bn_relu_kernel(x_ref, scale_ref, shift_ref, o_ref):
    """x_ref: (TM, CW) bf16 raw conv (lane-dense view); o_ref: (TM, CW) f32."""
    y = x_ref[...].astype(jnp.float32) * scale_ref[...] + shift_ref[...]
    o_ref[...] = jnp.maximum(y, 0.0).astype(o_ref.dtype)


def _make_conv2_kernel(th, wp, c1, f):
    """In-kernel halo'd shifted-matmul 3x3 conv over an NHWC row tile.

    x_ref : (1, TH, WP+2, C1) bf16  padded rows [i*TH, i*TH+TH)
    h0_ref: (1, 1,  WP+2, C1) bf16  padded row   i*TH+TH
    h1_ref: (1, 1,  WP+2, C1) bf16  padded row   i*TH+TH+1
    w_ref : (9, C1, F)        bf16  (VMEM-resident)
    o_ref : (TH*WP, F)        bf16  raw conv rows (n, h, w) row-major
    stats_ref: (1, 2, F)      f32   per-tile [sum, sum_sq]
    """
    def kernel(x_ref, h0_ref, h1_ref, w_ref, o_ref, stats_ref):
        xin = jnp.concatenate([x_ref[0], h0_ref[0], h1_ref[0]], axis=0)  # (TH+2, WP+2, C1)
        acc = jnp.zeros((th * wp, f), jnp.float32)
        for dy in range(3):
            for dx in range(3):
                patch = xin[dy:dy + th, dx:dx + wp, :].reshape(th * wp, c1)
                acc = acc + jnp.dot(patch, w_ref[dy * 3 + dx],
                                    preferred_element_type=jnp.float32)
        o_ref[...] = acc.astype(o_ref.dtype)
        stats_ref[0, 0:1, :] = jnp.sum(acc, axis=0, keepdims=True)
        stats_ref[0, 1:2, :] = jnp.sum(acc * acc, axis=0, keepdims=True)

    return kernel


# ---------------------------------------------------------------------------
# pallas_call wrappers (tiling / specs)
# ---------------------------------------------------------------------------
def _cparams(n_axes=1):
    return pltpu.CompilerParams(
        dimension_semantics=("parallel",) * n_axes,
        vmem_limit_bytes=_VMEM_LIMIT,
    )


def _pick_tile(m, cap=2048, min_grid=4):
    """Largest divisor of m that is a multiple of 8 and <= cap, preferring >= min_grid
    grid steps (keeps both v7x TensorCores fed and the DMA pipeline alive)."""
    best = None
    best_pref = None
    t = 8
    while t <= min(cap, m):
        if m % t == 0:
            best = t
            if m // t >= min_grid:
                best_pref = t
        t += 8
    if best_pref is not None:
        return best_pref
    if best is not None:
        return best
    # TODO(synk): masked partial last tiles for M with no divisor that is a multiple of 8.
    return m


def _pick_row_tile(hp, wp, n, row_cap=1024, min_grid=4):
    """Row-tile height TH for the stage-2 halo'd conv: divides Hp, keeps TH*Wp a multiple
    of 8 and <= row_cap, preferring n*(Hp/TH) >= min_grid grid steps."""
    cands = [t for t in range(1, hp + 1)
             if hp % t == 0 and (t * wp) % 8 == 0 and t * wp <= row_cap]
    if not cands:
        # TODO(synk): masked partial row tiles for awkward Hp/Wp.
        return hp
    pref = [t for t in cands if n * (hp // t) >= min_grid]
    return max(pref) if pref else max(cands)


def _conv_stats_call(x, w, tm):
    M, K = x.shape
    C = w.shape[1]
    g = M // tm
    return pl.pallas_call(
        _conv_stats_kernel,
        grid=(g,),
        in_specs=[
            pl.BlockSpec((tm, K), lambda i: (i, 0)),
            pl.BlockSpec((K, C), lambda i: (0, 0)),      # weights: resident across grid
        ],
        out_specs=(
            pl.BlockSpec((tm, C), lambda i: (i, 0)),
            pl.BlockSpec((1, 2, C), lambda i: (i, 0, 0)),
        ),
        out_shape=(
            jax.ShapeDtypeStruct((M, C), jnp.bfloat16),
            jax.ShapeDtypeStruct((g, 2, C), jnp.float32),
        ),
        compiler_params=_cparams(1),
    )(x, w)


def _conv2_call(xpad, w, th):
    """xpad: (N, Hp+2, Wp+2, C1) bf16 zero-padded pooled map; w: (9, C1, F) bf16."""
    N, Hpad, Wpad, C1 = xpad.shape
    Hp, Wp = Hpad - 2, Wpad - 2
    F = w.shape[-1]
    hp_tiles = Hp // th
    M2 = N * Hp * Wp
    kernel = _make_conv2_kernel(th, Wp, C1, F)
    return pl.pallas_call(
        kernel,
        grid=(N, hp_tiles),
        in_specs=[
            pl.BlockSpec((1, th, Wpad, C1), lambda n, i: (n, i, 0, 0)),
            pl.BlockSpec((1, 1, Wpad, C1), lambda n, i: (n, (i + 1) * th, 0, 0)),
            pl.BlockSpec((1, 1, Wpad, C1), lambda n, i: (n, (i + 1) * th + 1, 0, 0)),
            pl.BlockSpec((9, C1, F), lambda n, i: (0, 0, 0)),   # weights resident
        ],
        out_specs=(
            pl.BlockSpec((th * Wp, F), lambda n, i: (n * hp_tiles + i, 0)),
            pl.BlockSpec((1, 2, F), lambda n, i: (n * hp_tiles + i, 0, 0)),
        ),
        out_shape=(
            jax.ShapeDtypeStruct((M2, F), jnp.bfloat16),
            jax.ShapeDtypeStruct((N * hp_tiles, 2, F), jnp.float32),
        ),
        compiler_params=_cparams(2),
    )(xpad, xpad, xpad, w)


def _bn_relu_pool_call(x4, scale, shift, tm, out_dtype):
    _, M, Cw = x4.shape
    g = M // tm
    return pl.pallas_call(
        _bn_relu_pool_kernel,
        grid=(g,),
        in_specs=[
            pl.BlockSpec((4, tm, Cw), lambda i: (0, i, 0)),
            pl.BlockSpec((1, Cw), lambda i: (0, 0)),
            pl.BlockSpec((1, Cw), lambda i: (0, 0)),
        ],
        out_specs=pl.BlockSpec((tm, Cw), lambda i: (i, 0)),
        out_shape=jax.ShapeDtypeStruct((M, Cw), out_dtype),
        compiler_params=_cparams(1),
    )(x4, scale, shift)


def _bn_relu_call(x, scale, shift, tm):
    M, Cw = x.shape
    g = M // tm
    return pl.pallas_call(
        _bn_relu_kernel,
        grid=(g,),
        in_specs=[
            pl.BlockSpec((tm, Cw), lambda i: (i, 0)),
            pl.BlockSpec((1, Cw), lambda i: (0, 0)),
            pl.BlockSpec((1, Cw), lambda i: (0, 0)),
        ],
        out_specs=pl.BlockSpec((tm, Cw), lambda i: (i, 0)),
        out_shape=jax.ShapeDtypeStruct((M, Cw), jnp.float32),
        compiler_params=_cparams(1),
    )(x, scale, shift)


# ---------------------------------------------------------------------------
# Wrapper glue (im2col, stats -> scale/shift, layout)
# ---------------------------------------------------------------------------
def _bn_scale_shift(stats, count, gamma, beta):
    """Per-tile [sum, sumsq] -> BN scale/shift (training-mode batch statistics).
    Conv bias is intentionally omitted: a per-channel constant cancels under BN."""
    s = jnp.sum(stats[:, 0, :], axis=0)
    q = jnp.sum(stats[:, 1, :], axis=0)
    mean = s / count
    var = jnp.maximum(q / count - mean * mean, 0.0)
    scale = gamma * jax.lax.rsqrt(var + _BN_EPS)
    shift = beta - mean * scale
    return (scale.reshape(1, -1).astype(jnp.float32),
            shift.reshape(1, -1).astype(jnp.float32))


def _lane_merge_factor(c, m):
    """How many consecutive rows to merge so the last dim becomes 128 lanes."""
    if c < 128 and 128 % c == 0 and m % (128 // c) == 0:
        return 128 // c
    return 1


def cnn_encoder_forward(images_nchw, params, tile_cap=2048):
    w1, b1, g1, be1, w2, b2, g2, be2 = params
    del b1, b2   # conv bias cancels exactly under training-mode BatchNorm
    N, Cin, H, W = images_nchw.shape
    assert Cin == 3 and H % 2 == 0 and W % 2 == 0
    C1 = w1.shape[-1]
    F = w2.shape[-1]
    Hp, Wp = H // 2, W // 2
    M1, M2 = N * H * W, N * Hp * Wp

    # ---- stage 1: fused preprocessing + conv1 (+ partial BN stats) ----
    # Candidate-major im2col built in ONE stack/concat expression, bf16 from the start,
    # with the K pad (27 -> 32) folded into the same concat.
    K1, K1p = 9 * Cin, 32
    xp = jnp.pad(jnp.transpose(images_nchw, (0, 2, 3, 1)).astype(jnp.bfloat16),
                 ((0, 0), (1, 1), (1, 1), (0, 0)))
    kpad = jnp.zeros((N, Hp, Wp, K1p - K1), jnp.bfloat16)
    x1 = jnp.stack(
        [jnp.concatenate(
            [xp[:, a + dy:a + dy + H:2, b + dx:b + dx + W:2, :]
             for dy in range(3) for dx in range(3)] + [kpad], axis=-1)
         for a in (0, 1) for b in (0, 1)],
        axis=0).reshape(M1, K1p)
    w1m = jnp.pad(w1.reshape(K1, C1).astype(jnp.bfloat16), ((0, K1p - K1), (0, 0)))

    tm1 = _pick_tile(M1, tile_cap)
    raw1, stats1 = _conv_stats_call(x1, w1m, tm1)                  # (M1, C1) bf16
    scale1, shift1 = _bn_scale_shift(stats1, M1, g1, be1)

    # ---- stage 1: BN + ReLU + 2x2 max-pool (lane-dense view) ----
    r1 = _lane_merge_factor(C1, M2)
    raw1v = raw1.reshape(4, M2 // r1, r1 * C1)
    sc1 = jnp.tile(scale1, (1, r1))
    sh1 = jnp.tile(shift1, (1, r1))
    tm_p = _pick_tile(M2 // r1, tile_cap)
    pooled = _bn_relu_pool_call(raw1v, sc1, sh1, tm_p, jnp.bfloat16)   # (M2//r1, r1*C1)

    # ---- stage 2: in-kernel halo'd shifted-matmul conv2 (+ partial BN stats) ----
    pooled_pad = jnp.pad(pooled.reshape(N, Hp, Wp, C1),
                         ((0, 0), (1, 1), (1, 1), (0, 0)))             # (N,Hp+2,Wp+2,C1) bf16
    TH = _pick_row_tile(Hp, Wp, N)
    assert Hp % TH == 0 and (TH * Wp) % 8 == 0
    w2m = w2.reshape(9, C1, F).astype(jnp.bfloat16)
    raw2, stats2 = _conv2_call(pooled_pad, w2m, TH)                    # (M2, F) bf16
    scale2, shift2 = _bn_scale_shift(stats2, M2, g2, be2)

    # ---- stage 2: BN + ReLU (lane-dense view) ----
    r2 = _lane_merge_factor(F, M2)
    raw2v = raw2.reshape(M2 // r2, r2 * F)
    sc2 = jnp.tile(scale2, (1, r2))
    sh2 = jnp.tile(shift2, (1, r2))
    tm2 = _pick_tile(M2 // r2, tile_cap)
    out = _bn_relu_call(raw2v, sc2, sh2, tm2)                          # (M2//r2, r2*F) f32

    return out.reshape(N, Hp, Wp, F).transpose(0, 3, 1, 2)             # NCHW


# ---------------------------------------------------------------------------
# Deterministic parameter init (matching the PyTorch module's shapes)
# ---------------------------------------------------------------------------
def init_params(key, feature_dim):
    k1, k2, k3, k4 = jax.random.split(key, 4)
    # Conv2d(3, 64, 3, padding=1): weights stored HWIO.
    w1 = jax.random.normal(k1, (3, 3, 3, 64), jnp.float32) * (1.0 / (3 * 3 * 3) ** 0.5)
    b1 = jax.random.normal(k2, (64,), jnp.float32) * 0.01
    g1 = jnp.ones((64,), jnp.float32)            # BatchNorm2d default weight
    be1 = jnp.zeros((64,), jnp.float32)          # BatchNorm2d default bias
    # Conv2d(64, feature_dim, 3, padding=1)
    w2 = jax.random.normal(k3, (3, 3, 64, feature_dim), jnp.float32) * (1.0 / (3 * 3 * 64) ** 0.5)
    b2 = jax.random.normal(k4, (feature_dim,), jnp.float32) * 0.01
    g2 = jnp.ones((feature_dim,), jnp.float32)
    be2 = jnp.zeros((feature_dim,), jnp.float32)
    return (w1, b1, g1, be1, w2, b2, g2, be2)


# ---------------------------------------------------------------------------
# Pure-JAX reference (for correctness check)
# ---------------------------------------------------------------------------
def _reference_forward(images_nchw, params):
    w1, b1, g1, be1, w2, b2, g2, be2 = params

    def conv(x_nchw, w_hwio, b):
        y = jax.lax.conv_general_dilated(
            x_nchw, w_hwio, window_strides=(1, 1), padding=((1, 1), (1, 1)),
            dimension_numbers=("NCHW", "HWIO", "NCHW"))
        return y + b[None, :, None, None]

    def bn_relu(x, g, be):
        mean = jnp.mean(x, axis=(0, 2, 3), keepdims=True)
        var = jnp.mean((x - mean) ** 2, axis=(0, 2, 3), keepdims=True)
        y = (x - mean) * jax.lax.rsqrt(var + _BN_EPS)
        y = y * g[None, :, None, None] + be[None, :, None, None]
        return jnp.maximum(y, 0.0)

    y = bn_relu(conv(images_nchw, w1, b1), g1, be1)
    y = jax.lax.reduce_window(y, -jnp.inf, jax.lax.max,
                              window_dimensions=(1, 1, 2, 2),
                              window_strides=(1, 1, 2, 2), padding="VALID")
    y = bn_relu(conv(y, w2, b2), g2, be2)
    return y


if __name__ == "__main__":
    N, H, W = 2, 32, 32          # M1 = 2048, M2 = 512 -> exercises tiling, halo conv, stats reduction
    feature_dim = 32

    key = jax.random.PRNGKey(0)
    k_img, k_par = jax.random.split(key)
    images = jax.random.normal(k_img, (N, 3, H, W), jnp.float32)   # PyTorch NCHW input
    params = init_params(k_par, feature_dim)

    fwd = jax.jit(cnn_encoder_forward)
    out = jax.block_until_ready(fwd(images, params))

    assert out.shape == (N, feature_dim, H // 2, W // 2), out.shape
    assert bool(jnp.all(jnp.isfinite(out)))

    ref = jax.block_until_ready(_reference_forward(images, params))
    max_err = float(jnp.max(jnp.abs(out - ref)))
    # bf16 MXU operands + bf16 raw-conv intermediates vs. the pure-f32 reference.
    assert jnp.allclose(out, ref, rtol=5e-2, atol=7e-2), max_err

    print("KERNEL_OK")
</pallas_src>

<mosaic_0001>
module attributes {stable_mosaic.version = 11 : i64} {
  func.func @_conv_stats_kernel(%arg0: i32, %arg1: memref<512x32xbf16, #tpu.memory_space<vmem>>, %arg2: memref<32x64xbf16, #tpu.memory_space<vmem>>, %arg3: memref<512x64xbf16, #tpu.memory_space<vmem>>, %arg4: memref<1x2x64xf32, #tpu.memory_space<vmem>>) attributes {dimension_semantics = [#tpu.dimension_semantics<parallel>], iteration_bounds = array<i64: 4>, scalar_prefetch = 0 : i64, scratch_operands = 0 : i64, tpu.core_type = #tpu.core_type<tc>, window_params = [{transform_indices = @transform_0, window_bounds = array<i64: 512, 32>}, {pipeline_mode = #tpu.pipeline_mode<synchronous>, transform_indices = @transform_1, window_bounds = array<i64: 32, 64>}, {transform_indices = @transform_2, window_bounds = array<i64: 512, 64>}, {transform_indices = @transform_3, window_bounds = array<i64: 1, 2, 64>}]} {
    %c0 = arith.constant 0 : index
    %c0_0 = arith.constant 0 : index
    %0 = vector.load %arg1[%c0, %c0_0] : memref<512x32xbf16, #tpu.memory_space<vmem>>, vector<512x32xbf16>
    %c0_1 = arith.constant 0 : index
    %c0_2 = arith.constant 0 : index
    %1 = vector.load %arg2[%c0_1, %c0_2] : memref<32x64xbf16, #tpu.memory_space<vmem>>, vector<32x64xbf16>
    %cst = arith.constant dense<0.000000e+00> : vector<512x64xf32>
    %2 = tpu.matmul %0, %1, %cst {dimension_numbers = #tpu.dot_dimension_numbers<[1], [0], [0], [1], [0, 0, 1, 1], [], []>} : vector<512x32xbf16>, vector<32x64xbf16>, vector<512x64xf32> -> vector<512x64xf32>
    %3 = arith.truncf %2 : vector<512x64xf32> to vector<512x64xbf16>
    %c0_3 = arith.constant 0 : index
    %c0_4 = arith.constant 0 : index
    %4 = vector.load %arg3[%c0_3, %c0_4] : memref<512x64xbf16, #tpu.memory_space<vmem>>, vector<512x64xbf16>
    tpu.vector_store %arg3[%c0_3, %c0_4], %3 {strides = array<i32>} : memref<512x64xbf16, #tpu.memory_space<vmem>>, vector<512x64xbf16>,
    %cst_5 = arith.constant dense<0.000000e+00> : vector<64xf32>
    %5 = vector.multi_reduction <add>, %2, %cst_5 [0] : vector<512x64xf32> to vector<64xf32>
    %6 = vector.shape_cast %5 : vector<64xf32> to vector<1x64xf32>
    %c0_6 = arith.constant 0 : index
    %c0_7 = arith.constant 0 : index
    %c0_8 = arith.constant 0 : index
    %7 = vector.load %arg4[%c0_6, %c0_7, %c0_8] : memref<1x2x64xf32, #tpu.memory_space<vmem>>, vector<1x1x64xf32>
    %8 = vector.shape_cast %7 : vector<1x1x64xf32> to vector<1x64xf32>
    %9 = vector.shape_cast %6 : vector<1x64xf32> to vector<1x1x64xf32>
    tpu.vector_store %arg4[%c0_6, %c0_7, %c0_8], %9 {strides = array<i32>} : memref<1x2x64xf32, #tpu.memory_space<vmem>>, vector<1x1x64xf32>,
    %10 = arith.mulf %2, %2 : vector<512x64xf32>
    %cst_9 = arith.constant dense<0.000000e+00> : vector<64xf32>
    %11 = vector.multi_reduction <add>, %10, %cst_9 [0] : vector<512x64xf32> to vector<64xf32>
    %12 = vector.shape_cast %11 : vector<64xf32> to vector<1x64xf32>
    %c0_10 = arith.constant 0 : index
    %c1 = arith.constant 1 : index
    %c0_11 = arith.constant 0 : index
    %13 = vector.load %arg4[%c0_10, %c1, %c0_11] : memref<1x2x64xf32, #tpu.memory_space<vmem>>, vector<1x1x64xf32>
    %14 = vector.shape_cast %13 : vector<1x1x64xf32> to vector<1x64xf32>
    %15 = vector.shape_cast %12 : vector<1x64xf32> to vector<1x1x64xf32>
    tpu.vector_store %arg4[%c0_10, %c1, %c0_11], %15 {strides = array<i32>} : memref<1x2x64xf32, #tpu.memory_space<vmem>>, vector<1x1x64xf32>,
    return
  }
  func.func @transform_0(%arg0: i32) -> (i32, i32) {
    %c0_i32 = arith.constant 0 : i32
    %c0_i32_0 = arith.constant 0 : i32
    return %arg0, %c0_i32 : i32, i32
  }
  func.func @transform_1(%arg0: i32) -> (i32, i32) {
    %c0_i32 = arith.constant 0 : i32
    %c0_i32_0 = arith.constant 0 : i32
    %c0_i32_1 = arith.constant 0 : i32
    return %c0_i32, %c0_i32_0 : i32, i32
  }
  func.func @transform_2(%arg0: i32) -> (i32, i32) {
    %c0_i32 = arith.constant 0 : i32
    %c0_i32_0 = arith.constant 0 : i32
    return %arg0, %c0_i32 : i32, i32
  }
  func.func @transform_3(%arg0: i32) -> (i32, i32, i32) {
    %c0_i32 = arith.constant 0 : i32
    %c0_i32_0 = arith.constant 0 : i32
    %c0_i32_1 = arith.constant 0 : i32
    return %arg0, %c0_i32, %c0_i32_0 : i32, i32, i32
  }
}

module attributes {stable_mosaic.version = 11 : i64} {
  func.func @_bn_relu_pool_kernel(%arg0: i32, %arg1: memref<4x64x128xbf16, #tpu.memory_space<vmem>>, %arg2: memref<1x128xf32, #tpu.memory_space<vmem>>, %arg3: memref<1x128xf32, #tpu.memory_space<vmem>>, %arg4: memref<64x128xbf16, #tpu.memory_space<vmem>>) attributes {dimension_semantics = [#tpu.dimension_semantics<parallel>], iteration_bounds = array<i64: 4>, scalar_prefetch = 0 : i64, scratch_operands = 0 : i64, tpu.core_type = #tpu.core_type<tc>, window_params = [{transform_indices = @transform_0, window_bounds = array<i64: 4, 64, 128>}, {pipeline_mode = #tpu.pipeline_mode<synchronous>, transform_indices = @transform_1, window_bounds = array<i64: 1, 128>}, {pipeline_mode = #tpu.pipeline_mode<synchronous>, transform_indices = @transform_2, window_bounds = array<i64: 1, 128>}, {transform_indices = @transform_3, window_bounds = array<i64: 64, 128>}]} {
    %c0 = arith.constant 0 : index
    %c0_0 = arith.constant 0 : index
    %0 = vector.load %arg2[%c0, %c0_0] : memref<1x128xf32, #tpu.memory_space<vmem>>, vector<1x128xf32>
    %c0_1 = arith.constant 0 : index
    %c0_2 = arith.constant 0 : index
    %1 = vector.load %arg3[%c0_1, %c0_2] : memref<1x128xf32, #tpu.memory_space<vmem>>, vector<1x128xf32>
    %c0_3 = arith.constant 0 : index
    %c0_4 = arith.constant 0 : index
    %c0_5 = arith.constant 0 : index
    %2 = vector.load %arg1[%c0_3, %c0_4, %c0_5] : memref<4x64x128xbf16, #tpu.memory_space<vmem>>, vector<1x64x128xbf16>
    %3 = vector.shape_cast %2 : vector<1x64x128xbf16> to vector<64x128xbf16>
    %4 = arith.extf %3 : vector<64x128xbf16> to vector<64x128xf32>
    %5 = vector.broadcast %0 : vector<1x128xf32> to vector<64x128xf32>
    %6 = arith.mulf %4, %5 : vector<64x128xf32>
    %7 = vector.broadcast %1 : vector<1x128xf32> to vector<64x128xf32>
    %8 = arith.addf %6, %7 : vector<64x128xf32>
    %cst = arith.constant 0.000000e+00 : f32
    %9 = vector.broadcast %cst : f32 to vector<64x128xf32>
    %10 = arith.maximumf %8, %9 : vector<64x128xf32>
    %c1 = arith.constant 1 : index
    %c0_6 = arith.constant 0 : index
    %c0_7 = arith.constant 0 : index
    %11 = vector.load %arg1[%c1, %c0_6, %c0_7] : memref<4x64x128xbf16, #tpu.memory_space<vmem>>, vector<1x64x128xbf16>
    %12 = vector.shape_cast %11 : vector<1x64x128xbf16> to vector<64x128xbf16>
    %13 = arith.extf %12 : vector<64x128xbf16> to vector<64x128xf32>
    %14 = vector.broadcast %0 : vector<1x128xf32> to vector<64x128xf32>
    %15 = arith.mulf %13, %14 : vector<64x128xf32>
    %16 = vector.broadcast %1 : vector<1x128xf32> to vector<64x128xf32>
    %17 = arith.addf %15, %16 : vector<64x128xf32>
    %cst_8 = arith.constant 0.000000e+00 : f32
    %18 = vector.broadcast %cst_8 : f32 to vector<64x128xf32>
    %19 = arith.maximumf %17, %18 : vector<64x128xf32>
    %20 = arith.maximumf %10, %19 : vector<64x128xf32>
    %c2 = arith.constant 2 : index
    %c0_9 = arith.constant 0 : index
    %c0_10 = arith.constant 0 : index
    %21 = vector.load %arg1[%c2, %c0_9, %c0_10] : memref<4x64x128xbf16, #tpu.memory_space<vmem>>, vector<1x64x128xbf16>
    %22 = vector.shape_cast %21 : vector<1x64x128xbf16> to vector<64x128xbf16>
    %23 = arith.extf %22 : vector<64x128xbf16> to vector<64x128xf32>
    %24 = vector.broadcast %0 : vector<1x128xf32> to vector<64x128xf32>
    %25 = arith.mulf %23, %24 : vector<64x128xf32>
    %26 = vector.broadcast %1 : vector<1x128xf32> to vector<64x128xf32>
    %27 = arith.addf %25, %26 : vector<64x128xf32>
    %cst_11 = arith.constant 0.000000e+00 : f32
    %28 = vector.broadcast %cst_11 : f32 to vector<64x128xf32>
    %29 = arith.maximumf %27, %28 : vector<64x128xf32>
    %c3 = arith.constant 3 : index
    %c0_12 = arith.constant 0 : index
    %c0_13 = arith.constant 0 : index
    %30 = vector.load %arg1[%c3, %c0_12, %c0_13] : memref<4x64x128xbf16, #tpu.memory_space<vmem>>, vector<1x64x128xbf16>
    %31 = vector.shape_cast %30 : vector<1x64x128xbf16> to vector<64x128xbf16>
    %32 = arith.extf %31 : vector<64x128xbf16> to vector<64x128xf32>
    %33 = vector.broadcast %0 : vector<1x128xf32> to vector<64x128xf32>
    %34 = arith.mulf %32, %33 : vector<64x128xf32>
    %35 = vector.broadcast %1 : vector<1x128xf32> to vector<64x128xf32>
    %36 = arith.addf %34, %35 : vector<64x128xf32>
    %cst_14 = arith.constant 0.000000e+00 : f32
    %37 = vector.broadcast %cst_14 : f32 to vector<64x128xf32>
    %38 = arith.maximumf %36, %37 : vector<64x128xf32>
    %39 = arith.maximumf %29, %38 : vector<64x128xf32>
    %40 = arith.maximumf %20, %39 : vector<64x128xf32>
    %41 = arith.truncf %40 : vector<64x128xf32> to vector<64x128xbf16>
    %c0_15 = arith.constant 0 : index
    %c0_16 = arith.constant 0 : index
    %42 = vector.load %arg4[%c0_15, %c0_16] : memref<64x128xbf16, #tpu.memory_space<vmem>>, vector<64x128xbf16>
    tpu.vector_store %arg4[%c0_15, %c0_16], %41 {strides = array<i32>} : memref<64x128xbf16, #tpu.memory_space<vmem>>, vector<64x128xbf16>,
    return
  }
  func.func @transform_0(%arg0: i32) -> (i32, i32, i32) {
    %c0_i32 = arith.constant 0 : i32
    %c0_i32_0 = arith.constant 0 : i32
    %c0_i32_1 = arith.constant 0 : i32
    return %c0_i32, %arg0, %c0_i32_0 : i32, i32, i32
  }
  func.func @transform_1(%arg0: i32) -> (i32, i32) {
    %c0_i32 = arith.constant 0 : i32
    %c0_i32_0 = arith.constant 0 : i32
    %c0_i32_1 = arith.constant 0 : i32
    return %c0_i32, %c0_i32_0 : i32, i32
  }
  func.func @transform_2(%arg0: i32) -> (i32, i32) {
    %c0_i32 = arith.constant 0 : i32
    %c0_i32_0 = arith.constant 0 : i32
    %c0_i32_1 = arith.constant 0 : i32
    return %c0_i32, %c0_i32_0 : i32, i32
  }
  func.func @transform_3(%arg0: i32) -> (i32, i32) {
    %c0_i32 = arith.constant 0 : i32
    %c0_i32_0 = arith.constant 0 : i32
    return %arg0, %c0_i32 : i32, i32
  }
}

module attributes {stable_mosaic.version = 11 : i64} {
  func.func @kernel(%arg0: i32, %arg1: i32, %arg2: memref<1x8x18x64xbf16, #tpu.memory_space<vmem>>, %arg3: memref<1x1x18x64xbf16, #tpu.memory_space<vmem>>, %arg4: memref<1x1x18x64xbf16, #tpu.memory_space<vmem>>, %arg5: memref<9x64x32xbf16, #tpu.memory_space<vmem>>, %arg6: memref<128x32xbf16, #tpu.memory_space<vmem>>, %arg7: memref<1x2x32xf32, #tpu.memory_space<vmem>>) attributes {dimension_semantics = [#tpu.dimension_semantics<parallel>, #tpu.dimension_semantics<parallel>], iteration_bounds = array<i64: 2, 2>, scalar_prefetch = 0 : i64, scratch_operands = 0 : i64, tpu.core_type = #tpu.core_type<tc>, window_params = [{transform_indices = @transform_0, window_bounds = array<i64: 1, 8, 18, 64>}, {transform_indices = @transform_1, window_bounds = array<i64: 1, 1, 18, 64>}, {transform_indices = @transform_2, window_bounds = array<i64: 1, 1, 18, 64>}, {pipeline_mode = #tpu.pipeline_mode<synchronous>, transform_indices = @transform_3, window_bounds = array<i64: 9, 64, 32>}, {transform_indices = @transform_4, window_bounds = array<i64: 128, 32>}, {transform_indices = @transform_5, window_bounds = array<i64: 1, 2, 32>}]} {
    %c0 = arith.constant 0 : index
    %c0_0 = arith.constant 0 : index
    %c0_1 = arith.constant 0 : index
    %c0_2 = arith.constant 0 : index
    %0 = vector.load %arg2[%c0, %c0_0, %c0_1, %c0_2] : memref<1x8x18x64xbf16, #tpu.memory_space<vmem>>, vector<1x8x18x64xbf16>
    %1 = vector.shape_cast %0 : vector<1x8x18x64xbf16> to vector<8x18x64xbf16>
    %c0_3 = arith.constant 0 : index
    %c0_4 = arith.constant 0 : index
    %c0_5 = arith.constant 0 : index
    %c0_6 = arith.constant 0 : index
    %2 = vector.load %arg3[%c0_3, %c0_4, %c0_5, %c0_6] : memref<1x1x18x64xbf16, #tpu.memory_space<vmem>>, vector<1x1x18x64xbf16>
    %3 = vector.shape_cast %2 : vector<1x1x18x64xbf16> to vector<1x18x64xbf16>
    %c0_7 = arith.constant 0 : index
    %c0_8 = arith.constant 0 : index
    %c0_9 = arith.constant 0 : index
    %c0_10 = arith.constant 0 : index
    %4 = vector.load %arg4[%c0_7, %c0_8, %c0_9, %c0_10] : memref<1x1x18x64xbf16, #tpu.memory_space<vmem>>, vector<1x1x18x64xbf16>
    %5 = vector.shape_cast %4 : vector<1x1x18x64xbf16> to vector<1x18x64xbf16>
    %6 = tpu.concatenate %1, %3, %5 in 0 : vector<8x18x64xbf16>, vector<1x18x64xbf16>, vector<1x18x64xbf16> -> vector<10x18x64xbf16>
    %cst = arith.constant 0.000000e+00 : f32
    %7 = vector.broadcast %cst : f32 to vector<128x32xf32>
    %8 = vector.extract_strided_slice %6 {offsets = [0, 0, 0], sizes = [8, 16, 64], strides = [1, 1, 1]} : vector<10x18x64xbf16> to vector<8x16x64xbf16>
    %9 = vector.shape_cast %8 : vector<8x16x64xbf16> to vector<128x64xbf16>
    %c0_11 = arith.constant 0 : index
    %c0_12 = arith.constant 0 : index
    %c0_13 = arith.constant 0 : index
    %10 = vector.load %arg5[%c0_11, %c0_12, %c0_13] : memref<9x64x32xbf16, #tpu.memory_space<vmem>>, vector<1x64x32xbf16>
    %11 = vector.shape_cast %10 : vector<1x64x32xbf16> to vector<64x32xbf16>
    %cst_14 = arith.constant dense<0.000000e+00> : vector<128x32xf32>
    %12 = tpu.matmul %9, %11, %cst_14 {dimension_numbers = #tpu.dot_dimension_numbers<[1], [0], [0], [1], [0, 0, 1, 1], [], []>} : vector<128x64xbf16>, vector<64x32xbf16>, vector<128x32xf32> -> vector<128x32xf32>
    %13 = arith.addf %7, %12 : vector<128x32xf32>
    %14 = vector.extract_strided_slice %6 {offsets = [0, 1, 0], sizes = [8, 16, 64], strides = [1, 1, 1]} : vector<10x18x64xbf16> to vector<8x16x64xbf16>
    %15 = vector.shape_cast %14 : vector<8x16x64xbf16> to vector<128x64xbf16>
    %c1 = arith.constant 1 : index
    %c0_15 = arith.constant 0 : index
    %c0_16 = arith.constant 0 : index
    %16 = vector.load %arg5[%c1, %c0_15, %c0_16] : memref<9x64x32xbf16, #tpu.memory_space<vmem>>, vector<1x64x32xbf16>
    %17 = vector.shape_cast %16 : vector<1x64x32xbf16> to vector<64x32xbf16>
    %cst_17 = arith.constant dense<0.000000e+00> : vector<128x32xf32>
    %18 = tpu.matmul %15, %17, %cst_17 {dimension_numbers = #tpu.dot_dimension_numbers<[1], [0], [0], [1], [0, 0, 1, 1], [], []>} : vector<128x64xbf16>, vector<64x32xbf16>, vector<128x32xf32> -> vector<128x32xf32>
    %19 = arith.addf %13, %18 : vector<128x32xf32>
    %20 = vector.extract_strided_slice %6 {offsets = [0, 2, 0], sizes = [8, 16, 64], strides = [1, 1, 1]} : vector<10x18x64xbf16> to vector<8x16x64xbf16>
    %21 = vector.shape_cast %20 : vector<8x16x64xbf16> to vector<128x64xbf16>
    %c2 = arith.constant 2 : index
    %c0_18 = arith.constant 0 : index
    %c0_19 = arith.constant 0 : index
    %22 = vector.load %arg5[%c2, %c0_18, %c0_19] : memref<9x64x32xbf16, #tpu.memory_space<vmem>>, vector<1x64x32xbf16>
    %23 = vector.shape_cast %22 : vector<1x64x32xbf16> to vector<64x32xbf16>
    %cst_20 = arith.constant dense<0.000000e+00> : vector<128x32xf32>
    %24 = tpu.matmul %21, %23, %cst_20 {dimension_numbers = #tpu.dot_dimension_numbers<[1], [0], [0], [1], [0, 0, 1, 1], [], []>} : vector<128x64xbf16>, vector<64x32xbf16>, vector<128x32xf32> -> vector<128x32xf32>
    %25 = arith.addf %19, %24 : vector<128x32xf32>
    %26 = vector.extract_strided_slice %6 {offsets = [1, 0, 0], sizes = [8, 16, 64], strides = [1, 1, 1]} : vector<10x18x64xbf16> to vector<8x16x64xbf16>
    %27 = vector.shape_cast %26 : vector<8x16x64xbf16> to vector<128x64xbf16>
    %c3 = arith.constant 3 : index
    %c0_21 = arith.constant 0 : index
    %c0_22 = arith.constant 0 : index
    %28 = vector.load %arg5[%c3, %c0_21, %c0_22] : memref<9x64x32xbf16, #tpu.memory_space<vmem>>, vector<1x64x32xbf16>
    %29 = vector.shape_cast %28 : vector<1x64x32xbf16> to vector<64x32xbf16>
    %cst_23 = arith.constant dense<0.000000e+00> : vector<128x32xf32>
    %30 = tpu.matmul %27, %29, %cst_23 {dimension_numbers = #tpu.dot_dimension_numbers<[1], [0], [0], [1], [0, 0, 1, 1], [], []>} : vector<128x64xbf16>, vector<64x32xbf16>, vector<128x32xf32> -> vector<128x32xf32>
    %31 = arith.addf %25, %30 : vector<128x32xf32>
    %32 = vector.extract_strided_slice %6 {offsets = [1, 1, 0], sizes = [8, 16, 64], strides = [1, 1, 1]} : vector<10x18x64xbf16> to vector<8x16x64xbf16>
    %33 = vector.shape_cast %32 : vector<8x16x64xbf16> to vector<128x64xbf16>
    %c4 = arith.constant 4 : index
    %c0_24 = arith.constant 0 : index
    %c0_25 = arith.constant 0 : index
    %34 = vector.load %arg5[%c4, %c0_24, %c0_25] : memref<9x64x32xbf16, #tpu.memory_space<vmem>>, vector<1x64x32xbf16>
    %35 = vector.shape_cast %34 : vector<1x64x32xbf16> to vector<64x32xbf16>
    %cst_26 = arith.constant dense<0.000000e+00> : vector<128x32xf32>
    %36 = tpu.matmul %33, %35, %cst_26 {dimension_numbers = #tpu.dot_dimension_numbers<[1], [0], [0], [1], [0, 0, 1, 1], [], []>} : vector<128x64xbf16>, vector<64x32xbf16>, vector<128x32xf32> -> vector<128x32xf32>
    %37 = arith.addf %31, %36 : vector<128x32xf32>
    %38 = vector.extract_strided_slice %6 {offsets = [1, 2, 0], sizes = [8, 16, 64], strides = [1, 1, 1]} : vector<10x18x64xbf16> to vector<8x16x64xbf16>
    %39 = vector.shape_cast %38 : vector<8x16x64xbf16> to vector<128x64xbf16>
    %c5 = arith.constant 5 : index
    %c0_27 = arith.constant 0 : index
    %c0_28 = arith.constant 0 : index
    %40 = vector.load %arg5[%c5, %c0_27, %c0_28] : memref<9x64x32xbf16, #tpu.memory_space<vmem>>, vector<1x64x32xbf16>
    %41 = vector.shape_cast %40 : vector<1x64x32xbf16> to vector<64x32xbf16>
    %cst_29 = arith.constant dense<0.000000e+00> : vector<128x32xf32>
    %42 = tpu.matmul %39, %41, %cst_29 {dimension_numbers = #tpu.dot_dimension_numbers<[1], [0], [0], [1], [0, 0, 1, 1], [], []>} : vector<128x64xbf16>, vector<64x32xbf16>, vector<128x32xf32> -> vector<128x32xf32>
    %43 = arith.addf %37, %42 : vector<128x32xf32>
    %44 = vector.extract_strided_slice %6 {offsets = [2, 0, 0], sizes = [8, 16, 64], strides = [1, 1, 1]} : vector<10x18x64xbf16> to vector<8x16x64xbf16>
    %45 = vector.shape_cast %44 : vector<8x16x64xbf16> to vector<128x64xbf16>
    %c6 = arith.constant 6 : index
    %c0_30 = arith.constant 0 : index
    %c0_31 = arith.constant 0 : index
    %46 = vector.load %arg5[%c6, %c0_30, %c0_31] : memref<9x64x32xbf16, #tpu.memory_space<vmem>>, vector<1x64x32xbf16>
    %47 = vector.shape_cast %46 : vector<1x64x32xbf16> to vector<64x32xbf16>
    %cst_32 = arith.constant dense<0.000000e+00> : vector<128x32xf32>
    %48 = tpu.matmul %45, %47, %cst_32 {dimension_numbers = #tpu.dot_dimension_numbers<[1], [0], [0], [1], [0, 0, 1, 1], [], []>} : vector<128x64xbf16>, vector<64x32xbf16>, vector<128x32xf32> -> vector<128x32xf32>
    %49 = arith.addf %43, %48 : vector<128x32xf32>
    %50 = vector.extract_strided_slice %6 {offsets = [2, 1, 0], sizes = [8, 16, 64], strides = [1, 1, 1]} : vector<10x18x64xbf16> to vector<8x16x64xbf16>
    %51 = vector.shape_cast %50 : vector<8x16x64xbf16> to vector<128x64xbf16>
    %c7 = arith.constant 7 : index
    %c0_33 = arith.constant 0 : index
    %c0_34 = arith.constant 0 : index
    %52 = vector.load %arg5[%c7, %c0_33, %c0_34] : memref<9x64x32xbf16, #tpu.memory_space<vmem>>, vector<1x64x32xbf16>
    %53 = vector.shape_cast %52 : vector<1x64x32xbf16> to vector<64x32xbf16>
    %cst_35 = arith.constant dense<0.000000e+00> : vector<128x32xf32>
    %54 = tpu.matmul %51, %53, %cst_35 {dimension_numbers = #tpu.dot_dimension_numbers<[1], [0], [0], [1], [0, 0, 1, 1], [], []>} : vector<128x64xbf16>, vector<64x32xbf16>, vector<128x32xf32> -> vector<128x32xf32>
    %55 = arith.addf %49, %54 : vector<128x32xf32>
    %56 = vector.extract_strided_slice %6 {offsets = [2, 2, 0], sizes = [8, 16, 64], strides = [1, 1, 1]} : vector<10x18x64xbf16> to vector<8x16x64xbf16>
    %57 = vector.shape_cast %56 : vector<8x16x64xbf16> to vector<128x64xbf16>
    %c8 = arith.constant 8 : index
    %c0_36 = arith.constant 0 : index
    %c0_37 = arith.constant 0 : index
    %58 = vector.load %arg5[%c8, %c0_36, %c0_37] : memref<9x64x32xbf16, #tpu.memory_space<vmem>>, vector<1x64x32xbf16>
    %59 = vector.shape_cast %58 : vector<1x64x32xbf16> to vector<64x32xbf16>
    %cst_38 = arith.constant dense<0.000000e+00> : vector<128x32xf32>
    %60 = tpu.matmul %57, %59, %cst_38 {dimension_numbers = #tpu.dot_dimension_numbers<[1], [0], [0], [1], [0, 0, 1, 1], [], []>} : vector<128x64xbf16>, vector<64x32xbf16>, vector<128x32xf32> -> vector<128x32xf32>
    %61 = arith.addf %55, %60 : vector<128x32xf32>
    %62 = arith.truncf %61 : vector<128x32xf32> to vector<128x32xbf16>
    %c0_39 = arith.constant 0 : index
    %c0_40 = arith.constant 0 : index
    %63 = vector.load %arg6[%c0_39, %c0_40] : memref<128x32xbf16, #tpu.memory_space<vmem>>, vector<128x32xbf16>
    tpu.vector_store %arg6[%c0_39, %c0_40], %62 {strides = array<i32>} : memref<128x32xbf16, #tpu.memory_space<vmem>>, vector<128x32xbf16>,
    %cst_41 = arith.constant dense<0.000000e+00> : vector<32xf32>
    %64 = vector.multi_reduction <add>, %61, %cst_41 [0] : vector<128x32xf32> to vector<32xf32>
    %65 = vector.shape_cast %64 : vector<32xf32> to vector<1x32xf32>
    %c0_42 = arith.constant 0 : index
    %c0_43 = arith.constant 0 : index
    %c0_44 = arith.constant 0 : index
    %66 = vector.load %arg7[%c0_42, %c0_43, %c0_44] : memref<1x2x32xf32, #tpu.memory_space<vmem>>, vector<1x1x32xf32>
    %67 = vector.shape_cast %66 : vector<1x1x32xf32> to vector<1x32xf32>
    %68 = vector.shape_cast %65 : vector<1x32xf32> to vector<1x1x32xf32>
    tpu.vector_store %arg7[%c0_42, %c0_43, %c0_44], %68 {strides = array<i32>} : memref<1x2x32xf32, #tpu.memory_space<vmem>>, vector<1x1x32xf32>,
    %69 = arith.mulf %61, %61 : vector<128x32xf32>
    %cst_45 = arith.constant dense<0.000000e+00> : vector<32xf32>
    %70 = vector.multi_reduction <add>, %69, %cst_45 [0] : vector<128x32xf32> to vector<32xf32>
    %71 = vector.shape_cast %70 : vector<32xf32> to vector<1x32xf32>
    %c0_46 = arith.constant 0 : index
    %c1_47 = arith.constant 1 : index
    %c0_48 = arith.constant 0 : index
    %72 = vector.load %arg7[%c0_46, %c1_47, %c0_48] : memref<1x2x32xf32, #tpu.memory_space<vmem>>, vector<1x1x32xf32>
    %73 = vector.shape_cast %72 : vector<1x1x32xf32> to vector<1x32xf32>
    %74 = vector.shape_cast %71 : vector<1x32xf32> to vector<1x1x32xf32>
    tpu.vector_store %arg7[%c0_46, %c1_47, %c0_48], %74 {strides = array<i32>} : memref<1x2x32xf32, #tpu.memory_space<vmem>>, vector<1x1x32xf32>,
    return
  }
  func.func @transform_0(%arg0: i32, %arg1: i32) -> (i32, i32, i32, i32) {
    %c0_i32 = arith.constant 0 : i32
    %c0_i32_0 = arith.constant 0 : i32
    %c0_i32_1 = arith.constant 0 : i32
    return %arg0, %arg1, %c0_i32, %c0_i32_0 : i32, i32, i32, i32
  }
  func.func @transform_1(%arg0: i32, %arg1: i32) -> (i32, i32, i32, i32) {
    %c1_i32 = arith.constant 1 : i32
    %0 = arith.addi %arg1, %c1_i32 : i32
    %c8_i32 = arith.constant 8 : i32
    %1 = arith.muli %0, %c8_i32 : i32
    %c0_i32 = arith.constant 0 : i32
    %c0_i32_0 = arith.constant 0 : i32
    %c0_i32_1 = arith.constant 0 : i32
    return %arg0, %1, %c0_i32, %c0_i32_0 : i32, i32, i32, i32
  }
  func.func @transform_2(%arg0: i32, %arg1: i32) -> (i32, i32, i32, i32) {
    %c1_i32 = arith.constant 1 : i32
    %0 = arith.addi %arg1, %c1_i32 : i32
    %c8_i32 = arith.constant 8 : i32
    %1 = arith.muli %0, %c8_i32 : i32
    %c1_i32_0 = arith.constant 1 : i32
    %2 = arith.addi %1, %c1_i32_0 : i32
    %c0_i32 = arith.constant 0 : i32
    %c0_i32_1 = arith.constant 0 : i32
    %c0_i32_2 = arith.constant 0 : i32
    return %arg0, %2, %c0_i32, %c0_i32_1 : i32, i32, i32, i32
  }
  func.func @transform_3(%arg0: i32, %arg1: i32) -> (i32, i32, i32) {
    %c0_i32 = arith.constant 0 : i32
    %c0_i32_0 = arith.constant 0 : i32
    %c0_i32_1 = arith.constant 0 : i32
    %c0_i32_2 = arith.constant 0 : i32
    return %c0_i32, %c0_i32_0, %c0_i32_1 : i32, i32, i32
  }
  func.func @transform_4(%arg0: i32, %arg1: i32) -> (i32, i32) {
    %c2_i32 = arith.constant 2 : i32
    %0 = arith.muli %arg0, %c2_i32 : i32
    %1 = arith.addi %0, %arg1 : i32
    %c0_i32 = arith.constant 0 : i32
    %c0_i32_0 = arith.constant 0 : i32
    return %1, %c0_i32 : i32, i32
  }
  func.func @transform_5(%arg0: i32, %arg1: i32) -> (i32, i32, i32) {
    %c2_i32 = arith.constant 2 : i32
    %0 = arith.muli %arg0, %c2_i32 : i32
    %1 = arith.addi %0, %arg1 : i32
    %c0_i32 = arith.constant 0 : i32
    %c0_i32_0 = arith.constant 0 : i32
    %c0_i32_1 = arith.constant 0 : i32
    return %1, %c0_i32, %c0_i32_0 : i32, i32, i32
  }
}

module attributes {stable_mosaic.version = 11 : i64} {
  func.func @_bn_relu_kernel(%arg0: i32, %arg1: memref<32x128xbf16, #tpu.memory_space<vmem>>, %arg2: memref<1x128xf32, #tpu.memory_space<vmem>>, %arg3: memref<1x128xf32, #tpu.memory_space<vmem>>, %arg4: memref<32x128xf32, #tpu.memory_space<vmem>>) attributes {dimension_semantics = [#tpu.dimension_semantics<parallel>], iteration_bounds = array<i64: 4>, scalar_prefetch = 0 : i64, scratch_operands = 0 : i64, tpu.core_type = #tpu.core_type<tc>, window_params = [{transform_indices = @transform_0, window_bounds = array<i64: 32, 128>}, {pipeline_mode = #tpu.pipeline_mode<synchronous>, transform_indices = @transform_1, window_bounds = array<i64: 1, 128>}, {pipeline_mode = #tpu.pipeline_mode<synchronous>, transform_indices = @transform_2, window_bounds = array<i64: 1, 128>}, {transform_indices = @transform_3, window_bounds = array<i64: 32, 128>}]} {
    %c0 = arith.constant 0 : index
    %c0_0 = arith.constant 0 : index
    %0 = vector.load %arg1[%c0, %c0_0] : memref<32x128xbf16, #tpu.memory_space<vmem>>, vector<32x128xbf16>
    %1 = arith.extf %0 : vector<32x128xbf16> to vector<32x128xf32>
    %c0_1 = arith.constant 0 : index
    %c0_2 = arith.constant 0 : index
    %2 = vector.load %arg2[%c0_1, %c0_2] : memref<1x128xf32, #tpu.memory_space<vmem>>, vector<1x128xf32>
    %3 = vector.broadcast %2 : vector<1x128xf32> to vector<32x128xf32>
    %4 = arith.mulf %1, %3 : vector<32x128xf32>
    %c0_3 = arith.constant 0 : index
    %c0_4 = arith.constant 0 : index
    %5 = vector.load %arg3[%c0_3, %c0_4] : memref<1x128xf32, #tpu.memory_space<vmem>>, vector<1x128xf32>
    %6 = vector.broadcast %5 : vector<1x128xf32> to vector<32x128xf32>
    %7 = arith.addf %4, %6 : vector<32x128xf32>
    %cst = arith.constant 0.000000e+00 : f32
    %8 = vector.broadcast %cst : f32 to vector<32x128xf32>
    %9 = arith.maximumf %7, %8 : vector<32x128xf32>
    %c0_5 = arith.constant 0 : index
    %c0_6 = arith.constant 0 : index
    %10 = vector.load %arg4[%c0_5, %c0_6] : memref<32x128xf32, #tpu.memory_space<vmem>>, vector<32x128xf32>
    tpu.vector_store %arg4[%c0_5, %c0_6], %9 {strides = array<i32>} : memref<32x128xf32, #tpu.memory_space<vmem>>, vector<32x128xf32>,
    return
  }
  func.func @transform_0(%arg0: i32) -> (i32, i32) {
    %c0_i32 = arith.constant 0 : i32
    %c0_i32_0 = arith.constant 0 : i32
    return %arg0, %c0_i32 : i32, i32
  }
  func.func @transform_1(%arg0: i32) -> (i32, i32) {
    %c0_i32 = arith.constant 0 : i32
    %c0_i32_0 = arith.constant 0 : i32
    %c0_i32_1 = arith.constant 0 : i32
    return %c0_i32, %c0_i32_0 : i32, i32
  }
  func.func @transform_2(%arg0: i32) -> (i32, i32) {
    %c0_i32 = arith.constant 0 : i32
    %c0_i32_0 = arith.constant 0 : i32
    %c0_i32_1 = arith.constant 0 : i32
    return %c0_i32, %c0_i32_0 : i32, i32
  }
  func.func @transform_3(%arg0: i32) -> (i32, i32) {
    %c0_i32 = arith.constant 0 : i32
    %c0_i32_0 = arith.constant 0 : i32
    return %arg0, %c0_i32 : i32, i32
  }
}

</mosaic_0001>

<bundles_post_ra>
// kernel: cnn_encoder_forward.5
= control target key start
LH: loop header
LB: loop body
LE: loop exit
PB: predicated region body
PF: predicated region fallthrough
CT: control target
= control target key end

     0   :  { %s870_s12 = smov 0   ;;  %s872_s13 = smov 0   ;;  %s1042_s0 = inlined_call_operand.vmem [shape: bf16[4,256,128], index: 0, kind: input, shape index: {}]   ;;  %s1043_s1 = inlined_call_operand.vmem [shape: f32[1,128], index: 1, kind: input, shape index: {}]   ;;  %s1044_s2 = inlined_call_operand.vmem [shape: f32[1,128], index: 2, kind: input, shape index: {}]   ;;  %s1045_s3 = inlined_call_operand.vmem [shape: bf16[256,128], index: 3, kind: output, shape index: {}]  }
   0x1   :  { %s874_s14 = smov 0  }
   0x2 LB: > { %s644_s15 = sadd.s32 4294967295, %s848_s14   ;;  %s887_s16 = sadd.s32 1, %s848_s14   ;;  %s848_s14 = sphi %s874_s14, %s1048_s14   ;;  %s844_s13 = sphi %s872_s13, %s1047_s13   ;;  %s840_s12 = sphi %s870_s12, %s1046_s12  }
   0x3   : > { %s17_s17 = ssub.s32 %s848_s14, %s887_s16  ;;  %s20_s18 = sadd.s32 1, %s844_s13 }
   0x4   : > { %p18_p0 = scmp.eq.s32.totalorder %s17_s17, 0  ;;  %p27_p1 = scmp.ne.s32.totalorder %s844_s13, %s840_s12 }
   0x5   : > { %p28_p2 = scmp.eq.s32.totalorder %s848_s14, 0  ;;  %p647_p4 = scmp.ge.s32.totalorder %s848_s14, 4 }
   0x6   : > { %s896_s19 = scalar_select %p18_p0, %s844_s13, %s20_s18  }
   0x7   : > { %p29_p3 = por %p28_p2, %p27_p1  ;;  %127 = sbr.rel (%p647_p4) target bundleno = 24 (0x18), region = 24 }
   0xc   : > { %130 = sbr.rel (!%p29_p3) target bundleno = 24 (0x18), region = 28  ;;  %s132_s20 = sand.u32 (%p29_p3), 1, %s844_s13  }
   0xd   : > { %s691_s21 = sshll.u32 (%p29_p3), %s848_s14, 5  ;;  %s648_s22 = sshll.u32 (%p29_p3), %s132_s20, 7 }
   0xe   : > { %s904_s25 = scalar_lea.vmem (%p29_p3), %s1042_s0, %s691_s21  ;;  %s134_s26 = scalar_lea.vmem (%p29_p3), [#allocation2], %s648_s22 }
   0xf   : > { %v154_v0 = vld [vmem:[%s904_s25] sm:$0xff] (%p29_p3)   ;;  %v158_v1 = vld [vmem:[%s904_s25 + $0x8] sm:$0xff] (%p29_p3)   ;;  %v162_v2 = vld [vmem:[%s904_s25 + $0x10] sm:$0xff] (%p29_p3)  }
  0x10   : > { %155 = vst [vmem:[%s134_s26] sm:$0xff] (%p29_p3), %v154_v0   ;;  %159 = vst [vmem:[%s134_s26 + $0x8] sm:$0xff] (%p29_p3), %v158_v1   ;;  %v166_v3 = vld [vmem:[%s904_s25 + $0x18] sm:$0xff] (%p29_p3)   ;;  %v170_v4 = vld [vmem:[%s904_s25 + $0x80] sm:$0xff] (%p29_p3)  }
  0x11   : > { %163 = vst [vmem:[%s134_s26 + $0x10] sm:$0xff] %v162_v2   ;;  %v174_v5 = vld [vmem:[%s904_s25 + $0x88] sm:$0xff]   ;;  %167 = vst [vmem:[%s134_s26 + $0x18] sm:$0xff] %v166_v3   ;;  %v178_v6 = vld [vmem:[%s904_s25 + $0x90] sm:$0xff]  }
  0x12   : > { %171 = vst [vmem:[%s134_s26 + $0x20] sm:$0xff] %v170_v4   ;;  %175 = vst [vmem:[%s134_s26 + $0x28] sm:$0xff] %v174_v5   ;;  %v182_v7 = vld [vmem:[%s904_s25 + $0x98] sm:$0xff]   ;;  %v186_v8 = vld [vmem:[%s904_s25 + $0x100] sm:$0xff]  }
  0x13   : > { %179 = vst [vmem:[%s134_s26 + $0x30] sm:$0xff] %v178_v6   ;;  %183 = vst [vmem:[%s134_s26 + $0x38] sm:$0xff] %v182_v7   ;;  %v190_v9 = vld [vmem:[%s904_s25 + $0x108] sm:$0xff]   ;;  %v194_v10 = vld [vmem:[%s904_s25 + $0x110] sm:$0xff]  }
  0x14   : > { %187 = vst [vmem:[%s134_s26 + $0x40] sm:$0xff] %v186_v8   ;;  %v198_v11 = vld [vmem:[%s904_s25 + $0x118] sm:$0xff]   ;;  %191 = vst [vmem:[%s134_s26 + $0x48] sm:$0xff] %v190_v9   ;;  %v202_v12 = vld [vmem:[%s904_s25 + $0x180] sm:$0xff]  }
  0x15   : > { %195 = vst [vmem:[%s134_s26 + $0x50] sm:$0xff] %v194_v10   ;;  %199 = vst [vmem:[%s134_s26 + $0x58] sm:$0xff] %v198_v11   ;;  %v206_v13 = vld [vmem:[%s904_s25 + $0x188] sm:$0xff]   ;;  %v210_v14 = vld [vmem:[%s904_s25 + $0x190] sm:$0xff]  }
  0x16   : > { %203 = vst [vmem:[%s134_s26 + $0x60] sm:$0xff] %v202_v12   ;;  %207 = vst [vmem:[%s134_s26 + $0x68] sm:$0xff] %v206_v13   ;;  %v214_v15 = vld [vmem:[%s904_s25 + $0x198] sm:$0xff]  }
  0x17   : > { %211 = vst [vmem:[%s134_s26 + $0x70] sm:$0xff] %v210_v14   ;;  %215 = vst [vmem:[%s134_s26 + $0x78] sm:$0xff] %v214_v15  }
  0x18 PF: > { %p651_p5 = scmp.ge.s32.totalorder %s848_s14, 1  ;;  %p304_p6 = scmp.lt.s32.totalorder %s848_s14, 5 }
  0x1a   : > { %p305_p7 = pnand %p651_p5, %p304_p6 }
  0x1b   : > { %s311_s27 = sand.u32 (!%p305_p7), 1, %s840_s12   ;;  %s653_s29 = sshll.u32 (!%p305_p7), %s644_s15, 3 }
  0x1c   : > { %308 = sbr.rel (%p305_p7) target bundleno = 83 (0x53), region = 69  ;;  %s652_s28 = sshll.u32 (!%p305_p7), %s311_s27, 7 }
  0x1d   : > { %s932_s5 = scalar_lea.vmem (!%p305_p7), [#allocation2], %s652_s28  ;;  %p336_p8 = scmp.lt.s32.totalorder (!%p305_p7), %s653_s29, 31 }
  0x21   : > { %v930_v16 = vld [vmem:[%s1043_s1] ss:$0 sm:$0xff]  ;;  %s1050_s29 = smov (!%p336_p8, %s653_s29), 31  ;;  %v784_v46 = vld [vmem:[%s932_s5 + $0x8] sm:$0xff]  }
  0x22   : > { %v701_v17 = vld [vmem:[%s932_s5] sm:$0xff]   ;;  %v788_v51 = vld [vmem:[%s932_s5 + $0x28] sm:$0xff]   ;;  %v706_v59 = vunpack.c.l.bf16 %v784_v46  ;;  %v707_v60 = vunpack.c.h.bf16 %v784_v46  ;;  %s654_s8 = sshll.u32 %s1050_s29, 2 }
  0x23   : > { %v787_v18 = vld [vmem:[%s932_s5 + $0x20] sm:$0xff]   ;;  %v702_v20 = vunpack.c.l.bf16 %v701_v17  ;;  %v703_v21 = vunpack.c.h.bf16 %v701_v17  ;;  %v792_v56 = vld [vmem:[%s932_s5 + $0x48] sm:$0xff]   ;;  %v722_v63 = vunpack.c.l.bf16 %v788_v51  ;;  %v723_v0 = vunpack.c.h.bf16 %v788_v51  ;;  %s974_s11 = scalar_lea.vmem %s1045_s3, %s654_s8 }
  0x24   : > { %v791_v19 = vld [vmem:[%s932_s5 + $0x40] sm:$0xff]   ;;  %v718_v22 = vunpack.c.l.bf16 %v787_v18  ;;  %v719_v23 = vunpack.c.h.bf16 %v787_v18  ;;  %v367_v1 = vmul.f32 %v706_v59, %v930_v16  ;;  %v368_v2 = vmul.f32 %v707_v60, %v930_v16  ;;  %v796_v5 = vld [vmem:[%s932_s5 + $0x68] sm:$0xff]   ;;  %v786_v60 = vld [vmem:[%s932_s5 + $0x18] sm:$0xff]  }
  0x25   : > { %v795_v24 = vld [vmem:[%s932_s5 + $0x60] sm:$0xff]   ;;  %v734_v26 = vunpack.c.l.bf16 %v791_v19  ;;  %v735_v27 = vunpack.c.h.bf16 %v791_v19  ;;  %v365_v30 = vmul.f32 %v702_v20, %v930_v16  ;;  %v366_v31 = vmul.f32 %v703_v21, %v930_v16  ;;  %v785_v19 = vld [vmem:[%s932_s5 + $0x10] sm:$0xff]  }
  0x26   : > { %v941_v25 = vld [vmem:[%s1044_s2] ss:$0 sm:$0xff]  ;;  %v750_v28 = vunpack.c.l.bf16 %v795_v24  ;;  %v751_v29 = vunpack.c.h.bf16 %v795_v24  ;;  %v412_v32 = vmul.f32 %v718_v22, %v930_v16  ;;  %v413_v33 = vmul.f32 %v719_v23, %v930_v16 }
  0x27   : > { %v461_v34 = vmul.f32 %v734_v26, %v930_v16  ;;  %v462_v35 = vmul.f32 %v735_v27, %v930_v16  ;;  %v379_v38 = vadd.f32 %v941_v25, %v365_v30  ;;  %v380_v39 = vadd.f32 %v941_v25, %v366_v31 }
  0x28   : > { %v502_v36 = vmul.f32 %v750_v28, %v930_v16  ;;  %v503_v37 = vmul.f32 %v751_v29, %v930_v16  ;;  %v420_v40 = vadd.f32 %v941_v25, %v412_v32  ;;  %v421_v41 = vadd.f32 %v941_v25, %v413_v33  ;;  %v789_v29 = vld [vmem:[%s932_s5 + $0x30] sm:$0xff]  }
  0x29   : > { %v469_v42 = vadd.f32 %v941_v25, %v461_v34  ;;  %v470_v43 = vadd.f32 %v941_v25, %v462_v35  ;;  %v387_v47 = vmax.f32 %v379_v38, 0.0  ;;  %v388_v48 = vmax.f32 %v380_v39, 0.0  ;;  %v793_v34 = vld [vmem:[%s932_s5 + $0x50] sm:$0xff]  }
  0x2a   : > { %v510_v44 = vadd.f32 %v941_v25, %v502_v36  ;;  %v511_v45 = vadd.f32 %v941_v25, %v503_v37  ;;  %v428_v49 = vmax.f32 %v420_v40, 0.0  ;;  %v429_v50 = vmax.f32 %v421_v41, 0.0 }
  0x2b   : > { %v477_v52 = vmax.f32 %v469_v42, 0.0  ;;  %v478_v53 = vmax.f32 %v470_v43, 0.0  ;;  %v738_v3 = vunpack.c.l.bf16 %v792_v56  ;;  %v739_v4 = vunpack.c.h.bf16 %v792_v56 }
  0x2c   : > { %v518_v54 = vmax.f32 %v510_v44, 0.0  ;;  %v519_v55 = vmax.f32 %v511_v45, 0.0  ;;  %v436_v57 = vmax.f32 %v387_v47, %v428_v49  ;;  %v437_v58 = vmax.f32 %v388_v48, %v429_v50 }
  0x2d   : > { %v414_v8 = vmul.f32 %v722_v63, %v930_v16  ;;  %v415_v9 = vmul.f32 %v723_v0, %v930_v16  ;;  %v381_v10 = vadd.f32 %v941_v25, %v367_v1  ;;  %v382_v11 = vadd.f32 %v941_v25, %v368_v2 }
  0x2e   : > { %v526_v61 = vmax.f32 %v477_v52, %v518_v54  ;;  %v527_v62 = vmax.f32 %v478_v53, %v519_v55  ;;  %v463_v12 = vmul.f32 %v738_v3, %v930_v16  ;;  %v464_v13 = vmul.f32 %v739_v4, %v930_v16  ;;  %v797_v55 = vld [vmem:[%s932_s5 + $0x70] sm:$0xff]  }
  0x2f   : > { %v422_v15 = vadd.f32 %v941_v25, %v414_v8  ;;  %v423_v17 = vadd.f32 %v941_v25, %v415_v9  ;;  %v754_v18 = vunpack.c.l.bf16 %v796_v5  ;;  %v389_v20 = vmax.f32 %v381_v10, 0.0  ;;  %v794_v10 = vld [vmem:[%s932_s5 + $0x58] sm:$0xff]  }
  0x30   : > { %v534_v6 = vmax.f32 %v436_v57, %v526_v61  ;;  %v535_v7 = vmax.f32 %v437_v58, %v527_v62  ;;  %v390_v21 = vmax.f32 %v382_v11, 0.0  ;;  %v471_v22 = vadd.f32 %v941_v25, %v463_v12 }
  0x31   : > { %v472_v23 = vadd.f32 %v941_v25, %v464_v13  ;;  %v430_v24 = vmax.f32 %v422_v15, 0.0  ;;  %v431_v26 = vmax.f32 %v423_v17, 0.0  ;;  %v755_v27 = vunpack.c.h.bf16 %v796_v5  ;;  %v790_v5 = vld [vmem:[%s932_s5 + $0x38] sm:$0xff]  }
  0x32   : > { %v767_v14 = vpack.c.bf16 %v535_v7, %v534_v6  ;;  %v504_v28 = vmul.f32 %v754_v18, %v930_v16  ;;  %v479_v30 = vmax.f32 %v471_v22, 0.0  ;;  %v710_v32 = vunpack.c.l.bf16 %v785_v19 }
  0x33   : > { %v480_v31 = vmax.f32 %v472_v23, 0.0  ;;  %v711_v33 = vunpack.c.h.bf16 %v785_v19  ;;  %v438_v35 = vmax.f32 %v389_v20, %v430_v24  ;;  %v439_v36 = vmax.f32 %v390_v21, %v431_v26 }
  0x34   : > { %768 = vst [vmem:[%s974_s11] sm:$0xff] %v767_v14   ;;  %v505_v37 = vmul.f32 %v755_v27, %v930_v16  ;;  %v512_v38 = vadd.f32 %v941_v25, %v504_v28  ;;  %v369_v39 = vmul.f32 %v710_v32, %v930_v16  ;;  %v726_v41 = vunpack.c.l.bf16 %v789_v29 }
  0x35   : > { %v370_v40 = vmul.f32 %v711_v33, %v930_v16  ;;  %v727_v42 = vunpack.c.h.bf16 %v789_v29  ;;  %v742_v45 = vunpack.c.l.bf16 %v793_v34  ;;  %v743_v46 = vunpack.c.h.bf16 %v793_v34  ;;  %v798_v33 = vld [vmem:[%s932_s5 + $0x78] sm:$0xff]  }
  0x36   : > { %v513_v43 = vadd.f32 %v941_v25, %v505_v37  ;;  %v520_v44 = vmax.f32 %v512_v38, 0.0  ;;  %v383_v47 = vadd.f32 %v941_v25, %v369_v39  ;;  %v416_v49 = vmul.f32 %v726_v41, %v930_v16 }
  0x37   : > { %v384_v48 = vadd.f32 %v941_v25, %v370_v40  ;;  %v417_v50 = vmul.f32 %v727_v42, %v930_v16  ;;  %v465_v53 = vmul.f32 %v742_v45, %v930_v16  ;;  %v466_v54 = vmul.f32 %v743_v46, %v930_v16 }
  0x38   : > { %v521_v51 = vmax.f32 %v513_v43, 0.0  ;;  %v528_v52 = vmax.f32 %v479_v30, %v520_v44  ;;  %v391_v56 = vmax.f32 %v383_v47, 0.0  ;;  %v424_v58 = vadd.f32 %v941_v25, %v416_v49 }
  0x39   : > { %v392_v57 = vmax.f32 %v384_v48, 0.0  ;;  %v425_v59 = vadd.f32 %v941_v25, %v417_v50  ;;  %v473_v63 = vadd.f32 %v941_v25, %v465_v53  ;;  %v474_v0 = vadd.f32 %v941_v25, %v466_v54 }
  0x3a   : > { %v529_v61 = vmax.f32 %v480_v31, %v521_v51  ;;  %v536_v62 = vmax.f32 %v438_v35, %v528_v52  ;;  %v432_v1 = vmax.f32 %v424_v58, 0.0  ;;  %v758_v3 = vunpack.c.l.bf16 %v797_v55 }
  0x3b   : > { %v433_v2 = vmax.f32 %v425_v59, 0.0  ;;  %v759_v4 = vunpack.c.h.bf16 %v797_v55  ;;  %v481_v7 = vmax.f32 %v473_v63, 0.0  ;;  %v482_v8 = vmax.f32 %v474_v0, 0.0 }
  0x3c   : > { %v537_v6 = vmax.f32 %v439_v36, %v529_v61  ;;  %v714_v9 = vunpack.c.l.bf16 %v786_v60  ;;  %v440_v11 = vmax.f32 %v391_v56, %v432_v1  ;;  %v506_v13 = vmul.f32 %v758_v3, %v930_v16 }
  0x3d   : > { %v441_v12 = vmax.f32 %v392_v57, %v433_v2  ;;  %v507_v14 = vmul.f32 %v759_v4, %v930_v16  ;;  %v715_v17 = vunpack.c.h.bf16 %v786_v60  ;;  %v730_v19 = vunpack.c.l.bf16 %v790_v5 }
  0x3e   : > { %v772_v15 = vpack.c.bf16 %v537_v6, %v536_v62  ;;  %v371_v18 = vmul.f32 %v714_v9, %v930_v16  ;;  %v514_v20 = vadd.f32 %v941_v25, %v506_v13  ;;  %v731_v22 = vunpack.c.h.bf16 %v790_v5 }
  0x3f   : > { %v515_v21 = vadd.f32 %v941_v25, %v507_v14  ;;  %v746_v23 = vunpack.c.l.bf16 %v794_v10  ;;  %v372_v24 = vmul.f32 %v715_v17, %v930_v16  ;;  %v418_v27 = vmul.f32 %v730_v19, %v930_v16 }
  0x40   : > { %799 = vst [vmem:[%s974_s11 + $0x8] sm:$0xff] %v772_v15   ;;  %v385_v26 = vadd.f32 %v941_v25, %v371_v18  ;;  %v747_v28 = vunpack.c.h.bf16 %v794_v10  ;;  %v522_v29 = vmax.f32 %v514_v20, 0.0  ;;  %v419_v31 = vmul.f32 %v731_v22, %v930_v16 }
  0x41   : > { %v523_v30 = vmax.f32 %v515_v21, 0.0  ;;  %v467_v32 = vmul.f32 %v746_v23, %v930_v16  ;;  %v426_v34 = vadd.f32 %v941_v25, %v418_v27  ;;  %v386_v38 = vadd.f32 %v941_v25, %v372_v24 }
  0x42   : > { %v468_v35 = vmul.f32 %v747_v28, %v930_v16  ;;  %v530_v36 = vmax.f32 %v481_v7, %v522_v29  ;;  %v427_v39 = vadd.f32 %v941_v25, %v419_v31  ;;  %v762_v41 = vunpack.c.l.bf16 %v798_v33 }
  0x43   : > { %v531_v37 = vmax.f32 %v482_v8, %v523_v30  ;;  %v475_v40 = vadd.f32 %v941_v25, %v467_v32  ;;  %v393_v44 = vmax.f32 %v385_v26, 0.0  ;;  %v434_v45 = vmax.f32 %v426_v34, 0.0 }
  0x44   : > { %v538_v42 = vmax.f32 %v440_v11, %v530_v36  ;;  %v476_v46 = vadd.f32 %v941_v25, %v468_v35  ;;  %v763_v47 = vunpack.c.h.bf16 %v798_v33  ;;  %v508_v48 = vmul.f32 %v762_v41, %v930_v16 }
  0x45   : > { %v539_v43 = vmax.f32 %v441_v12, %v531_v37  ;;  %v394_v50 = vmax.f32 %v386_v38, 0.0  ;;  %v435_v51 = vmax.f32 %v427_v39, 0.0  ;;  %v483_v52 = vmax.f32 %v475_v40, 0.0 }
  0x46   : > { %v509_v53 = vmul.f32 %v763_v47, %v930_v16  ;;  %v516_v54 = vadd.f32 %v941_v25, %v508_v48  ;;  %v442_v55 = vmax.f32 %v393_v44, %v434_v45  ;;  %v484_v56 = vmax.f32 %v476_v46, 0.0 }
  0x47   : > { %v777_v49 = vpack.c.bf16 %v539_v43, %v538_v42  ;;  %v443_v59 = vmax.f32 %v394_v50, %v435_v51 }
  0x48   : > { %v517_v57 = vadd.f32 %v941_v25, %v509_v53  ;;  %v524_v58 = vmax.f32 %v516_v54, 0.0 }
  0x49   : > { %800 = vst [vmem:[%s974_s11 + $0x10] sm:$0xff] %v777_v49  }
  0x4a   : > { %v525_v60 = vmax.f32 %v517_v57, 0.0  ;;  %v532_v61 = vmax.f32 %v483_v52, %v524_v58 }
  0x4c   : > { %v533_v62 = vmax.f32 %v484_v56, %v525_v60  ;;  %v540_v63 = vmax.f32 %v442_v55, %v532_v61 }
  0x4e   : > { %v541_v0 = vmax.f32 %v443_v59, %v533_v62 }
  0x50   : > { %v782_v1 = vpack.c.bf16 %v541_v0, %v540_v63 }
  0x52   : > { %801 = vst [vmem:[%s974_s11 + $0x18] sm:$0xff] %v782_v1  }
  0x53 PF: > { %p10_p9 = scmp.ge.s32.totalorder %s887_s16, 6   ;;  %s1046_s12 = smov %s844_s13 }
  0x54   : > { %s1047_s13 = smov %s896_s19  ;;  %s1048_s14 = smov %s887_s16 }
  0x55   :  { %12 = sbr.rel (!%p10_p9) target bundleno = 2 (0x2), region = 111 }

// kernel: cnn_encoder_forward.4
= control target key start
LH: loop header
LB: loop body
LE: loop exit
PB: predicated region body
PF: predicated region fallthrough
CT: control target
= control target key end

     0   :  { %s1936_s12 = smov 0   ;;  %s2522_s0 = inlined_call_operand.vmem [shape: bf16[2048,32], index: 0, kind: input, shape index: {}]   ;;  %s2523_s1 = inlined_call_operand.vmem [shape: bf16[32,64], index: 1, kind: input, shape index: {}]   ;;  %s2524_s2 = inlined_call_operand.vmem [shape: bf16[2048,64], index: 2, kind: output, shape index: {0}]   ;;  %s2525_s3 = inlined_call_operand.vmem [shape: f32[4,2,64], index: 3, kind: output, shape index: {1}]  }
   0x1 LB: > { %s1942_s13 = sadd.s32 4294967295, %s1914_s12   ;;  %p1558_p0 = scmp.ge.s32.totalorder %s1914_s12, 1  ;;  %s1914_s12 = sphi %s1936_s12, %s14_s12  }
   0x2   : > { %p141_p1 = scmp.lt.s32.totalorder %s1914_s12, 5 }
   0x4   : > { %p142_p2 = pnand %p1558_p0, %p141_p1 }
   0x5   : > { %s1559_s16 = sshll.u32 (!%p142_p2), %s1942_s13, 6  ;;  %p181_p4 = scmp.lt.s32.totalorder (!%p142_p2), %s1942_s13, 3 }
   0x6   : > { %145 = sbr.rel (%p142_p2) target bundleno = 361 (0x169), region = 28  ;;  %p170_p3 = scmp.lt.s32.totalorder (!%p142_p2), %s1559_s16, 255 }
   0xb   : > { %v1874_v0 = vld [vmem:[%s2523_s1 + $0x8] sm:$0xff]   ;;  %v1875_v1 = vld [vmem:[%s2523_s1] sm:$0xff]   ;;  %s2527_s16 = smov (!%p170_p3, %s1559_s16), 255  ;;  %vm426_vm0 = vcmask 261120   ;;  %vm1068_vm1 = vcmask 519168   ;;  %vm1133_vm2 = vcmask 523264  }
   0xc   : > { %1794 = vmatprep.subr.bf16.mxu0 %v1874_v0  ;;  %1862 = vmatprep.subr.bf16.mxu1 %v1874_v0  ;;  %s1560_s19 = sshll.u32 %s2527_s16, 2  ;;  %s2529_s13 = smov (!%p181_p4, %s1942_s13), 3  ;;  %vm1267_vm3 = vcmask 516096  }
   0xd   : > { %1795 = vmatpush3.bf16.msra.mxu0 %v1874_v0  ;;  %1864 = vmatpush3.bf16.msra.mxu1 %v1874_v0  ;;  %s1961_s22 = scalar_lea.vmem %s2522_s0, %s1560_s19  ;;  %s2032_s25 = scalar_lea.vmem %s2524_s2, %s1560_s19 }
   0xe   : > { %1796 = vmatprep.subr.bf16.mxu0 %v1875_v1  ;;  %1863 = vmatprep.subr.bf16.mxu1 %v1875_v1  ;;  %v1876_v2 = vld [vmem:[%s1961_s22] sm:$0xff]   ;;  %v1877_v3 = vld [vmem:[%s1961_s22 + $0x8] sm:$0xff]   ;;  %v1878_v4 = vld [vmem:[%s1961_s22 + $0x10] sm:$0xff]   ;;  %s1563_s26 = sshll.u32 %s2529_s13, 1 }
   0xf   : > { %1798 = vmatprep.mubr.msk.bf16.mxu0 %vm426_vm0, %v1876_v2  ;;  %v1879_v5 = vld [vmem:[%s1961_s22 + $0x18] sm:$0xff]   ;;  %v1880_v6 = vld [vmem:[%s1961_s22 + $0x20] sm:$0xff]   ;;  %v1881_v7 = vld [vmem:[%s1961_s22 + $0x28] sm:$0xff]   ;;  %s184_s29 = scalar_lea.vmem %s2525_s3, %s1563_s26 }
  0x10   : > { %v1882_v8 = vld [vmem:[%s1961_s22 + $0x30] sm:$0xff]   ;;  %v1892_v9 = vld [vmem:[%s1961_s22 + $0x80] sm:$0xff]   ;;  %v1893_v10 = vld [vmem:[%s1961_s22 + $0x88] sm:$0xff]  }
  0x11   : > { %1797 = vmatpush3.bf16.msra.mxu0 %v1875_v1  ;;  %1865 = vmatpush3.bf16.msra.mxu1 %v1875_v1  ;;  %v1894_v11 = vld [vmem:[%s1961_s22 + $0x90] sm:$0xff]   ;;  %v1883_v12 = vld [vmem:[%s1961_s22 + $0x38] sm:$0xff]   ;;  %v1884_v13 = vld [vmem:[%s1961_s22 + $0x40] sm:$0xff]  }
  0x12   : > { %1830 = vmatprep.mubr.msk.bf16.mxu1 %vm426_vm0, %v1892_v9  ;;  %v1895_v14 = vld [vmem:[%s1961_s22 + $0x98] sm:$0xff]   ;;  %v1896_v15 = vld [vmem:[%s1961_s22 + $0xa0] sm:$0xff]   ;;  %v1885_v16 = vld [vmem:[%s1961_s22 + $0x48] sm:$0xff]  }
  0x13   : > { %v1897_v17 = vld [vmem:[%s1961_s22 + $0xa8] sm:$0xff]   ;;  %v1886_v18 = vld [vmem:[%s1961_s22 + $0x50] sm:$0xff]   ;;  %v1887_v20 = vld [vmem:[%s1961_s22 + $0x58] sm:$0xff]  }
  0x14   : > { %1799 = vmatmul.mubr.msk.bf16.vlgmr.msra.gmra.mxu0 %vm426_vm0, %v1877_v3  ;;  %1831 = vmatmul.mubr.msk.bf16.vlgmr.msra.gmra.mxu1 %vm426_vm0, %v1893_v10  ;;  %v1898_v19 = vld [vmem:[%s1961_s22 + $0xb0] sm:$0xff]   ;;  %v1899_v21 = vld [vmem:[%s1961_s22 + $0xb8] sm:$0xff]   ;;  %v1888_v22 = vld [vmem:[%s1961_s22 + $0x60] sm:$0xff]  }
  0x15   : > { %1802 = vmatprep.mubr.msk.bf16.mxu0 %vm426_vm0, %v1878_v4  ;;  %1834 = vmatprep.mubr.msk.bf16.mxu1 %vm426_vm0, %v1894_v11  ;;  %v1900_v23 = vld [vmem:[%s1961_s22 + $0xc0] sm:$0xff]   ;;  %v1889_v24 = vld [vmem:[%s1961_s22 + $0x68] sm:$0xff]   ;;  %v1890_v26 = vld [vmem:[%s1961_s22 + $0x70] sm:$0xff]  }
  0x16   : > { %v1901_v25 = vld [vmem:[%s1961_s22 + $0xc8] sm:$0xff]   ;;  %v1902_v27 = vld [vmem:[%s1961_s22 + $0xd0] sm:$0xff]   ;;  %v1891_v28 = vld [vmem:[%s1961_s22 + $0x78] sm:$0xff]  }
  0x17   : > { %v1903_v29 = vld [vmem:[%s1961_s22 + $0xd8] sm:$0xff]   ;;  %v1904_v30 = vld [vmem:[%s1961_s22 + $0xe0] sm:$0xff]   ;;  %v1905_v31 = vld [vmem:[%s1961_s22 + $0xe8] sm:$0xff]  }
  0x18   : > { %v1906_v32 = vld [vmem:[%s1961_s22 + $0xf0] sm:$0xff]   ;;  %v1907_v33 = vld [vmem:[%s1961_s22 + $0xf8] sm:$0xff]  }
  0x1c   : > { %1803 = vmatmul.mubr.msk.bf16.gmra.mxu0 %vm426_vm0, %v1879_v5  ;;  %1835 = vmatmul.mubr.msk.bf16.gmra.mxu1 %vm426_vm0, %v1895_v14 }
  0x1d   : > { %1806 = vmatprep.mubr.msk.bf16.mxu0 %vm426_vm0, %v1880_v6  ;;  %1838 = vmatprep.mubr.msk.bf16.mxu1 %vm426_vm0, %v1896_v15 }
  0x24   : > { %1807 = vmatmul.mubr.msk.bf16.gmra.mxu0 %vm426_vm0, %v1881_v7  ;;  %1839 = vmatmul.mubr.msk.bf16.gmra.mxu1 %vm426_vm0, %v1897_v17 }
  0x25   : > { %1810 = vmatprep.mubr.msk.bf16.mxu0 %vm426_vm0, %v1882_v8  ;;  %1842 = vmatprep.mubr.msk.bf16.mxu1 %vm426_vm0, %v1898_v19 }
  0x2c   : > { %1811 = vmatmul.mubr.msk.bf16.gmra.mxu0 %vm426_vm0, %v1883_v12  ;;  %1843 = vmatmul.mubr.msk.bf16.gmra.mxu1 %vm426_vm0, %v1899_v21 }
  0x2d   : > { %1814 = vmatprep.mubr.msk.bf16.mxu0 %vm426_vm0, %v1884_v13  ;;  %1846 = vmatprep.mubr.msk.bf16.mxu1 %vm426_vm0, %v1900_v23 }
  0x34   : > { %1815 = vmatmul.mubr.msk.bf16.gmra.mxu0 %vm426_vm0, %v1885_v16  ;;  %1847 = vmatmul.mubr.msk.bf16.gmra.mxu1 %vm426_vm0, %v1901_v25 }
  0x35   : > { %1818 = vmatprep.mubr.msk.bf16.mxu0 %vm426_vm0, %v1886_v18  ;;  %1850 = vmatprep.mubr.msk.bf16.mxu1 %vm426_vm0, %v1902_v27 }
  0x3c   : > { %1819 = vmatmul.mubr.msk.bf16.gmra.mxu0 %vm426_vm0, %v1887_v20  ;;  %1851 = vmatmul.mubr.msk.bf16.gmra.mxu1 %vm426_vm0, %v1903_v29 }
  0x3d   : > { %1822 = vmatprep.mubr.msk.bf16.mxu0 %vm426_vm0, %v1888_v22  ;;  %1854 = vmatprep.mubr.msk.bf16.mxu1 %vm426_vm0, %v1904_v30 }
  0x44   : > { %1823 = vmatmul.mubr.msk.bf16.gmra.mxu0 %vm426_vm0, %v1889_v24  ;;  %1855 = vmatmul.mubr.msk.bf16.gmra.mxu1 %vm426_vm0, %v1905_v31 }
  0x45   : > { %1826 = vmatprep.mubr.msk.bf16.mxu0 %vm426_vm0, %v1890_v26  ;;  %1858 = vmatprep.mubr.msk.bf16.mxu1 %vm426_vm0, %v1906_v32 }
  0x4c   : > { %1827 = vmatmul.mubr.msk.bf16.gmra.mxu0 %vm426_vm0, %v1891_v28  ;;  %1859 = vmatmul.mubr.msk.bf16.gmra.mxu1 %vm426_vm0, %v1907_v33 }
  0xd4   : > { %v1800_v34 = vpop.f32.mrf.mxu0  ;;  %v2059_v14 = vpop.f32.mrf.mxu1 }
  0xd5   : > { %v1698_v35 = vpack.c.bf16 %v1800_v34, %v1800_v34  ;;  %v1271_v41 = vmul.f32 %v1800_v34, %v1800_v34  ;;  %v1137_v47 = vsel %vm1133_vm2, %v1800_v34, 0.0  ;;  %v1730_v22 = vpack.c.bf16 %v2059_v14, %v2059_v14 }
  0xd6   : > { %v557_v36 = vpop.f32.mrf.mxu0  ;;  %v2067_v23 = vpop.f32.mrf.mxu1 }
  0xd7   : > { %1071 = vst.msk [vmem:[%s2032_s25 + $0x8] sm:$0xf] %vm1068_vm1, %v1698_v35  ;;  %v1696_v37 = vpack.c.bf16 %v557_v36, %v557_v36  ;;  %v1269_v39 = vmul.f32 %v557_v36, %v557_v36  ;;  %v1134_v43 = vsel %vm1133_vm2, %v557_v36, 0.0  ;;  %v1336_v57 = vsel %vm1133_vm2, %v1271_v41, 0.0  ;;  %1103 = vst.msk [vmem:[%s2032_s25 + $0x88] sm:$0xf] %vm1068_vm1, %v1730_v22 }
  0xd8   : > { %v1801_v38 = vpop.f32.mrf.mxu0  ;;  %v1728_v31 = vpack.c.bf16 %v2067_v23, %v2067_v23  ;;  %v2077_v32 = vpop.f32.mrf.mxu1 }
  0xd9   : > { %1069 = vst.msk [vmem:[%s2032_s25] sm:$0xf] %vm1068_vm1, %v1696_v37  ;;  %v1699_v40 = vpack.c.bf16 %v1801_v38, %v1801_v38  ;;  %v1333_v50 = vsel %vm1133_vm2, %v1269_v39, 0.0  ;;  %v1272_v51 = vmul.f32 %v1801_v38, %v1801_v38  ;;  %v1139_v58 = vsel %vm1133_vm2, %v1801_v38, 0.0 }
  0xda   : > { %v560_v42 = vpop.f32.mrf.mxu0  ;;  %1101 = vst.msk [vmem:[%s2032_s25 + $0x80] sm:$0xf] %vm1068_vm1, %v1728_v31 }
  0xdb   : > { %1072 = vst.msk [vmem:[%s2032_s25 + $0xc] sm:$0xf] %vm1068_vm1, %v1699_v40  ;;  %v1697_v44 = vpack.c.bf16 %v560_v42, %v560_v42  ;;  %v1135_v45 = vsel %vm1133_vm2, %v560_v42, 0.0  ;;  %v1270_v46 = vmul.f32 %v560_v42, %v560_v42  ;;  %v1338_v0 = vsel %vm1133_vm2, %v1272_v51, 0.0  ;;  %v2085_v40 = vpop.f32.mrf.mxu1 }
  0xdc   : > { %v1136_v48 = vadd.f32 %v1135_v45, %v1134_v43  ;;  %v1804_v49 = vpop.f32.mrf.mxu0 }
  0xdd   : > { %1070 = vst.msk [vmem:[%s2032_s25 + $0x4] sm:$0xf] %vm1068_vm1, %v1697_v44  ;;  %v1334_v52 = vsel %vm1133_vm2, %v1270_v46, 0.0  ;;  %v1702_v53 = vpack.c.bf16 %v1804_v49, %v1804_v49  ;;  %v1275_v3 = vmul.f32 %v1804_v49, %v1804_v49  ;;  %v1145_v15 = vsel %vm1133_vm2, %v1804_v49, 0.0  ;;  %v2093_v49 = vpop.f32.mrf.mxu1 }
  0xde   : > { %v1138_v54 = vadd.f32 %v1137_v47, %v1136_v48  ;;  %v1335_v55 = vadd.f32 %v1334_v52, %v1333_v50  ;;  %v573_v56 = vpop.f32.mrf.mxu0  ;;  %v1731_v48 = vpack.c.bf16 %v2077_v32, %v2077_v32 }
  0xdf   : > { %1075 = vst.msk [vmem:[%s2032_s25 + $0x18] sm:$0xf] %vm1068_vm1, %v1702_v53  ;;  %v1700_v59 = vpack.c.bf16 %v573_v56, %v573_v56  ;;  %v1273_v60 = vmul.f32 %v573_v56, %v573_v56  ;;  %v1141_v1 = vsel %vm1133_vm2, %v573_v56, 0.0  ;;  %v1344_v24 = vsel %vm1133_vm2, %v1275_v3, 0.0 }
  0xe0   : > { %v1337_v61 = vadd.f32 %v1336_v57, %v1335_v55  ;;  %v1140_v62 = vadd.f32 %v1139_v58, %v1138_v54  ;;  %v1805_v63 = vpop.f32.mrf.mxu0  ;;  %1104 = vst.msk [vmem:[%s2032_s25 + $0x8c] sm:$0xf] %vm1068_vm1, %v1731_v48  ;;  %v2101_v57 = vpop.f32.mrf.mxu1 }
  0xe1   : > { %1073 = vst.msk [vmem:[%s2032_s25 + $0x10] sm:$0xf] %vm1068_vm1, %v1700_v59  ;;  %v1703_v2 = vpack.c.bf16 %v1805_v63, %v1805_v63  ;;  %v1340_v7 = vsel %vm1133_vm2, %v1273_v60, 0.0  ;;  %v1276_v16 = vmul.f32 %v1805_v63, %v1805_v63  ;;  %v1147_v25 = vsel %vm1133_vm2, %v1805_v63, 0.0 }
  0xe2   : > { %v1142_v4 = vadd.f32 %v1141_v1, %v1140_v62  ;;  %v1339_v5 = vadd.f32 %v1338_v0, %v1337_v61  ;;  %v576_v6 = vpop.f32.mrf.mxu0  ;;  %v1729_v1 = vpack.c.bf16 %v2085_v40, %v2085_v40 }
  0xe3   : > { %1076 = vst.msk [vmem:[%s2032_s25 + $0x1c] sm:$0xf] %vm1068_vm1, %v1703_v2  ;;  %v1701_v8 = vpack.c.bf16 %v576_v6, %v576_v6  ;;  %v1143_v9 = vsel %vm1133_vm2, %v576_v6, 0.0  ;;  %v1274_v10 = vmul.f32 %v576_v6, %v576_v6  ;;  %v1346_v33 = vsel %vm1133_vm2, %v1276_v16, 0.0  ;;  %v2109_v2 = vpop.f32.mrf.mxu1 }
  0xe4   : > { %v1341_v11 = vadd.f32 %v1340_v7, %v1339_v5  ;;  %v1144_v12 = vadd.f32 %v1143_v9, %v1142_v4  ;;  %v1808_v13 = vpop.f32.mrf.mxu0  ;;  %1102 = vst.msk [vmem:[%s2032_s25 + $0x84] sm:$0xf] %vm1068_vm1, %v1729_v1 }
  0xe5   : > { %1074 = vst.msk [vmem:[%s2032_s25 + $0x14] sm:$0xf] %vm1068_vm1, %v1701_v8  ;;  %v1342_v17 = vsel %vm1133_vm2, %v1274_v10, 0.0  ;;  %v1706_v18 = vpack.c.bf16 %v1808_v13, %v1808_v13  ;;  %v1279_v36 = vmul.f32 %v1808_v13, %v1808_v13  ;;  %v1153_v50 = vsel %vm1133_vm2, %v1808_v13, 0.0  ;;  %v2117_v10 = vpop.f32.mrf.mxu1 }
  0xe6   : > { %v1146_v19 = vadd.f32 %v1145_v15, %v1144_v12  ;;  %v1343_v20 = vadd.f32 %v1342_v17, %v1341_v11  ;;  %v589_v21 = vpop.f32.mrf.mxu0 }
  0xe7   : > { %1079 = vst.msk [vmem:[%s2032_s25 + $0x28] sm:$0xf] %vm1068_vm1, %v1706_v18  ;;  %v1704_v26 = vpack.c.bf16 %v589_v21, %v589_v21  ;;  %v1277_v27 = vmul.f32 %v589_v21, %v589_v21  ;;  %v1149_v34 = vsel %vm1133_vm2, %v589_v21, 0.0  ;;  %v1352_v58 = vsel %vm1133_vm2, %v1279_v36, 0.0 }
  0xe8   : > { %v1345_v28 = vadd.f32 %v1344_v24, %v1343_v20  ;;  %v1148_v29 = vadd.f32 %v1147_v25, %v1146_v19  ;;  %v1809_v30 = vpop.f32.mrf.mxu0  ;;  %v1734_v19 = vpack.c.bf16 %v2093_v49, %v2093_v49  ;;  %v2125_v20 = vpop.f32.mrf.mxu1 }
  0xe9   : > { %1077 = vst.msk [vmem:[%s2032_s25 + $0x20] sm:$0xf] %vm1068_vm1, %v1704_v26  ;;  %v1707_v35 = vpack.c.bf16 %v1809_v30, %v1809_v30  ;;  %v1348_v41 = vsel %vm1133_vm2, %v1277_v27, 0.0  ;;  %v1280_v51 = vmul.f32 %v1809_v30, %v1809_v30  ;;  %v1155_v59 = vsel %vm1133_vm2, %v1809_v30, 0.0 }
  0xea   : > { %v1150_v37 = vadd.f32 %v1149_v34, %v1148_v29  ;;  %v1347_v38 = vadd.f32 %v1346_v33, %v1345_v28  ;;  %v592_v39 = vpop.f32.mrf.mxu0  ;;  %1107 = vst.msk [vmem:[%s2032_s25 + $0x98] sm:$0xf] %vm1068_vm1, %v1734_v19  ;;  %v2133_v29 = vpop.f32.mrf.mxu1 }
  0xeb   : > { %1080 = vst.msk [vmem:[%s2032_s25 + $0x2c] sm:$0xf] %vm1068_vm1, %v1707_v35  ;;  %v1705_v42 = vpack.c.bf16 %v592_v39, %v592_v39  ;;  %v1151_v43 = vsel %vm1133_vm2, %v592_v39, 0.0  ;;  %v1278_v44 = vmul.f32 %v592_v39, %v592_v39  ;;  %v1354_v3 = vsel %vm1133_vm2, %v1280_v51, 0.0 }
  0xec   : > { %v1349_v45 = vadd.f32 %v1348_v41, %v1347_v38  ;;  %v1152_v46 = vadd.f32 %v1151_v43, %v1150_v37  ;;  %v1812_v47 = vpop.f32.mrf.mxu0  ;;  %v1732_v38 = vpack.c.bf16 %v2101_v57, %v2101_v57  ;;  %v2141_v39 = vpop.f32.mrf.mxu1 }
  0xed   : > { %1078 = vst.msk [vmem:[%s2032_s25 + $0x24] sm:$0xf] %vm1068_vm1, %v1705_v42  ;;  %v1350_v52 = vsel %vm1133_vm2, %v1278_v44, 0.0  ;;  %v1710_v53 = vpack.c.bf16 %v1812_v47, %v1812_v47  ;;  %v1283_v6 = vmul.f32 %v1812_v47, %v1812_v47  ;;  %v1161_v21 = vsel %vm1133_vm2, %v1812_v47, 0.0 }
  0xee   : > { %v1154_v54 = vadd.f32 %v1153_v50, %v1152_v46  ;;  %v1351_v55 = vadd.f32 %v1350_v52, %v1349_v45  ;;  %v605_v56 = vpop.f32.mrf.mxu0  ;;  %1105 = vst.msk [vmem:[%s2032_s25 + $0x90] sm:$0xf] %vm1068_vm1, %v1732_v38  ;;  %v2149_v48 = vpop.f32.mrf.mxu1 }
  0xef   : > { %1083 = vst.msk [vmem:[%s2032_s25 + $0x38] sm:$0xf] %vm1068_vm1, %v1710_v53  ;;  %v1708_v60 = vpack.c.bf16 %v605_v56, %v605_v56  ;;  %v1281_v61 = vmul.f32 %v605_v56, %v605_v56  ;;  %v1157_v4 = vsel %vm1133_vm2, %v605_v56, 0.0  ;;  %v1360_v30 = vsel %vm1133_vm2, %v1283_v6, 0.0 }
  0xf0   : > { %v1353_v62 = vadd.f32 %v1352_v58, %v1351_v55  ;;  %v1156_v63 = vadd.f32 %v1155_v59, %v1154_v54  ;;  %v1813_v0 = vpop.f32.mrf.mxu0  ;;  %v1735_v58 = vpack.c.bf16 %v2109_v2, %v2109_v2  ;;  %v2157_v59 = vpop.f32.mrf.mxu1 }
  0xf1   : > { %1081 = vst.msk [vmem:[%s2032_s25 + $0x30] sm:$0xf] %vm1068_vm1, %v1708_v60  ;;  %v1711_v5 = vpack.c.bf16 %v1813_v0, %v1813_v0  ;;  %v1356_v11 = vsel %vm1133_vm2, %v1281_v61, 0.0  ;;  %v1284_v22 = vmul.f32 %v1813_v0, %v1813_v0  ;;  %v1163_v31 = vsel %vm1133_vm2, %v1813_v0, 0.0 }
  0xf2   : > { %v1158_v7 = vadd.f32 %v1157_v4, %v1156_v63  ;;  %v1355_v8 = vadd.f32 %v1354_v3, %v1353_v62  ;;  %v608_v9 = vpop.f32.mrf.mxu0  ;;  %1108 = vst.msk [vmem:[%s2032_s25 + $0x9c] sm:$0xf] %vm1068_vm1, %v1735_v58  ;;  %v2165_v4 = vpop.f32.mrf.mxu1 }
  0xf3   : > { %1084 = vst.msk [vmem:[%s2032_s25 + $0x3c] sm:$0xf] %vm1068_vm1, %v1711_v5  ;;  %v1709_v12 = vpack.c.bf16 %v608_v9, %v608_v9  ;;  %v1159_v13 = vsel %vm1133_vm2, %v608_v9, 0.0  ;;  %v1282_v15 = vmul.f32 %v608_v9, %v608_v9  ;;  %v1362_v41 = vsel %vm1133_vm2, %v1284_v22, 0.0 }
  0xf4   : > { %v1357_v16 = vadd.f32 %v1356_v11, %v1355_v8  ;;  %v1160_v17 = vadd.f32 %v1159_v13, %v1158_v7  ;;  %v1816_v18 = vpop.f32.mrf.mxu0  ;;  %v1733_v13 = vpack.c.bf16 %v2117_v10, %v2117_v10 }
  0xf5   : > { %1082 = vst.msk [vmem:[%s2032_s25 + $0x34] sm:$0xf] %vm1068_vm1, %v1709_v12  ;;  %v1358_v24 = vsel %vm1133_vm2, %v1282_v15, 0.0  ;;  %v1714_v25 = vpack.c.bf16 %v1816_v18, %v1816_v18  ;;  %v1287_v44 = vmul.f32 %v1816_v18, %v1816_v18  ;;  %v1169_v60 = vsel %vm1133_vm2, %v1816_v18, 0.0  ;;  %v2173_v15 = vpop.f32.mrf.mxu1 }
  0xf6   : > { %v1162_v26 = vadd.f32 %v1161_v21, %v1160_v17  ;;  %v1359_v27 = vadd.f32 %v1358_v24, %v1357_v16  ;;  %v621_v28 = vpop.f32.mrf.mxu0  ;;  %1106 = vst.msk [vmem:[%s2032_s25 + $0x94] sm:$0xf] %vm1068_vm1, %v1733_v13 }
  0xf7   : > { %1087 = vst.msk [vmem:[%s2032_s25 + $0x48] sm:$0xf] %vm1068_vm1, %v1714_v25  ;;  %v1712_v33 = vpack.c.bf16 %v621_v28, %v621_v28  ;;  %v1285_v34 = vmul.f32 %v621_v28, %v621_v28  ;;  %v1165_v42 = vsel %vm1133_vm2, %v621_v28, 0.0  ;;  %v1368_v5 = vsel %vm1133_vm2, %v1287_v44, 0.0  ;;  %v2181_v25 = vpop.f32.mrf.mxu1 }
  0xf8   : > { %v1361_v35 = vadd.f32 %v1360_v30, %v1359_v27  ;;  %v1164_v36 = vadd.f32 %v1163_v31, %v1162_v26  ;;  %v1817_v37 = vpop.f32.mrf.mxu0 }
  0xf9   : > { %1085 = vst.msk [vmem:[%s2032_s25 + $0x40] sm:$0xf] %vm1068_vm1, %v1712_v33  ;;  %v1715_v43 = vpack.c.bf16 %v1817_v37, %v1817_v37  ;;  %v1364_v50 = vsel %vm1133_vm2, %v1285_v34, 0.0  ;;  %v1288_v61 = vmul.f32 %v1817_v37, %v1817_v37  ;;  %v1171_v6 = vsel %vm1133_vm2, %v1817_v37, 0.0 }
  0xfa   : > { %v1166_v45 = vadd.f32 %v1165_v42, %v1164_v36  ;;  %v1363_v46 = vadd.f32 %v1362_v41, %v1361_v35  ;;  %v624_v47 = vpop.f32.mrf.mxu0  ;;  %v1738_v35 = vpack.c.bf16 %v2125_v20, %v2125_v20  ;;  %v2189_v36 = vpop.f32.mrf.mxu1 }
  0xfb   : > { %1088 = vst.msk [vmem:[%s2032_s25 + $0x4c] sm:$0xf] %vm1068_vm1, %v1715_v43  ;;  %v1713_v51 = vpack.c.bf16 %v624_v47, %v624_v47  ;;  %v1167_v52 = vsel %vm1133_vm2, %v624_v47, 0.0  ;;  %v1286_v53 = vmul.f32 %v624_v47, %v624_v47  ;;  %v1370_v16 = vsel %vm1133_vm2, %v1288_v61, 0.0 }
  0xfc   : > { %v1365_v54 = vadd.f32 %v1364_v50, %v1363_v46  ;;  %v1168_v55 = vadd.f32 %v1167_v52, %v1166_v45  ;;  %v1820_v56 = vpop.f32.mrf.mxu0  ;;  %1111 = vst.msk [vmem:[%s2032_s25 + $0xa8] sm:$0xf] %vm1068_vm1, %v1738_v35  ;;  %v2197_v46 = vpop.f32.mrf.mxu1 }
  0xfd   : > { %1086 = vst.msk [vmem:[%s2032_s25 + $0x44] sm:$0xf] %vm1068_vm1, %v1713_v51  ;;  %v1366_v62 = vsel %vm1133_vm2, %v1286_v53, 0.0  ;;  %v1718_v63 = vpack.c.bf16 %v1820_v56, %v1820_v56  ;;  %v1291_v19 = vmul.f32 %v1820_v56, %v1820_v56  ;;  %v1177_v37 = vsel %vm1133_vm2, %v1820_v56, 0.0 }
  0xfe   : > { %v1170_v0 = vadd.f32 %v1169_v60, %v1168_v55  ;;  %v1367_v1 = vadd.f32 %v1366_v62, %v1365_v54  ;;  %v637_v3 = vpop.f32.mrf.mxu0  ;;  %v1736_v56 = vpack.c.bf16 %v2133_v29, %v2133_v29  ;;  %v2205_v58 = vpop.f32.mrf.mxu1 }
  0xff   : > { %1091 = vst.msk [vmem:[%s2032_s25 + $0x58] sm:$0xf] %vm1068_vm1, %v1718_v63  ;;  %v1716_v7 = vpack.c.bf16 %v637_v3, %v637_v3  ;;  %v1289_v8 = vmul.f32 %v637_v3, %v637_v3  ;;  %v1173_v17 = vsel %vm1133_vm2, %v637_v3, 0.0  ;;  %v1376_v47 = vsel %vm1133_vm2, %v1291_v19, 0.0 }
 0x100   : > { %v1369_v9 = vadd.f32 %v1368_v5, %v1367_v1  ;;  %v1172_v11 = vadd.f32 %v1171_v6, %v1170_v0  ;;  %v1821_v12 = vpop.f32.mrf.mxu0  ;;  %1109 = vst.msk [vmem:[%s2032_s25 + $0xa0] sm:$0xf] %vm1068_vm1, %v1736_v56  ;;  %v2213_v5 = vpop.f32.mrf.mxu1 }
 0x101   : > { %1089 = vst.msk [vmem:[%s2032_s25 + $0x50] sm:$0xf] %vm1068_vm1, %v1716_v7  ;;  %v1719_v18 = vpack.c.bf16 %v1821_v12, %v1821_v12  ;;  %v1372_v26 = vsel %vm1133_vm2, %v1289_v8, 0.0  ;;  %v1292_v38 = vmul.f32 %v1821_v12, %v1821_v12  ;;  %v1179_v50 = vsel %vm1133_vm2, %v1821_v12, 0.0 }
 0x102   : > { %v1174_v21 = vadd.f32 %v1173_v17, %v1172_v11  ;;  %v1371_v22 = vadd.f32 %v1370_v16, %v1369_v9  ;;  %v640_v24 = vpop.f32.mrf.mxu0  ;;  %v1739_v16 = vpack.c.bf16 %v2141_v39, %v2141_v39  ;;  %v2221_v17 = vpop.f32.mrf.mxu1 }
 0x103   : > { %1092 = vst.msk [vmem:[%s2032_s25 + $0x5c] sm:$0xf] %vm1068_vm1, %v1719_v18  ;;  %v1717_v27 = vpack.c.bf16 %v640_v24, %v640_v24  ;;  %v1175_v28 = vsel %vm1133_vm2, %v640_v24, 0.0  ;;  %v1290_v30 = vmul.f32 %v640_v24, %v640_v24  ;;  %v1378_v60 = vsel %vm1133_vm2, %v1292_v38, 0.0 }
 0x104   : > { %v1373_v31 = vadd.f32 %v1372_v26, %v1371_v22  ;;  %v1176_v33 = vadd.f32 %v1175_v28, %v1174_v21  ;;  %v1824_v34 = vpop.f32.mrf.mxu0  ;;  %1112 = vst.msk [vmem:[%s2032_s25 + $0xac] sm:$0xf] %vm1068_vm1, %v1739_v16  ;;  %v2229_v28 = vpop.f32.mrf.mxu1  ;;  %v1301_v16 = vmul.f32 %v2067_v23, %v2067_v23 }
 0x105   : > { %1090 = vst.msk [vmem:[%s2032_s25 + $0x54] sm:$0xf] %vm1068_vm1, %v1717_v27  ;;  %v1374_v41 = vsel %vm1133_vm2, %v1290_v30, 0.0  ;;  %v1722_v42 = vpack.c.bf16 %v1824_v34, %v1824_v34  ;;  %v1295_v63 = vmul.f32 %v1824_v34, %v1824_v34  ;;  %v1185_v18 = vsel %vm1133_vm2, %v1824_v34, 0.0 }
 0x106   : > { %v1178_v43 = vadd.f32 %v1177_v37, %v1176_v33  ;;  %v1375_v44 = vadd.f32 %v1374_v41, %v1373_v31  ;;  %v653_v45 = vpop.f32.mrf.mxu0  ;;  %v1737_v41 = vpack.c.bf16 %v2149_v48, %v2149_v48 }
 0x107   : > { %1095 = vst.msk [vmem:[%s2032_s25 + $0x68] sm:$0xf] %vm1068_vm1, %v1722_v42  ;;  %v1720_v51 = vpack.c.bf16 %v653_v45, %v653_v45  ;;  %v1293_v52 = vmul.f32 %v653_v45, %v653_v45  ;;  %v1181_v61 = vsel %vm1133_vm2, %v653_v45, 0.0  ;;  %v1384_v30 = vsel %vm1133_vm2, %v1295_v63, 0.0  ;;  %v2237_v42 = vpop.f32.mrf.mxu1 }
 0x108   : > { %v1377_v53 = vadd.f32 %v1376_v47, %v1375_v44  ;;  %v1180_v54 = vadd.f32 %v1179_v50, %v1178_v43  ;;  %v1825_v55 = vpop.f32.mrf.mxu0  ;;  %1110 = vst.msk [vmem:[%s2032_s25 + $0xa4] sm:$0xf] %vm1068_vm1, %v1737_v41  ;;  %v1742_v63 = vpack.c.bf16 %v2157_v59, %v2157_v59  ;;  %v1744_v41 = vpack.c.bf16 %v2197_v46, %v2197_v46 }
 0x109   : > { %1093 = vst.msk [vmem:[%s2032_s25 + $0x60] sm:$0xf] %vm1068_vm1, %v1720_v51  ;;  %v1723_v62 = vpack.c.bf16 %v1825_v55, %v1825_v55  ;;  %v1380_v6 = vsel %vm1133_vm2, %v1293_v52, 0.0  ;;  %v1296_v19 = vmul.f32 %v1825_v55, %v1825_v55  ;;  %v1187_v31 = vsel %vm1133_vm2, %v1825_v55, 0.0 }
 0x10a   : > { %v1182_v0 = vadd.f32 %v1181_v61, %v1180_v54  ;;  %v1379_v1 = vadd.f32 %v1378_v60, %v1377_v53  ;;  %v656_v3 = vpop.f32.mrf.mxu0  ;;  %v2245_v53 = vpop.f32.mrf.mxu1  ;;  %1115 = vst.msk [vmem:[%s2032_s25 + $0xb8] sm:$0xf] %vm1068_vm1, %v1742_v63  ;;  %1117 = vst.msk [vmem:[%s2032_s25 + $0xc0] sm:$0xf] %vm1068_vm1, %v1744_v41 }
 0x10b   : > { %1096 = vst.msk [vmem:[%s2032_s25 + $0x6c] sm:$0xf] %vm1068_vm1, %v1723_v62  ;;  %v1721_v7 = vpack.c.bf16 %v656_v3, %v656_v3  ;;  %v1183_v8 = vsel %vm1133_vm2, %v656_v3, 0.0  ;;  %v1294_v9 = vmul.f32 %v656_v3, %v656_v3  ;;  %v1386_v43 = vsel %vm1133_vm2, %v1296_v19, 0.0 }
 0x10c   : > { %v1381_v11 = vadd.f32 %v1380_v6, %v1379_v1  ;;  %v1184_v12 = vadd.f32 %v1183_v8, %v1182_v0  ;;  %v1828_v13 = vpop.f32.mrf.mxu0  ;;  %v2253_v0 = vpop.f32.mrf.mxu1 }
 0x10d   : > { %1094 = vst.msk [vmem:[%s2032_s25 + $0x64] sm:$0xf] %vm1068_vm1, %v1721_v7  ;;  %v1382_v21 = vsel %vm1133_vm2, %v1294_v9, 0.0  ;;  %v1726_v22 = vpack.c.bf16 %v1828_v13, %v1828_v13  ;;  %v1299_v47 = vmul.f32 %v1828_v13, %v1828_v13  ;;  %v1193_v1 = vsel %vm1133_vm2, %v1828_v13, 0.0 }
 0x10e   : > { %v1186_v24 = vadd.f32 %v1185_v18, %v1184_v12  ;;  %v1383_v26 = vadd.f32 %v1382_v21, %v1381_v11  ;;  %v669_v27 = vpop.f32.mrf.mxu0  ;;  %v1740_v7 = vpack.c.bf16 %v2165_v4, %v2165_v4  ;;  %v2263_v11 = vpop.f32.mrf.mxu1  ;;  %v1743_v18 = vpack.c.bf16 %v2173_v15, %v2173_v15 }
 0x10f   : > { %1099 = vst.msk [vmem:[%s2032_s25 + $0x78] sm:$0xf] %vm1068_vm1, %v1726_v22  ;;  %v1724_v33 = vpack.c.bf16 %v669_v27, %v669_v27  ;;  %v1297_v34 = vmul.f32 %v669_v27, %v669_v27  ;;  %v1189_v44 = vsel %vm1133_vm2, %v669_v27, 0.0  ;;  %v1392_v12 = vsel %vm1133_vm2, %v1299_v47, 0.0 }
 0x110   : > { %v1385_v35 = vadd.f32 %v1384_v30, %v1383_v26  ;;  %v1188_v37 = vadd.f32 %v1187_v31, %v1186_v24  ;;  %v1829_v38 = vpop.f32.mrf.mxu0  ;;  %1113 = vst.msk [vmem:[%s2032_s25 + $0xb0] sm:$0xf] %vm1068_vm1, %v1740_v7  ;;  %v1741_v22 = vpack.c.bf16 %v2181_v25, %v2181_v25  ;;  %v2275_v24 = vpop.f32.mrf.mxu1  ;;  %v1197_v27 = vsel %vm1133_vm2, %v2067_v23, 0.0  ;;  %1116 = vst.msk [vmem:[%s2032_s25 + $0xbc] sm:$0xf] %vm1068_vm1, %v1743_v18 }
 0x111   : > { %1097 = vst.msk [vmem:[%s2032_s25 + $0x70] sm:$0xf] %vm1068_vm1, %v1724_v33  ;;  %v1727_v45 = vpack.c.bf16 %v1829_v38, %v1829_v38  ;;  %v1388_v54 = vsel %vm1133_vm2, %v1297_v34, 0.0  ;;  %v1300_v3 = vmul.f32 %v1829_v38, %v1829_v38  ;;  %v1195_v13 = vsel %vm1133_vm2, %v1829_v38, 0.0 }
 0x112   : > { %v1190_v50 = vadd.f32 %v1189_v44, %v1188_v37  ;;  %v1387_v51 = vadd.f32 %v1386_v43, %v1385_v35  ;;  %v672_v52 = vpop.f32.mrf.mxu0  ;;  %v1302_v30 = vmul.f32 %v2085_v40, %v2085_v40  ;;  %v1746_v31 = vpack.c.bf16 %v2189_v36, %v2189_v36  ;;  %1114 = vst.msk [vmem:[%s2032_s25 + $0xb4] sm:$0xf] %vm1068_vm1, %v1741_v22  ;;  %v2288_v35 = vpop.f32.mrf.mxu1 }
 0x113   : > { %1100 = vst.msk [vmem:[%s2032_s25 + $0x7c] sm:$0xf] %vm1068_vm1, %v1727_v45  ;;  %v1725_v55 = vpack.c.bf16 %v672_v52, %v672_v52  ;;  %v1191_v56 = vsel %vm1133_vm2, %v672_v52, 0.0  ;;  %v1298_v60 = vmul.f32 %v672_v52, %v672_v52  ;;  %v1394_v26 = vsel %vm1133_vm2, %v1300_v3, 0.0 }
 0x114   : > { %v1389_v61 = vadd.f32 %v1388_v54, %v1387_v51  ;;  %v1192_v62 = vadd.f32 %v1191_v56, %v1190_v50  ;;  %v1303_v37 = vmul.f32 %v2059_v14, %v2059_v14  ;;  %v1396_v23 = vsel %vm1133_vm2, %v1301_v16, 0.0  ;;  %1119 = vst.msk [vmem:[%s2032_s25 + $0xc8] sm:$0xf] %vm1068_vm1, %v1746_v31 }
 0x115   : > { %1098 = vst.msk [vmem:[%s2032_s25 + $0x74] sm:$0xf] %vm1068_vm1, %v1725_v55  ;;  %v1390_v6 = vsel %vm1133_vm2, %v1298_v60, 0.0  ;;  %v1199_v38 = vsel %vm1133_vm2, %v2085_v40, 0.0  ;;  %v1747_v45 = vpack.c.bf16 %v2205_v58, %v2205_v58  ;;  %v1201_v47 = vsel %vm1133_vm2, %v2059_v14, 0.0  ;;  %v2312_v55 = vpop.f32.mrf.mxu1 }
 0x116   : > { %v1194_v8 = vadd.f32 %v1193_v1, %v1192_v62  ;;  %v1391_v9 = vadd.f32 %v1390_v6, %v1389_v61  ;;  %v1304_v50 = vmul.f32 %v2077_v32, %v2077_v32  ;;  %v1398_v51 = vsel %vm1133_vm2, %v1302_v30, 0.0 }
 0x117   : > { %v1745_v40 = vpack.c.bf16 %v2213_v5, %v2213_v5  ;;  %1120 = vst.msk [vmem:[%s2032_s25 + $0xcc] sm:$0xf] %vm1068_vm1, %v1747_v45  ;;  %v1400_v14 = vsel %vm1133_vm2, %v1303_v37, 0.0  ;;  %v1203_v56 = vsel %vm1133_vm2, %v2077_v32, 0.0  ;;  %v1305_v60 = vmul.f32 %v2101_v57, %v2101_v57 }
 0x118   : > { %v1196_v19 = vadd.f32 %v1195_v13, %v1194_v8  ;;  %v1393_v21 = vadd.f32 %v1392_v12, %v1391_v9  ;;  %v1750_v61 = vpack.c.bf16 %v2221_v17, %v2221_v17  ;;  %v1748_v1 = vpack.c.bf16 %v2229_v28, %v2229_v28  ;;  %v2336_v12 = vpop.f32.mrf.mxu1 }
 0x119   : > { %1118 = vst.msk [vmem:[%s2032_s25 + $0xc4] sm:$0xf] %vm1068_vm1, %v1745_v40  ;;  %v1402_v3 = vsel %vm1133_vm2, %v1304_v50, 0.0  ;;  %v1205_v6 = vsel %vm1133_vm2, %v2101_v57, 0.0  ;;  %v1306_v32 = vmul.f32 %v2117_v10, %v2117_v10  ;;  %v1751_v7 = vpack.c.bf16 %v2237_v42, %v2237_v42 }
 0x11a   : > { %v1395_v33 = vadd.f32 %v1394_v26, %v1393_v21  ;;  %v1198_v34 = vadd.f32 %v1197_v27, %v1196_v19  ;;  %1123 = vst.msk [vmem:[%s2032_s25 + $0xd8] sm:$0xf] %vm1068_vm1, %v1750_v61  ;;  %1121 = vst.msk [vmem:[%s2032_s25 + $0xd0] sm:$0xf] %vm1068_vm1, %v1748_v1  ;;  %v1307_v13 = vmul.f32 %v2093_v49, %v2093_v49  ;;  %v1404_v57 = vsel %vm1133_vm2, %v1305_v60, 0.0 }
 0x11b   : > { %v1207_v16 = vsel %vm1133_vm2, %v2117_v10, 0.0  ;;  %1124 = vst.msk [vmem:[%s2032_s25 + $0xdc] sm:$0xf] %vm1068_vm1, %v1751_v7  ;;  %v1749_v18 = vpack.c.bf16 %v2245_v53, %v2245_v53  ;;  %v1754_v22 = vpack.c.bf16 %v2253_v0, %v2253_v0  ;;  %v1209_v26 = vsel %vm1133_vm2, %v2093_v49, 0.0 }
 0x11c   : > { %v1200_v43 = vadd.f32 %v1199_v38, %v1198_v34  ;;  %v1397_v44 = vadd.f32 %v1396_v23, %v1395_v33  ;;  %v1308_v27 = vmul.f32 %v2109_v2, %v2109_v2  ;;  %v1406_v30 = vsel %vm1133_vm2, %v1306_v32, 0.0  ;;  %v2360_v34 = vpop.f32.mrf.mxu1 }
 0x11d   : > { %1122 = vst.msk [vmem:[%s2032_s25 + $0xd4] sm:$0xf] %vm1068_vm1, %v1749_v18  ;;  %v1752_v10 = vpack.c.bf16 %v2263_v11, %v2263_v11  ;;  %1127 = vst.msk [vmem:[%s2032_s25 + $0xe8] sm:$0xf] %vm1068_vm1, %v1754_v22  ;;  %v1408_v49 = vsel %vm1133_vm2, %v1307_v13, 0.0  ;;  %v1211_v37 = vsel %vm1133_vm2, %v2109_v2, 0.0  ;;  %v1309_v23 = vmul.f32 %v2133_v29, %v2133_v29 }
 0x11e   : > { %v1202_v52 = vadd.f32 %v1201_v47, %v1200_v43  ;;  %v1399_v54 = vadd.f32 %v1398_v51, %v1397_v44  ;;  %v1755_v38 = vpack.c.bf16 %v2275_v24, %v2275_v24  ;;  %v1753_v44 = vpack.c.bf16 %v2288_v35, %v2288_v35 }
 0x11f   : > { %1125 = vst.msk [vmem:[%s2032_s25 + $0xe0] sm:$0xf] %vm1068_vm1, %v1752_v10  ;;  %v1410_v45 = vsel %vm1133_vm2, %v1308_v27, 0.0  ;;  %v1213_v47 = vsel %vm1133_vm2, %v2133_v29, 0.0  ;;  %v1310_v2 = vmul.f32 %v2149_v48, %v2149_v48  ;;  %v1758_v50 = vpack.c.bf16 %v2312_v55, %v2312_v55 }
 0x120   : > { %v1401_v62 = vadd.f32 %v1400_v14, %v1399_v54  ;;  %v1204_v63 = vadd.f32 %v1203_v56, %v1202_v52  ;;  %1128 = vst.msk [vmem:[%s2032_s25 + $0xec] sm:$0xf] %vm1068_vm1, %v1755_v38  ;;  %1126 = vst.msk [vmem:[%s2032_s25 + $0xe4] sm:$0xf] %vm1068_vm1, %v1753_v44  ;;  %v2384_v52 = vpop.f32.mrf.mxu1  ;;  %v1311_v54 = vmul.f32 %v2125_v20, %v2125_v20  ;;  %v1412_v29 = vsel %vm1133_vm2, %v1309_v23, 0.0 }
 0x121   : > { %v1215_v14 = vsel %vm1133_vm2, %v2149_v48, 0.0  ;;  %1131 = vst.msk [vmem:[%s2032_s25 + $0xf8] sm:$0xf] %vm1068_vm1, %v1758_v50  ;;  %v1756_v56 = vpack.c.bf16 %v2336_v12, %v2336_v12  ;;  %v1312_v1 = vmul.f32 %v2141_v39, %v2141_v39  ;;  %v1757_v48 = vpack.c.bf16 %v2384_v52, %v2384_v52 }
 0x122   : > { %v1206_v8 = vadd.f32 %v1205_v6, %v1204_v63  ;;  %v1403_v9 = vadd.f32 %v1402_v3, %v1401_v62  ;;  %v1759_v62 = vpack.c.bf16 %v2360_v34, %v2360_v34  ;;  %v1217_v63 = vsel %vm1133_vm2, %v2125_v20, 0.0 }
 0x123   : > { %v1414_v3 = vsel %vm1133_vm2, %v1310_v2, 0.0  ;;  %1129 = vst.msk [vmem:[%s2032_s25 + $0xf0] sm:$0xf] %vm1068_vm1, %v1756_v56  ;;  %v1416_v7 = vsel %vm1133_vm2, %v1311_v54, 0.0  ;;  %v1313_v20 = vmul.f32 %v2165_v4, %v2165_v4  ;;  %1130 = vst.msk [vmem:[%s2032_s25 + $0xf4] sm:$0xf] %vm1068_vm1, %v1757_v48  ;;  %v1314_v18 = vmul.f32 %v2181_v25, %v2181_v25 }
 0x124   : > { %v1405_v19 = vadd.f32 %v1404_v57, %v1403_v9  ;;  %v1208_v21 = vadd.f32 %v1207_v16, %v1206_v8  ;;  %1132 = vst.msk [vmem:[%s2032_s25 + $0xfc] sm:$0xf] %vm1068_vm1, %v1759_v62  ;;  %v1219_v8 = vsel %vm1133_vm2, %v2141_v39, 0.0  ;;  %v1418_v57 = vsel %vm1133_vm2, %v1312_v1, 0.0 }
 0x125   : > { %v1221_v16 = vsel %vm1133_vm2, %v2165_v4, 0.0  ;;  %v1315_v39 = vmul.f32 %v2157_v59, %v2157_v59  ;;  %v1420_v22 = vsel %vm1133_vm2, %v1313_v20, 0.0  ;;  %v1225_v10 = vsel %vm1133_vm2, %v2157_v59, 0.0 }
 0x126   : > { %v1210_v31 = vadd.f32 %v1209_v26, %v1208_v21  ;;  %v1407_v33 = vadd.f32 %v1406_v30, %v1405_v19  ;;  %v1223_v26 = vsel %vm1133_vm2, %v2181_v25, 0.0  ;;  %v1316_v4 = vmul.f32 %v2173_v15, %v2173_v15 }
 0x127   : > { %v1227_v23 = vsel %vm1133_vm2, %v2173_v15, 0.0  ;;  %v1317_v25 = vmul.f32 %v2197_v46, %v2197_v46  ;;  %v1229_v59 = vsel %vm1133_vm2, %v2197_v46, 0.0  ;;  %v1318_v44 = vmul.f32 %v2213_v5, %v2213_v5 }
 0x128   : > { %v1409_v41 = vadd.f32 %v1408_v49, %v1407_v33  ;;  %v1212_v43 = vadd.f32 %v1211_v37, %v1210_v31  ;;  %v1422_v31 = vsel %vm1133_vm2, %v1314_v18, 0.0  ;;  %v1424_v37 = vsel %vm1133_vm2, %v1315_v39, 0.0 }
 0x129   : > { %v1319_v2 = vmul.f32 %v2189_v36, %v2189_v36  ;;  %v1428_v15 = vsel %vm1133_vm2, %v1317_v25, 0.0  ;;  %v1231_v50 = vsel %vm1133_vm2, %v2213_v5, 0.0  ;;  %v1233_v54 = vsel %vm1133_vm2, %v2189_v36, 0.0 }
 0x12a   : > { %v1214_v51 = vadd.f32 %v1213_v47, %v1212_v43  ;;  %v1411_v40 = vadd.f32 %v1410_v45, %v1409_v41  ;;  %v1426_v43 = vsel %vm1133_vm2, %v1316_v4, 0.0  ;;  %v1320_v46 = vmul.f32 %v2205_v58, %v2205_v58 }
 0x12b   : > { %v1321_v5 = vmul.f32 %v2229_v28, %v2229_v28  ;;  %v1237_v36 = vsel %vm1133_vm2, %v2229_v28, 0.0  ;;  %v1324_v28 = vmul.f32 %v2237_v42, %v2237_v42  ;;  %v1247_v4 = vsel %vm1133_vm2, %v2288_v35, 0.0 }
 0x12c   : > { %v1413_v60 = vadd.f32 %v1412_v29, %v1411_v40  ;;  %v1216_v61 = vadd.f32 %v1215_v14, %v1214_v51  ;;  %v1430_v29 = vsel %vm1133_vm2, %v1318_v44, 0.0  ;;  %v1434_v1 = vsel %vm1133_vm2, %v1320_v46, 0.0 }
 0x12e   : > { %v1218_v6 = vadd.f32 %v1217_v63, %v1216_v61  ;;  %v1415_v32 = vadd.f32 %v1414_v3, %v1413_v60  ;;  %v1432_v60 = vsel %vm1133_vm2, %v1319_v2, 0.0  ;;  %v1235_v61 = vsel %vm1133_vm2, %v2205_v58, 0.0 }
 0x12f   : > { %v1322_v3 = vmul.f32 %v2245_v53, %v2245_v53  ;;  %v1436_v58 = vsel %vm1133_vm2, %v1321_v5, 0.0 }
 0x130   : > { %v1417_v9 = vadd.f32 %v1416_v7, %v1415_v32  ;;  %v1220_v13 = vadd.f32 %v1219_v8, %v1218_v6  ;;  %v1323_v32 = vmul.f32 %v2221_v17, %v2221_v17  ;;  %v1239_v7 = vsel %vm1133_vm2, %v2245_v53, 0.0 }
 0x131   : > { %v1325_v53 = vmul.f32 %v2263_v11, %v2263_v11 }
 0x132   : > { %v1222_v19 = vadd.f32 %v1221_v16, %v1220_v13  ;;  %v1419_v21 = vadd.f32 %v1418_v57, %v1417_v9  ;;  %v1241_v9 = vsel %vm1133_vm2, %v2221_v17, 0.0  ;;  %v1438_v13 = vsel %vm1133_vm2, %v1322_v3, 0.0 }
 0x133   : > { %v1440_v18 = vsel %vm1133_vm2, %v1323_v32, 0.0  ;;  %v1245_v17 = vsel %vm1133_vm2, %v2263_v11, 0.0  ;;  %v1328_v11 = vmul.f32 %v2275_v24, %v2275_v24 }
 0x134   : > { %v1421_v27 = vadd.f32 %v1420_v22, %v1419_v21  ;;  %v1224_v30 = vadd.f32 %v1223_v26, %v1222_v19  ;;  %v1243_v19 = vsel %vm1133_vm2, %v2237_v42, 0.0  ;;  %v1442_v22 = vsel %vm1133_vm2, %v1324_v28, 0.0 }
 0x135   : > { %v1326_v26 = vmul.f32 %v2288_v35, %v2288_v35  ;;  %v1444_v42 = vsel %vm1133_vm2, %v1325_v53, 0.0  ;;  %v1329_v35 = vmul.f32 %v2336_v12, %v2336_v12  ;;  %v1450_v44 = vsel %vm1133_vm2, %v1328_v11, 0.0 }
 0x136   : > { %v1226_v33 = vadd.f32 %v1225_v10, %v1224_v30  ;;  %v1423_v49 = vadd.f32 %v1422_v31, %v1421_v27  ;;  %v1327_v10 = vmul.f32 %v2253_v0, %v2253_v0 }
 0x138   : > { %v1425_v38 = vadd.f32 %v1424_v37, %v1423_v49  ;;  %v1228_v41 = vadd.f32 %v1227_v23, %v1226_v33  ;;  %v1249_v49 = vsel %vm1133_vm2, %v2253_v0, 0.0  ;;  %v1446_v37 = vsel %vm1133_vm2, %v1326_v26, 0.0 }
 0x139   : > { %v1253_v0 = vsel %vm1133_vm2, %v2336_v12, 0.0  ;;  %v1257_v12 = vsel %vm1133_vm2, %v2312_v55, 0.0 }
 0x13a   : > { %v1230_v45 = vadd.f32 %v1229_v59, %v1228_v41  ;;  %v1427_v47 = vadd.f32 %v1426_v43, %v1425_v38  ;;  %v1448_v38 = vsel %vm1133_vm2, %v1327_v10, 0.0  ;;  %v1251_v41 = vsel %vm1133_vm2, %v2275_v24, 0.0 }
 0x13b   : > { %v1452_v24 = vsel %vm1133_vm2, %v1329_v35, 0.0 }
 0x13c   : > { %v1429_v51 = vadd.f32 %v1428_v15, %v1427_v47  ;;  %v1232_v40 = vadd.f32 %v1231_v50, %v1230_v45  ;;  %v1330_v45 = vmul.f32 %v2384_v52, %v2384_v52  ;;  %v1331_v15 = vmul.f32 %v2312_v55, %v2312_v55 }
 0x13d   : > { %v1255_v50 = vsel %vm1133_vm2, %v2384_v52, 0.0 }
 0x13e   : > { %v1234_v14 = vadd.f32 %v1233_v54, %v1232_v40  ;;  %v1431_v56 = vadd.f32 %v1430_v29, %v1429_v51  ;;  %v1332_v54 = vmul.f32 %v2360_v34, %v2360_v34  ;;  %v1454_v46 = vsel %vm1133_vm2, %v1330_v45, 0.0 }
 0x140   : > { %v1433_v62 = vadd.f32 %v1432_v60, %v1431_v56  ;;  %v1236_v63 = vadd.f32 %v1235_v61, %v1234_v14  ;;  %v1456_v56 = vsel %vm1133_vm2, %v1331_v15, 0.0  ;;  %v1259_v60 = vsel %vm1133_vm2, %v2360_v34, 0.0 }
 0x141   : > { %v1458_v5 = vsel %vm1133_vm2, %v1332_v54, 0.0 }
 0x142   : > { %v1238_v48 = vadd.f32 %v1237_v36, %v1236_v63  ;;  %v1435_v6 = vadd.f32 %v1434_v1, %v1433_v62 }
 0x144   : > { %v1437_v8 = vadd.f32 %v1436_v58, %v1435_v6  ;;  %v1240_v20 = vadd.f32 %v1239_v7, %v1238_v48 }
 0x146   : > { %v1242_v57 = vadd.f32 %v1241_v9, %v1240_v20  ;;  %v1439_v16 = vadd.f32 %v1438_v13, %v1437_v8 }
 0x148   : > { %v1441_v21 = vadd.f32 %v1440_v18, %v1439_v16  ;;  %v1244_v39 = vadd.f32 %v1243_v19, %v1242_v57 }
 0x14a   : > { %v1246_v27 = vadd.f32 %v1245_v17, %v1244_v39  ;;  %v1443_v30 = vadd.f32 %v1442_v22, %v1441_v21 }
 0x14c   : > { %v1445_v31 = vadd.f32 %v1444_v42, %v1443_v30  ;;  %v1248_v33 = vadd.f32 %v1247_v4, %v1246_v27 }
 0x14e   : > { %v1250_v23 = vadd.f32 %v1249_v49, %v1248_v33  ;;  %v1447_v25 = vadd.f32 %v1446_v37, %v1445_v31 }
 0x150   : > { %v1449_v43 = vadd.f32 %v1448_v38, %v1447_v25  ;;  %v1252_v59 = vadd.f32 %v1251_v41, %v1250_v23 }
 0x152   : > { %v1254_v47 = vadd.f32 %v1253_v0, %v1252_v59  ;;  %v1451_v2 = vadd.f32 %v1450_v44, %v1449_v43 }
 0x154   : > { %v1453_v51 = vadd.f32 %v1452_v24, %v1451_v2  ;;  %v1256_v40 = vadd.f32 %v1255_v50, %v1254_v47 }
 0x156   : > { %v1258_v29 = vadd.f32 %v1257_v12, %v1256_v40  ;;  %v1455_v14 = vadd.f32 %v1454_v46, %v1453_v51 }
 0x158   : > { %v1260_v52 = vadd.f32 %v1259_v60, %v1258_v29  ;;  %v1457_v61 = vadd.f32 %v1456_v56, %v1455_v14 }
 0x15a   : > { %v1261_v62 = vrot.slane %v1260_v52, 4  ;;  %v1459_v63 = vadd.f32 %v1458_v5, %v1457_v61 }
 0x15c   : > { %v1262_v55 = vadd.f32 %v1261_v62, %v1260_v52  ;;  %v1460_v1 = vrot.slane %v1459_v63, 4 }
 0x15e   : > { %v1263_v36 = vrot.slane %v1262_v55, 2  ;;  %v1461_v3 = vadd.f32 %v1460_v1, %v1459_v63 }
 0x160   : > { %v1264_v48 = vadd.f32 %v1263_v36, %v1262_v55  ;;  %v1462_v6 = vrot.slane %v1461_v3, 2 }
 0x162   : > { %v1265_v32 = vrot.slane %v1264_v48, 1  ;;  %v1463_v58 = vadd.f32 %v1462_v6, %v1461_v3 }
 0x164   : > { %v1266_v34 = vadd.f32 %v1265_v32, %v1264_v48  ;;  %v1464_v7 = vrot.slane %v1463_v58, 1 }
 0x166   : > { %1268 = vst.msk [vmem:[%s184_s29] sm:$0x1] %vm1267_vm3, %v1266_v34  ;;  %v1465_v8 = vadd.f32 %v1464_v7, %v1463_v58 }
 0x168   : > { %1466 = vst.msk [vmem:[%s184_s29 + $0x1] sm:$0x1] %vm1267_vm3, %v1465_v8 }
 0x169 PF: > { %s14_s12 = sadd.s32 1, %s1914_s12  }
 0x16a   : > { %p11_p5 = scmp.ge.s32.totalorder %s14_s12, 6  }
 0x16c   :  { %13 = sbr.rel (!%p11_p5) target bundleno = 1 (0x1), region = 70 }

// kernel: cnn_encoder_forward.7
= control target key start
LH: loop header
LB: loop body
LE: loop exit
PB: predicated region body
PF: predicated region fallthrough
CT: control target
= control target key end

     0   :  { %s326_s12 = smov 0   ;;  %s349_s0 = inlined_call_operand.vmem [shape: bf16[128,128], index: 0, kind: input, shape index: {}]   ;;  %s350_s1 = inlined_call_operand.vmem [shape: f32[1,128], index: 1, kind: input, shape index: {}]   ;;  %s351_s2 = inlined_call_operand.vmem [shape: f32[1,128], index: 2, kind: input, shape index: {}]   ;;  %s352_s3 = inlined_call_operand.vmem [shape: f32[128,128], index: 3, kind: output, shape index: {}]  }
   0x1 LB: > { %s268_s13 = sadd.s32 4294967295, %s304_s12   ;;  %p272_p0 = scmp.ge.s32.totalorder %s304_s12, 1  ;;  %s304_s12 = sphi %s326_s12, %s13_s12  }
   0x2   : > { %p138_p1 = scmp.lt.s32.totalorder %s304_s12, 5 }
   0x4   : > { %p139_p2 = pnand %p272_p0, %p138_p1 }
   0x5   : > { %s273_s14 = sshll.u32 (!%p139_p2), %s268_s13, 2 }
   0x6   : > { %142 = sbr.rel (%p139_p2) target bundleno = 25 (0x19), region = 32  ;;  %p163_p3 = scmp.lt.s32.totalorder (!%p139_p2), %s273_s14, 15 }
   0xb   : > { %s354_s14 = smov (!%p163_p3, %s273_s14), 15  ;;  %v277_v1 = vld [vmem:[%s350_s1] ss:$0 sm:$0xff] }
   0xc   : > { %s274_s15 = sshll.u32 %s354_s14, 2  ;;  %v278_v7 = vld [vmem:[%s351_s2] ss:$0 sm:$0xff]  ;;  %s276_s23 = sshll.u32 %s354_s14, 3 }
   0xd   : > { %s166_s18 = scalar_lea.vmem %s349_s0, %s274_s15  ;;  %s172_s26 = scalar_lea.vmem %s352_s3, %s276_s23 }
   0xe   : > { %v282_v0 = vld [vmem:[%s166_s18] sm:$0xff]   ;;  %v289_v2 = vld [vmem:[%s166_s18 + $0x8] sm:$0xff]  }
   0xf   : > { %v283_v3 = vunpack.c.l.bf16 %v282_v0  ;;  %v284_v4 = vunpack.c.h.bf16 %v282_v0  ;;  %v287_v5 = vunpack.c.l.bf16 %v289_v2  ;;  %v288_v6 = vunpack.c.h.bf16 %v289_v2 }
  0x11   : > { %v189_v8 = vmul.f32 %v283_v3, %v277_v1  ;;  %v190_v9 = vmul.f32 %v284_v4, %v277_v1  ;;  %v191_v10 = vmul.f32 %v287_v5, %v277_v1  ;;  %v192_v11 = vmul.f32 %v288_v6, %v277_v1 }
  0x13   : > { %v200_v12 = vadd.f32 %v278_v7, %v189_v8  ;;  %v201_v13 = vadd.f32 %v278_v7, %v190_v9  ;;  %v202_v14 = vadd.f32 %v278_v7, %v191_v10  ;;  %v203_v15 = vadd.f32 %v278_v7, %v192_v11 }
  0x15   : > { %v204_v16 = vmax.f32 %v200_v12, 0.0  ;;  %v205_v17 = vmax.f32 %v201_v13, 0.0  ;;  %v206_v18 = vmax.f32 %v202_v14, 0.0  ;;  %v207_v19 = vmax.f32 %v203_v15, 0.0 }
  0x17   : > { %208 = vst [vmem:[%s172_s26] sm:$0xff] %v204_v16  ;;  %209 = vst [vmem:[%s172_s26 + $0x8] sm:$0xff] %v205_v17 }
  0x18   : > { %210 = vst [vmem:[%s172_s26 + $0x10] sm:$0xff] %v206_v18  ;;  %211 = vst [vmem:[%s172_s26 + $0x18] sm:$0xff] %v207_v19 }
  0x19 PF: > { %s13_s12 = sadd.s32 1, %s304_s12  }
  0x1a   : > { %p10_p4 = scmp.ge.s32.totalorder %s13_s12, 6  }
  0x1c   :  { %12 = sbr.rel (!%p10_p4) target bundleno = 1 (0x1), region = 62 }

// kernel: cnn_encoder_forward.6
= control target key start
LH: loop header
LB: loop body
LE: loop exit
PB: predicated region body
PF: predicated region fallthrough
CT: control target
= control target key end

     0   :  { %s3366_s18 = smov 0   ;;  %s3368_s19 = smov 0   ;;  %s4343_s0 = inlined_call_operand.vmem [shape: bf16[2,18,18,64], index: 0, kind: input, shape index: {}, may-alias: {0,1,2}]   ;;  %s4344_s1 = inlined_call_operand.vmem [shape: bf16[2,18,18,64], index: 1, kind: input, shape index: {}, may-alias: {0,1,2}]   ;;  %s4345_s2 = inlined_call_operand.vmem [shape: bf16[2,18,18,64], index: 2, kind: input, shape index: {}, may-alias: {0,1,2}]   ;;  %s4346_s3 = inlined_call_operand.vmem [shape: bf16[9,64,32], index: 3, kind: input, shape index: {}]   ;;  %s4347_s4 = inlined_call_operand.vmem [shape: bf16[512,32], index: 4, kind: output, shape index: {0}]   ;;  %s4348_s5 = inlined_call_operand.vmem [shape: f32[4,2,32], index: 5, kind: output, shape index: {1}]  }
   0x1   :  { %s3370_s20 = smov 0   ;;  %s3372_s21 = smov 0  }
   0x2   :  { %s3374_s22 = smov 0  }
   0x3 LB: > { %s25_s23 = sadd.s32 1, %s3326_s20  ;;  %s28_s24 = sadd.s32 1, %s3330_s21  ;;  %s3334_s22 = sphi %s3374_s22, %s16_s22   ;;  %s3330_s21 = sphi %s3372_s21, %s4393_s21   ;;  %s3326_s20 = sphi %s3370_s20, %s4392_s20   ;;  %s3322_s19 = sphi %s3368_s19, %s4391_s19   ;;  %s3318_s18 = sphi %s3366_s18, %s4390_s18  }
   0x4   : > { %p26_p0 = scmp.ge.s32.totalorder %s25_s23, 2  ;;  %p2604_p1 = scmp.ge.s32.totalorder %s3334_s22, 1 }
   0x5   : > { %p280_p2 = scmp.lt.s32.totalorder %s3334_s22, 5 }
   0x6   : > { %s4395_s23 = smov (%p26_p0, %s25_s23), 0  ;;  %s4397_s24 = smov (!%p26_p0, %s28_s24), %s3330_s21 }
   0x7   : > { %p281_p3 = pnand %p2604_p1, %p280_p2  ;;  %p30_p4 = scmp.ge.s32.totalorder %s4397_s24, 2 }
   0x9   : > { %s4399_s24 = smov (%p30_p4, %s4397_s24), 0  ;;  %284 = sbr.rel (%p281_p3) target bundleno = 419 (0x1a3), region = 36 }
   0xe   : > { %v3250_v0 = vld [vmem:[%s4346_s3 + $0x38] sm:$0xff]   ;;  %s3404_s27 = sshll.u32 %s3318_s18, 3  ;;  %v3251_v1 = vld [vmem:[%s4346_s3 + $0x30] sm:$0xff]   ;;  %p355_p5 = scmp.lt.s32.totalorder %s3322_s19, 1  ;;  %v3252_v2 = vld [vmem:[%s4346_s3 + $0x28] sm:$0xff]   ;;  %vm707_vm3 = vcmask 523264  }
   0xf   : > { %3198 = vmatprep.subr.bf16.mxu1 %v3250_v0  ;;  %2982 = vmatprep.subr.bf16.mxu0 %v3250_v0  ;;  %p357_p6 = scmp.lt.s32.totalorder %s3404_s27, 17  ;;  %v3253_v3 = vld [vmem:[%s4346_s3 + $0x20] sm:$0xff]   ;;  %vm455_vm0 = vsmask.f32 3328  ;;  %vm456_vm1 = vsmask.f32 7440 }
  0x10   : > { %3202 = vmatpush3.bf16.msra.mxu1 %v3250_v0  ;;  %2983 = vmatpush3.bf16.msra.mxu0 %v3250_v0  ;;  %s356_s30 = scalar_select %p355_p5, %s3322_s19, 1  ;;  %v3430_v4 = vld [vmem:[%s4346_s3 + $0x18] sm:$0xff]   ;;  %vm3475_vm2 = vmor %vm455_vm0, %vm456_vm1  ;;  %vm1022_vm4 = vcmask 1042432   ;;  %vm1023_vm5 = vcmask 1046532   ;;  %v3280_v31 = vld [vmem:[%s4346_s3 + $0xb0] sm:$0xff]   ;;  %vm2319_vm7 = vcmask 257024  }
  0x11   : > { %3199 = vmatprep.subr.bf16.mxu1 %v3251_v1  ;;  %2984 = vmatprep.subr.bf16.mxu0 %v3251_v1  ;;  %s358_s8 = scalar_select %p357_p6, %s3404_s27, 17  ;;  %v3435_v5 = vld [vmem:[%s4346_s3 + $0x58] sm:$0xff]   ;;  %vm3632_vm6 = vmor %vm1022_vm4, %vm1023_vm5  ;;  %vm2336_vm8 = vcmask 261120   ;;  %vm2374_vm9 = vcmask 253952  }
  0x12   : > { %s3416_s9 = smul.u32 54, %s356_s30  ;;  %s3560_s7 = sadd.s32 8, %s3404_s27 }
  0x13   : > { %s3206_s12 = smul.u32 3, %s358_s8  ;;  %p374_p7 = scmp.lt.s32.totalorder %s3560_s7, 17 }
  0x14   : > { %3203 = vmatpush3.bf16.msra.mxu1 %v3251_v1  ;;  %2985 = vmatpush3.bf16.msra.mxu0 %v3251_v1  ;;  %s385_s29 = sadd.s32 1, %s3560_s7 }
  0x15   : > { %3200 = vmatprep.subr.bf16.mxu1 %v3252_v2  ;;  %2986 = vmatprep.subr.bf16.mxu0 %v3252_v2  ;;  %s361_s13 = sadd.s32 %s3416_s9, %s3206_s12  ;;  %p388_p8 = scmp.lt.s32.totalorder %s385_s29, 17 }
  0x16   : > { %s2606_s14 = sshll.u32 %s361_s13, 2 }
  0x17   : > { %s3425_s17 = scalar_lea.vmem %s4343_s0, %s2606_s14  ;;  %s4401_s29 = smov (!%p388_p8, %s385_s29), 17 }
  0x18   : > { %3204 = vmatpush3.bf16.msra.mxu1 %v3252_v2  ;;  %2987 = vmatpush3.bf16.msra.mxu0 %v3252_v2  ;;  %v3438_v6 = vld [vmem:[%s3425_s17] sm:$0xf]  ;;  %v3441_v7 = vld [vmem:[%s3425_s17 + $0x4] sm:$0xf]  ;;  %v3444_v8 = vld [vmem:[%s3425_s17 + $0x8] sm:$0x1] }
  0x19   : > { %3201 = vmatprep.subr.bf16.mxu1 %v3253_v3  ;;  %2988 = vmatprep.subr.bf16.mxu0 %v3253_v3  ;;  %v459_v9 = vshrl.u32 %v3438_v6, 16  ;;  %v462_v10 = vshll.u32 %v3438_v6, 16  ;;  %v468_v11 = vshll.u32 %v3441_v7, 16  ;;  %v472_v12 = vshrl.u32 %v3441_v7, 16  ;;  %v3451_v13 = vld [vmem:[%s3425_s17 + $0x30] sm:$0xf] }
  0x1a   : > { %v478_v14 = vshll.u32 %v3444_v8, 16  ;;  %v3455_v15 = vld [vmem:[%s3425_s17 + $0x34] sm:$0xf]  ;;  %v3458_v16 = vld [vmem:[%s3425_s17 + $0x38] sm:$0x1]  ;;  %v555_v22 = vshrl.u32 %v3451_v13, 16 }
  0x1b   : > { %v461_v17 = vrot.slane %v459_v9, 4  ;;  %v464_v18 = vrot.slane %v462_v10, 5  ;;  %v470_v19 = vrot.slane %v468_v11, 5  ;;  %v474_v20 = vrot.slane %v472_v12, 4  ;;  %v3467_v29 = vld [vmem:[%s3425_s17 + $0xc] sm:$0xf] }
  0x1c   : > { %3205 = vmatpush3.bf16.msra.mxu1 %v3253_v3  ;;  %2989 = vmatpush3.bf16.msra.mxu0 %v3253_v3  ;;  %v480_v21 = vrot.slane %v478_v14, 5  ;;  %v558_v23 = vshll.u32 %v3451_v13, 16  ;;  %v564_v24 = vshll.u32 %v3455_v15, 16  ;;  %v568_v27 = vshrl.u32 %v3455_v15, 16  ;;  %v3470_v30 = vld [vmem:[%s3425_s17 + $0x10] sm:$0xf] }
  0x1d   : > { %v465_v25 = vor.u32 %v464_v18, %v461_v17  ;;  %v475_v26 = vor.u32 %v474_v20, %v470_v19  ;;  %v574_v28 = vshll.u32 %v3458_v16, 16  ;;  %3006 = vmatprep.subr.bf16.mxu1 %v3430_v4  ;;  %3030 = vmatprep.subr.bf16.mxu0 %v3435_v5  ;;  %v557_v32 = vrot.slane %v555_v22, 4  ;;  %v3480_v40 = vld [vmem:[%s3425_s17 + $0x14] sm:$0x1]  ;;  %v3491_v52 = vld [vmem:[%s3425_s17 + $0x3c] sm:$0xf] }
  0x1e   : > { %v560_v33 = vrot.slane %v558_v23, 5  ;;  %v566_v34 = vrot.slane %v564_v24, 5  ;;  %v570_v37 = vrot.slane %v568_v27, 4  ;;  %v483_v41 = vshrl.u32 %v3467_v29, 16  ;;  %v3495_v57 = vld [vmem:[%s3425_s17 + $0x40] sm:$0xf] }
  0x1f   : > { %v466_v35 = vrot.slane %v465_v25, 4  ;;  %v476_v36 = vrot.slane %v475_v26, 4  ;;  %v576_v38 = vrot.slane %v574_v28, 5  ;;  %v486_v42 = vshll.u32 %v3467_v29, 16  ;;  %v3503_v62 = vld [vmem:[%s3425_s17 + $0x44] sm:$0x1] }
  0x20   : > { %v561_v39 = vor.u32 %v560_v33, %v557_v32  ;;  %v492_v43 = vshll.u32 %v3470_v30, 16  ;;  %v571_v46 = vor.u32 %v570_v37, %v566_v34  ;;  %v496_v47 = vshrl.u32 %v3470_v30, 16  ;;  %v3509_v3 = vld [vmem:[%s3425_s17 + $0x18] sm:$0xf]  ;;  %v3516_v14 = vld [vmem:[%s3425_s17 + $0x1c] sm:$0xf] }
  0x21   : > { %v471_v44 = vsel %vm3475_vm2, %v466_v35, %v470_v19  ;;  %v481_v45 = vsel %vm3475_vm2, %v476_v36, %v480_v21  ;;  %v485_v50 = vrot.slane %v483_v41, 4  ;;  %v488_v51 = vrot.slane %v486_v42, 5  ;;  %v3521_v21 = vld [vmem:[%s3425_s17 + $0x20] sm:$0x1]  ;;  %v3529_v26 = vld [vmem:[%s3425_s17 + $0x48] sm:$0xf] }
  0x22   : > { %v2624_v48 = vcombine.low %v471_v44, %v481_v45  ;;  %v562_v49 = vrot.slane %v561_v39, 4  ;;  %v572_v53 = vrot.slane %v571_v46, 4  ;;  %v494_v54 = vrot.slane %v492_v43, 5  ;;  %v3257_v33 = vld [vmem:[%s4346_s3 + $0x50] sm:$0xff]   ;;  %v3538_v35 = vld [vmem:[%s3425_s17 + $0x4c] sm:$0xf] }
  0x23   : > { %v498_v55 = vrot.slane %v496_v47, 4  ;;  %v502_v56 = vshll.u32 %v3480_v40, 16  ;;  %v1030_v58 = vrot.slane %v3444_v8, 5  ;;  %v489_v60 = vor.u32 %v488_v51, %v485_v50  ;;  %v3546_v45 = vld [vmem:[%s3425_s17 + $0x50] sm:$0x1]  ;;  %s375_s30 = scalar_select %p374_p7, %s3560_s7, 17 }
  0x24   : > { %2990 = vmatprep.mubr.msk.bf16.mxu0 %vm707_vm3, %v2624_v48  ;;  %v567_v59 = vsel %vm3475_vm2, %v562_v49, %v566_v34  ;;  %v1034_v61 = vrot.slane %v3470_v30, 5  ;;  %v577_v63 = vsel %vm3475_vm2, %v572_v53, %v576_v38  ;;  %v579_v2 = vshrl.u32 %v3491_v52, 16  ;;  %v3553_v50 = vld [vmem:[%s3425_s17 + $0x24] sm:$0xf]  ;;  %s3209_s7 = smul.u32 3, %s4401_s29 }
  0x25   : > { %v499_v0 = vor.u32 %v498_v55, %v494_v54  ;;  %v504_v1 = vrot.slane %v502_v56, 5  ;;  %v3511_v9 = vcombine.low %v567_v59, %v577_v63  ;;  %v490_v10 = vrot.slane %v489_v60, 4  ;;  %v3557_v56 = vld [vmem:[%s3425_s17 + $0x28] sm:$0xf]  ;;  %v3256_v60 = vld [vmem:[%s4346_s3 + $0x10] sm:$0xff]   ;;  %s3208_s6 = smul.u32 3, %s375_s30 }
  0x26   : > { %v582_v11 = vshll.u32 %v3491_v52, 16  ;;  %v588_v12 = vshll.u32 %v3495_v57, 16  ;;  %v581_v18 = vrot.slane %v579_v2, 4  ;;  %v592_v19 = vshrl.u32 %v3495_v57, 16  ;;  %s392_s27 = sadd.s32 %s3209_s7, %s3416_s9 }
  0x27   : > { %v500_v17 = vrot.slane %v499_v0, 4  ;;  %v598_v20 = vshll.u32 %v3503_v62, 16  ;;  %2998 = vmatprep.mubr.msk.bf16.mxu1 %vm707_vm3, %v3511_v9  ;;  %v495_v22 = vsel %vm3475_vm2, %v490_v10, %v494_v54  ;;  %v507_v25 = vshrl.u32 %v3509_v3, 16  ;;  %s378_s11 = sadd.s32 %s3208_s6, %s3416_s9  ;;  %s2610_s13 = sshll.u32 %s392_s27, 2 }
  0x28   : > { %v584_v23 = vrot.slane %v582_v11, 5  ;;  %v590_v24 = vrot.slane %v588_v12, 5  ;;  %v594_v28 = vrot.slane %v592_v19, 4  ;;  %v510_v34 = vshll.u32 %v3509_v3, 16  ;;  %s2608_s12 = sshll.u32 %s378_s11, 2 }
  0x29   : > { %v505_v27 = vsel %vm3475_vm2, %v500_v17, %v504_v1  ;;  %v600_v32 = vrot.slane %v598_v20, 5  ;;  %v509_v38 = vrot.slane %v507_v25, 4  ;;  %v516_v39 = vshll.u32 %v3516_v14, 16  ;;  %v3259_v1 = vld [vmem:[%s4346_s3 + $0x48] sm:$0xff]   ;;  %s380_s14 = scalar_lea.vmem %s4344_s1, %s2608_s12  ;;  %s2611_s12 = sshll.u32 %s3322_s19, 1 }
  0x2a   : > { %v3540_v36 = vcombine.low %v495_v22, %v505_v27  ;;  %v585_v37 = vor.u32 %v584_v23, %v581_v18  ;;  %v595_v41 = vor.u32 %v594_v28, %v590_v24  ;;  %v512_v42 = vrot.slane %v510_v34, 5  ;;  %v3578_v22 = vld [vmem:[%s3425_s17 + $0x2c] sm:$0x1]  ;;  %v3581_v23 = vld [vmem:[%s3425_s17 + $0x54] sm:$0xf]  ;;  %v3261_v34 = vld [vmem:[%s4346_s3 + $0x40] sm:$0xff]   ;;  %s4138_s27 = sadd.s32 %s3318_s18, %s2611_s12 }
  0x2b   : > { %v520_v43 = vshrl.u32 %v3516_v14, 16  ;;  %v526_v44 = vshll.u32 %v3521_v21, 16  ;;  %v518_v47 = vrot.slane %v516_v39, 5  ;;  %v603_v48 = vshrl.u32 %v3529_v26, 16  ;;  %s2612_s19 = sshll.u32 %s4138_s27, 4  ;;  %p410_p10 = scmp.lt.s32.totalorder %s4138_s27, 3 }
  0x2c   : > { %2991 = vmatmul.mubr.msk.bf16.vlgmr.msra.gmra.mxu0 %vm707_vm3, %v3540_v36  ;;  %v586_v46 = vrot.slane %v585_v37, 4  ;;  %v606_v49 = vshll.u32 %v3529_v26, 16  ;;  %v596_v51 = vrot.slane %v595_v41, 4  ;;  %v513_v53 = vor.u32 %v512_v42, %v509_v38  ;;  %p4159_p9 = scmp.lt.s32.totalorder %s2612_s19, 63 }
  0x2d   : > { %3031 = vmatpush3.bf16.msra.mxu0 %v3435_v5  ;;  %v522_v54 = vrot.slane %v520_v43, 4  ;;  %v528_v55 = vrot.slane %v526_v44, 5  ;;  %v605_v63 = vrot.slane %v603_v48, 4  ;;  %v612_v5 = vshll.u32 %v3538_v35, 16  ;;  %s4405_s27 = smov (!%p410_p10, %s4138_s27), 3 }
  0x2e   : > { %v591_v59 = vsel %vm3475_vm2, %v586_v46, %v590_v24  ;;  %3032 = vmatprep.subr.bf16.mxu0 %v3257_v33  ;;  %v608_v0 = vrot.slane %v606_v49, 5  ;;  %v601_v2 = vsel %vm3475_vm2, %v596_v51, %v600_v32  ;;  %v514_v10 = vrot.slane %v513_v53, 4  ;;  %v3587_v32 = vld [vmem:[%s3425_s17 + $0x58] sm:$0xf]  ;;  %v3608_v53 = vld [vmem:[%s3425_s17 + $0x5c] sm:$0x1]  ;;  %s394_s17 = scalar_lea.vmem %s4345_s2, %s2610_s13 }
  0x2f   : > { %v523_v11 = vor.u32 %v522_v54, %v518_v47  ;;  %v616_v12 = vshrl.u32 %v3538_v35, 16  ;;  %v3574_v17 = vcombine.low %v591_v59, %v601_v2  ;;  %v614_v19 = vrot.slane %v612_v5, 5  ;;  %s4403_s19 = smov (!%p4159_p9, %s2612_s19), 63  ;;  %s2615_s16 = sshll.u32 %s4405_s27, 1 }
  0x30   : > { %v609_v18 = vor.u32 %v608_v0, %v605_v63  ;;  %v622_v20 = vshll.u32 %v3546_v45, 16  ;;  %v519_v24 = vsel %vm3475_vm2, %v514_v10, %v518_v47  ;;  %v531_v28 = vshrl.u32 %v3553_v50, 16  ;;  %v3620_v10 = vld [vmem:[%s4346_s3 + $0x98] sm:$0xff]   ;;  %s2613_s13 = sshll.u32 %s4403_s19, 2  ;;  %s413_s26 = scalar_lea.vmem %s4348_s5, %s2615_s16 }
  0x31   : > { %3033 = vmatpush3.bf16.msra.mxu0 %v3257_v33  ;;  %v524_v25 = vrot.slane %v523_v11, 4  ;;  %v618_v27 = vrot.slane %v616_v12, 4  ;;  %2999 = vmatmul.mubr.msk.bf16.vlgmr.msra.gmra.mxu1 %vm707_vm3, %v3574_v17  ;;  %v3258_v33 = vld [vmem:[%s4346_s3 + $0x8] sm:$0xff]   ;;  %v534_v39 = vshll.u32 %v3553_v50, 16  ;;  %v540_v41 = vshll.u32 %v3557_v56, 16  ;;  %s4221_s15 = scalar_lea.vmem %s4347_s4, %s2613_s13 }
  0x32   : > { %v610_v37 = vrot.slane %v609_v18, 4  ;;  %v624_v38 = vrot.slane %v622_v20, 5  ;;  %3034 = vmatprep.subr.bf16.mxu0 %v3259_v1  ;;  %3007 = vmatpush3.bf16.msra.mxu1 %v3430_v4  ;;  %v533_v44 = vrot.slane %v531_v28, 4  ;;  %v544_v46 = vshrl.u32 %v3557_v56, 16 }
  0x33   : > { %v529_v42 = vsel %vm3475_vm2, %v524_v25, %v528_v55  ;;  %v619_v43 = vor.u32 %v618_v27, %v614_v19  ;;  %3008 = vmatprep.subr.bf16.mxu1 %v3256_v60  ;;  %v536_v49 = vrot.slane %v534_v39, 5  ;;  %v542_v51 = vrot.slane %v540_v41, 5  ;;  %v3260_v27 = vld [vmem:[%s4346_s3] sm:$0xff]  }
  0x34   : > { %v3603_v47 = vcombine.low %v519_v24, %v529_v42  ;;  %v615_v48 = vsel %vm3475_vm2, %v610_v37, %v614_v19  ;;  %v546_v59 = vrot.slane %v544_v46, 4  ;;  %v550_v4 = vshll.u32 %v3578_v22, 16 }
  0x35   : > { %v620_v54 = vrot.slane %v619_v43, 4  ;;  %v627_v55 = vshrl.u32 %v3581_v23, 16  ;;  %3035 = vmatpush3.bf16.msra.mxu0 %v3259_v1  ;;  %v537_v63 = vor.u32 %v536_v49, %v533_v44  ;;  %v630_v0 = vshll.u32 %v3581_v23, 16 }
  0x36   : > { %2994 = vmatprep.mubr.msk.bf16.mxu0 %vm707_vm3, %v3603_v47  ;;  %v636_v5 = vshll.u32 %v3587_v32, 16  ;;  %v640_v2 = vshrl.u32 %v3587_v32, 16  ;;  %3036 = vmatprep.subr.bf16.mxu0 %v3261_v34  ;;  %v547_v11 = vor.u32 %v546_v59, %v542_v51  ;;  %v552_v12 = vrot.slane %v550_v4, 5 }
  0x37   : > { %3009 = vmatpush3.bf16.msra.mxu1 %v3256_v60  ;;  %v625_v1 = vsel %vm3475_vm2, %v620_v54, %v624_v38  ;;  %v629_v18 = vrot.slane %v627_v55, 4  ;;  %v538_v20 = vrot.slane %v537_v63, 4  ;;  %v632_v24 = vrot.slane %v630_v0, 5 }
  0x38   : > { %v3624_v19 = vcombine.low %v615_v48, %v625_v1  ;;  %3010 = vmatprep.subr.bf16.mxu1 %v3258_v33  ;;  %v638_v25 = vrot.slane %v636_v5, 5  ;;  %v548_v28 = vrot.slane %v547_v11, 4  ;;  %v642_v37 = vrot.slane %v640_v2, 4 }
  0x39   : > { %v646_v60 = vshll.u32 %v3608_v53, 16  ;;  %3037 = vmatpush3.bf16.msra.mxu0 %v3261_v34  ;;  %v2664_v39 = vrot.slane %v3438_v6, 9  ;;  %v1037_v41 = vrot.slane %v3480_v40, 5  ;;  %v543_v42 = vsel %vm3475_vm2, %v538_v20, %v542_v51  ;;  %v3649_v40 = vld [vmem:[%s4346_s3 + $0x78] sm:$0xff]  }
  0x3a   : > { %3002 = vmatprep.mubr.msk.bf16.mxu1 %vm707_vm3, %v3624_v19  ;;  %v633_v43 = vor.u32 %v632_v24, %v629_v18  ;;  %v1027_v44 = vrot.slane %v3441_v7, 5  ;;  %3078 = vmatprep.subr.bf16.mxu0 %v3620_v10  ;;  %v553_v34 = vsel %vm3475_vm2, %v548_v28, %v552_v12  ;;  %v643_v46 = vor.u32 %v642_v37, %v638_v25 }
  0x3b   : > { %v648_v48 = vrot.slane %v646_v60, 5  ;;  %3011 = vmatpush3.bf16.msra.mxu1 %v3258_v33  ;;  %v2665_v49 = vrot.slane %v3467_v29, 9  ;;  %v3653_v51 = vcombine.low %v543_v42, %v553_v34  ;;  %v2644_v33 = vcombine.low %v3438_v6, %v3441_v7 }
  0x3c   : > { %v634_v54 = vrot.slane %v633_v43, 4  ;;  %3012 = vmatprep.subr.bf16.mxu1 %v3260_v27  ;;  %v1028_v59 = vsel %vm3632_vm6, %v2664_v39, %v1027_v44  ;;  %v1029_v4 = vrot.slane %v1027_v44, 4  ;;  %v644_v55 = vrot.slane %v643_v46, 4  ;;  %v3737_v46 = vld [vmem:[%s380_s14] sm:$0xf] }
  0x3d   : > { %v1035_v63 = vsel %vm3632_vm6, %v2665_v49, %v1034_v61  ;;  %v1036_v0 = vrot.slane %v1034_v61, 4  ;;  %2995 = vmatmul.mubr.msk.bf16.gmra.mxu0 %vm707_vm3, %v3653_v51  ;;  %v2666_v7 = vrot.slane %v3509_v3, 9  ;;  %v1041_v2 = vrot.slane %v3516_v14, 5 }
  0x3e   : > { %v639_v5 = vsel %vm3475_vm2, %v634_v54, %v638_v25  ;;  %v1031_v6 = vsel %vm3632_vm6, %v1029_v4, %v1030_v58  ;;  %v649_v1 = vsel %vm3475_vm2, %v644_v55, %v648_v48  ;;  %v1044_v12 = vrot.slane %v3521_v21, 5  ;;  %v3745_v4 = vld [vmem:[%s380_s14 + $0x4] sm:$0xf]  ;;  %v443_v55 = vld [vmem:[%s380_s14 + $0x8] sm:$0x1] }
  0x3f   : > { %3013 = vmatpush3.bf16.msra.mxu1 %v3260_v27  ;;  %v2680_v61 = vcombine.low %v1028_v59, %v1031_v6  ;;  %v1038_v11 = vsel %vm3632_vm6, %v1036_v0, %v1037_v41  ;;  %v3680_v18 = vcombine.low %v639_v5, %v649_v1  ;;  %v1042_v8 = vsel %vm3632_vm6, %v2666_v7, %v1041_v2  ;;  %v3269_v41 = vld [vmem:[%s4346_s3 + $0x90] sm:$0xff]  }
  0x40   : > { %3054 = vmatprep.subr.bf16.mxu1 %v3649_v40  ;;  %v1043_v58 = vrot.slane %v1041_v2, 4  ;;  %v1048_v20 = vrot.slane %v3557_v56, 5  ;;  %v3692_v24 = vcombine.low %v1035_v63, %v1038_v11  ;;  %v2667_v25 = vrot.slane %v3553_v50, 9 }
  0x41   : > { %3038 = vmatprep.mubr.msk.bf16.mxu0 %vm707_vm3, %v2680_v61  ;;  %3003 = vmatmul.mubr.msk.bf16.gmra.mxu1 %vm707_vm3, %v3680_v18  ;;  %v1055_v27 = vrot.slane %v3455_v15, 5  ;;  %v1051_v60 = vrot.slane %v3578_v22, 5  ;;  %v1058_v39 = vrot.slane %v3458_v16, 5  ;;  %v2668_v42 = vrot.slane %v3451_v13, 9  ;;  %v3273_v22 = vld [vmem:[%s4346_s3 + $0x88] sm:$0xff]  }
  0x42   : > { %v1045_v21 = vsel %vm3632_vm6, %v1043_v58, %v1044_v12  ;;  %3014 = vmatprep.mubr.msk.bf16.mxu1 %vm707_vm3, %v2644_v33  ;;  %v1050_v37 = vrot.slane %v1048_v20, 4  ;;  %v1062_v44 = vrot.slane %v3495_v57, 5  ;;  %v3711_v34 = vcombine.low %v3467_v29, %v3470_v30  ;;  %v3267_v29 = vld [vmem:[%s4346_s3 + $0x70] sm:$0xff]  }
  0x43   : > { %v3699_v28 = vcombine.low %v1042_v8, %v1045_v21  ;;  %v1057_v43 = vrot.slane %v1055_v27, 4  ;;  %v3717_v16 = vcombine.low %v3509_v3, %v3516_v14  ;;  %v1049_v30 = vsel %vm3632_vm6, %v2667_v25, %v1048_v20 }
  0x44   : > { %v1052_v3 = vsel %vm3632_vm6, %v1050_v37, %v1051_v60  ;;  %v2669_v14 = vrot.slane %v3491_v52, 9  ;;  %v1056_v48 = vsel %vm3632_vm6, %v2668_v42, %v1055_v27  ;;  %v1065_v54 = vrot.slane %v3503_v62, 5  ;;  %v3271_v62 = vld [vmem:[%s4346_s3 + $0x68] sm:$0xff]  }
  0x45   : > { %3039 = vmatmul.mubr.msk.bf16.vlgmr.msra.gmra.mxu0 %vm707_vm3, %v3692_v24  ;;  %v1059_v49 = vsel %vm3632_vm6, %v1057_v43, %v1058_v39  ;;  %v2670_v59 = vrot.slane %v3529_v26, 9  ;;  %v3749_v33 = vcombine.low %v3553_v50, %v3557_v56  ;;  %v1064_v63 = vrot.slane %v1062_v44, 4  ;;  %v3277_v50 = vld [vmem:[%s4346_s3 + $0x80] sm:$0xff]  }
  0x46   : > { %3079 = vmatpush3.bf16.msra.mxu0 %v3620_v10  ;;  %3042 = vmatprep.mubr.msk.bf16.mxu0 %vm707_vm3, %v3699_v28  ;;  %v1069_v10 = vrot.slane %v3538_v35, 5  ;;  %v1072_v0 = vrot.slane %v3546_v45, 5  ;;  %v3754_v5 = vcombine.low %v1049_v30, %v1052_v3  ;;  %v1430_v7 = vshrl.u32 %v3737_v46, 16 }
  0x47   : > { %3080 = vmatprep.subr.bf16.mxu0 %v3269_v41  ;;  %v1433_v2 = vshll.u32 %v3737_v46, 16  ;;  %v3765_v45 = vcombine.low %v1056_v48, %v1059_v49  ;;  %v1443_v56 = vshrl.u32 %v3745_v4, 16  ;;  %v1439_v1 = vshll.u32 %v3745_v4, 16 }
  0x48   : > { %v1071_v6 = vrot.slane %v1069_v10, 4  ;;  %v1449_v61 = vshll.u32 %v443_v55, 16  ;;  %v1063_v11 = vsel %vm3632_vm6, %v2669_v14, %v1062_v44  ;;  %v1432_v12 = vrot.slane %v1430_v7, 4  ;;  %v3275_v44 = vld [vmem:[%s4346_s3 + $0x60] sm:$0xff]  }
  0x49   : > { %3015 = vmatmul.mubr.msk.bf16.vlgmr.msra.gmra.mxu1 %vm707_vm3, %v3711_v34  ;;  %v1435_v8 = vrot.slane %v1433_v2, 5  ;;  %v1066_v58 = vsel %vm3632_vm6, %v1064_v63, %v1065_v54  ;;  %v1076_v20 = vrot.slane %v3587_v32, 5  ;;  %v1441_v21 = vrot.slane %v1439_v1, 5  ;;  %v3838_v7 = vld [vmem:[%s394_s17] sm:$0xf] }
  0x4a   : > { %3055 = vmatpush3.bf16.msra.mxu1 %v3649_v40  ;;  %3018 = vmatprep.mubr.msk.bf16.mxu1 %vm707_vm3, %v3717_v16  ;;  %v3774_v40 = vcombine.low %v3451_v13, %v3455_v15  ;;  %v1445_v25 = vrot.slane %v1443_v56, 4  ;;  %v2742_v13 = vrot.slane %v3737_v46, 9  ;;  %v1608_v15 = vrot.slane %v3745_v4, 5  ;;  %v3840_v2 = vld [vmem:[%s394_s17 + $0x4] sm:$0xf] }
  0x4b   : > { %3056 = vmatprep.subr.bf16.mxu1 %v3267_v29  ;;  %3081 = vmatpush3.bf16.msra.mxu0 %v3269_v41  ;;  %v1436_v27 = vor.u32 %v1435_v8, %v1432_v12  ;;  %v1611_v37 = vrot.slane %v443_v55, 5  ;;  %v1070_v60 = vsel %vm3632_vm6, %v2670_v59, %v1069_v10  ;;  %v2671_v39 = vrot.slane %v3581_v23, 9  ;;  %v446_v56 = vld [vmem:[%s394_s17 + $0x8] sm:$0x1] }
  0x4c   : > { %3082 = vmatprep.subr.bf16.mxu0 %v3273_v22  ;;  %v1446_v41 = vor.u32 %v1445_v25, %v1441_v21  ;;  %v1451_v42 = vrot.slane %v1449_v61, 5  ;;  %v1073_v43 = vsel %vm3632_vm6, %v1071_v6, %v1072_v0  ;;  %v1609_v30 = vsel %vm3632_vm6, %v2742_v13, %v1608_v15 }
  0x4d   : > { %3043 = vmatmul.mubr.msk.bf16.gmra.mxu0 %vm707_vm3, %v3754_v5  ;;  %v1610_v3 = vrot.slane %v1608_v15, 4  ;;  %v1078_v14 = vrot.slane %v1076_v20, 4  ;;  %v1079_v10 = vrot.slane %v3608_v53, 5  ;;  %v3808_v49 = vcombine.low %v3491_v52, %v3495_v57  ;;  %v3278_v52 = vld [vmem:[%s4346_s3 + $0xb8] sm:$0xff]  }
  0x4e   : > { %3057 = vmatpush3.bf16.msra.mxu1 %v3267_v29  ;;  %3046 = vmatprep.mubr.msk.bf16.mxu0 %vm707_vm3, %v3765_v45  ;;  %v1437_v29 = vrot.slane %v1436_v27, 4  ;;  %v1447_v48 = vrot.slane %v1446_v41, 4  ;;  %v3810_v54 = vcombine.low %v1063_v11, %v1066_v58  ;;  %v3818_v55 = vcombine.low %v1070_v60, %v1073_v43 }
  0x4f   : > { %3058 = vmatprep.subr.bf16.mxu1 %v3271_v62  ;;  %3083 = vmatpush3.bf16.msra.mxu0 %v3273_v22  ;;  %v3801_v22 = vld [vmem:[%s4346_s3 + $0xd8] sm:$0xff]   ;;  %v1612_v59 = vsel %vm3632_vm6, %v1610_v3, %v1611_v37  ;;  %v3832_v0 = vcombine.low %v3529_v26, %v3538_v35  ;;  %v1080_v1 = vsel %vm3632_vm6, %v1078_v14, %v1079_v10  ;;  %v1920_v26 = vshrl.u32 %v3838_v7, 16  ;;  %v3284_v10 = vld [vmem:[%s4346_s3 + $0xa0] sm:$0xff]  }
  0x50   : > { %3084 = vmatprep.subr.bf16.mxu0 %v3277_v50  ;;  %v1442_v53 = vsel %vm3475_vm2, %v1437_v29, %v1441_v21  ;;  %v1452_v57 = vsel %vm3475_vm2, %v1447_v48, %v1451_v42  ;;  %v3825_v63 = vcombine.low %v1609_v30, %v1612_v59  ;;  %v1923_v35 = vshll.u32 %v3838_v7, 16  ;;  %v3287_v48 = vld [vmem:[%s4346_s3 + $0xf8] sm:$0xff]   ;;  %v3290_v59 = vld [vmem:[%s4346_s3 + $0x110] sm:$0xff]  }
  0x51   : > { %3019 = vmatmul.mubr.msk.bf16.gmra.mxu1 %vm707_vm3, %v3749_v33  ;;  %v3836_v6 = vcombine.low %v1442_v53, %v1452_v57  ;;  %v1933_v61 = vshrl.u32 %v3840_v2, 16  ;;  %v1939_v11 = vshll.u32 %v446_v56, 16  ;;  %v2806_v12 = vrot.slane %v3838_v7, 9 }
  0x52   : > { %3022 = vmatprep.mubr.msk.bf16.mxu1 %vm707_vm3, %v3774_v40  ;;  %3059 = vmatpush3.bf16.msra.mxu1 %v3271_v62  ;;  %v1077_v62 = vsel %vm3632_vm6, %v2671_v39, %v1076_v20  ;;  %v2098_v8 = vrot.slane %v3840_v2, 5  ;;  %v1922_v58 = vrot.slane %v1920_v26, 4  ;;  %v1925_v20 = vrot.slane %v1923_v35, 5 }
  0x53   : > { %3060 = vmatprep.subr.bf16.mxu1 %v3275_v44  ;;  %3085 = vmatpush3.bf16.msra.mxu0 %v3277_v50  ;;  %v1929_v50 = vshll.u32 %v3840_v2, 16  ;;  %v1935_v21 = vrot.slane %v1933_v61, 4  ;;  %v2101_v25 = vrot.slane %v446_v56, 5  ;;  %v3861_v60 = vcombine.low %v1077_v62, %v1080_v1 }
  0x54   : > { %3126 = vmatprep.subr.bf16.mxu0 %v3801_v22  ;;  %v3857_v13 = vsel %vm3632_vm6, %v2806_v12, %v2098_v8  ;;  %v2100_v15 = vrot.slane %v2098_v8, 4  ;;  %v1926_v37 = vor.u32 %v1925_v20, %v1922_v58  ;;  %v1941_v41 = vrot.slane %v1939_v11, 5 }
  0x55   : > { %3047 = vmatmul.mubr.msk.bf16.gmra.mxu0 %vm707_vm3, %v3810_v54  ;;  %v1931_v27 = vrot.slane %v1929_v50, 5  ;;  %v3875_v3 = vcombine.low %v3581_v23, %v3587_v32  ;;  %v3281_v23 = vld [vmem:[%s4346_s3 + $0xd0] sm:$0xff]   ;;  %v3282_v32 = vld [vmem:[%s4346_s3 + $0xa8] sm:$0xff]   ;;  %v2708_v53 = vcombine.low %v3737_v46, %v3745_v4  ;;  %v3295_v4 = vld [vmem:[%s4346_s3 + $0x100] sm:$0xff]  }
  0x56   : > { %3050 = vmatprep.mubr.msk.bf16.mxu0 %vm707_vm3, %v3818_v55  ;;  %3061 = vmatpush3.bf16.msra.mxu1 %v3275_v44  ;;  %v3865_v42 = vsel %vm3632_vm6, %v2100_v15, %v2101_v25  ;;  %v1927_v43 = vrot.slane %v1926_v37, 4  ;;  %v3291_v46 = vld [vmem:[%s4346_s3 + $0xe8] sm:$0xff]  }
  0x57   : > { %3102 = vmatprep.subr.bf16.mxu1 %v3278_v52  ;;  %v1936_v39 = vor.u32 %v1935_v21, %v1931_v27  ;;  %v2815_v44 = vcombine.low %v3857_v13, %v3865_v42 }
  0x58   : > { %v1932_v30 = vsel %vm3475_vm2, %v1927_v43, %v1931_v27 }
  0x59   : > { %3023 = vmatmul.mubr.msk.bf16.gmra.mxu1 %vm707_vm3, %v3808_v49  ;;  %v1937_v29 = vrot.slane %v1936_v39, 4 }
  0x5a   : > { %3026 = vmatprep.mubr.msk.bf16.mxu1 %vm707_vm3, %v3832_v0 }
  0x5b   : > { %v1942_v38 = vsel %vm3475_vm2, %v1937_v29, %v1941_v41 }
  0x5c   : > { %v3883_v14 = vcombine.low %v1932_v30, %v1942_v38 }
  0x5d   : > { %3051 = vmatmul.mubr.msk.bf16.gmra.mxu0 %vm707_vm3, %v3861_v60 }
  0x5e   : > { %3086 = vmatprep.mubr.msk.bf16.mxu0 %vm707_vm3, %v3540_v36  ;;  %v3283_v36 = vld [vmem:[%s4346_s3 + $0xc8] sm:$0xff]  }
  0x61   : > { %3027 = vmatmul.mubr.msk.bf16.gmra.mxu1 %vm707_vm3, %v3875_v3 }
  0x62   : > { %3062 = vmatprep.mubr.msk.bf16.mxu1 %vm707_vm3, %v3711_v34  ;;  %v3286_v34 = vld [vmem:[%s4346_s3 + $0xc0] sm:$0xff]  }
  0x65   : > { %3087 = vmatmul.mubr.msk.bf16.vlgmr.msra.gmra.mxu0 %vm707_vm3, %v3603_v47 }
  0x66   : > { %3127 = vmatpush3.bf16.msra.mxu0 %v3801_v22  ;;  %3090 = vmatprep.mubr.msk.bf16.mxu0 %vm707_vm3, %v3653_v51  ;;  %v3288_v22 = vld [vmem:[%s4346_s3 + $0x118] sm:$0xff]  }
  0x67   : > { %3128 = vmatprep.subr.bf16.mxu0 %v3281_v23 }
  0x69   : > { %3063 = vmatmul.mubr.msk.bf16.vlgmr.msra.gmra.mxu1 %vm707_vm3, %v3717_v16 }
  0x6a   : > { %3103 = vmatpush3.bf16.msra.mxu1 %v3278_v52  ;;  %3066 = vmatprep.mubr.msk.bf16.mxu1 %vm707_vm3, %v3749_v33 }
  0x6b   : > { %3104 = vmatprep.subr.bf16.mxu1 %v3280_v31  ;;  %3129 = vmatpush3.bf16.msra.mxu0 %v3281_v23 }
  0x6c   : > { %3130 = vmatprep.subr.bf16.mxu0 %v3283_v36 }
  0x6d   : > { %3091 = vmatmul.mubr.msk.bf16.gmra.mxu0 %vm707_vm3, %v3511_v9 }
  0x6e   : > { %3105 = vmatpush3.bf16.msra.mxu1 %v3280_v31  ;;  %3094 = vmatprep.mubr.msk.bf16.mxu0 %vm707_vm3, %v3574_v17 }
  0x6f   : > { %3106 = vmatprep.subr.bf16.mxu1 %v3282_v32  ;;  %3131 = vmatpush3.bf16.msra.mxu0 %v3283_v36 }
  0x70   : > { %3132 = vmatprep.subr.bf16.mxu0 %v3286_v34 }
  0x71   : > { %3067 = vmatmul.mubr.msk.bf16.gmra.mxu1 %vm707_vm3, %v3774_v40 }
  0x72   : > { %3070 = vmatprep.mubr.msk.bf16.mxu1 %vm707_vm3, %v3808_v49  ;;  %3107 = vmatpush3.bf16.msra.mxu1 %v3282_v32 }
  0x73   : > { %3108 = vmatprep.subr.bf16.mxu1 %v3284_v10  ;;  %3133 = vmatpush3.bf16.msra.mxu0 %v3286_v34 }
  0x74   : > { %3174 = vmatprep.subr.bf16.mxu0 %v3288_v22 }
  0x75   : > { %3095 = vmatmul.mubr.msk.bf16.gmra.mxu0 %vm707_vm3, %v3624_v19 }
  0x76   : > { %3098 = vmatprep.mubr.msk.bf16.mxu0 %vm707_vm3, %v3680_v18  ;;  %3109 = vmatpush3.bf16.msra.mxu1 %v3284_v10 }
  0x77   : > { %3150 = vmatprep.subr.bf16.mxu1 %v3287_v48 }
  0x79   : > { %3071 = vmatmul.mubr.msk.bf16.gmra.mxu1 %vm707_vm3, %v3832_v0 }
  0x7a   : > { %3074 = vmatprep.mubr.msk.bf16.mxu1 %vm707_vm3, %v3875_v3 }
  0x7d   : > { %3099 = vmatmul.mubr.msk.bf16.gmra.mxu0 %vm707_vm3, %v3836_v6 }
  0x7e   : > { %3134 = vmatprep.mubr.msk.bf16.mxu0 %vm707_vm3, %v3717_v16  ;;  %v3289_v16 = vld [vmem:[%s4346_s3 + $0xf0] sm:$0xff]  }
  0x81   : > { %3075 = vmatmul.mubr.msk.bf16.gmra.mxu1 %vm707_vm3, %v2708_v53 }
  0x82   : > { %3110 = vmatprep.mubr.msk.bf16.mxu1 %vm707_vm3, %v3692_v24  ;;  %v3292_v24 = vld [vmem:[%s4346_s3 + $0x108] sm:$0xff]  }
  0x85   : > { %3135 = vmatmul.mubr.msk.bf16.vlgmr.msra.gmra.mxu0 %vm707_vm3, %v3749_v33  ;;  %v3293_v33 = vld [vmem:[%s4346_s3 + $0xe0] sm:$0xff]  }
  0x86   : > { %3175 = vmatpush3.bf16.msra.mxu0 %v3288_v22  ;;  %3138 = vmatprep.mubr.msk.bf16.mxu0 %vm707_vm3, %v3774_v40  ;;  %v2772_v40 = vcombine.low %v3838_v7, %v3840_v2 }
  0x87   : > { %3176 = vmatprep.subr.bf16.mxu0 %v3290_v59 }
  0x89   : > { %3111 = vmatmul.mubr.msk.bf16.vlgmr.msra.gmra.mxu1 %vm707_vm3, %v3699_v28 }
  0x8a   : > { %3151 = vmatpush3.bf16.msra.mxu1 %v3287_v48  ;;  %3114 = vmatprep.mubr.msk.bf16.mxu1 %vm707_vm3, %v3754_v5 }
  0x8b   : > { %3152 = vmatprep.subr.bf16.mxu1 %v3289_v16  ;;  %3177 = vmatpush3.bf16.msra.mxu0 %v3290_v59 }
  0x8c   : > { %3178 = vmatprep.subr.bf16.mxu0 %v3292_v24 }
  0x8d   : > { %3139 = vmatmul.mubr.msk.bf16.gmra.mxu0 %vm707_vm3, %v3808_v49 }
  0x8e   : > { %3153 = vmatpush3.bf16.msra.mxu1 %v3289_v16  ;;  %3142 = vmatprep.mubr.msk.bf16.mxu0 %vm707_vm3, %v3832_v0 }
  0x8f   : > { %3154 = vmatprep.subr.bf16.mxu1 %v3291_v46  ;;  %3179 = vmatpush3.bf16.msra.mxu0 %v3292_v24 }
  0x90   : > { %3180 = vmatprep.subr.bf16.mxu0 %v3295_v4 }
  0x91   : > { %3115 = vmatmul.mubr.msk.bf16.gmra.mxu1 %vm707_vm3, %v3765_v45 }
  0x92   : > { %3118 = vmatprep.mubr.msk.bf16.mxu1 %vm707_vm3, %v3810_v54  ;;  %3155 = vmatpush3.bf16.msra.mxu1 %v3291_v46 }
  0x93   : > { %3156 = vmatprep.subr.bf16.mxu1 %v3293_v33  ;;  %3181 = vmatpush3.bf16.msra.mxu0 %v3295_v4 }
  0x95   : > { %3143 = vmatmul.mubr.msk.bf16.gmra.mxu0 %vm707_vm3, %v3875_v3 }
  0x96   : > { %3146 = vmatprep.mubr.msk.bf16.mxu0 %vm707_vm3, %v2708_v53  ;;  %3157 = vmatpush3.bf16.msra.mxu1 %v3293_v33 }
  0x99   : > { %3119 = vmatmul.mubr.msk.bf16.gmra.mxu1 %vm707_vm3, %v3818_v55 }
  0x9a   : > { %3122 = vmatprep.mubr.msk.bf16.mxu1 %vm707_vm3, %v3861_v60 }
  0x9d   : > { %3147 = vmatmul.mubr.msk.bf16.gmra.mxu0 %vm707_vm3, %v2772_v40 }
  0x9e   : > { %3182 = vmatprep.mubr.msk.bf16.mxu0 %vm707_vm3, %v3699_v28 }
  0xa1   : > { %3123 = vmatmul.mubr.msk.bf16.gmra.mxu1 %vm707_vm3, %v3825_v63 }
  0xa2   : > { %3158 = vmatprep.mubr.msk.bf16.mxu1 %vm707_vm3, %v3603_v47 }
  0xa5   : > { %3183 = vmatmul.mubr.msk.bf16.vlgmr.msra.gmra.mxu0 %vm707_vm3, %v3754_v5 }
  0xa6   : > { %3186 = vmatprep.mubr.msk.bf16.mxu0 %vm707_vm3, %v3765_v45 }
  0xa9   : > { %3159 = vmatmul.mubr.msk.bf16.vlgmr.msra.gmra.mxu1 %vm707_vm3, %v3653_v51 }
  0xaa   : > { %3162 = vmatprep.mubr.msk.bf16.mxu1 %vm707_vm3, %v3511_v9 }
  0xad   : > { %3187 = vmatmul.mubr.msk.bf16.gmra.mxu0 %vm707_vm3, %v3810_v54 }
  0xae   : > { %3190 = vmatprep.mubr.msk.bf16.mxu0 %vm707_vm3, %v3818_v55 }
  0xb1   : > { %3163 = vmatmul.mubr.msk.bf16.gmra.mxu1 %vm707_vm3, %v3574_v17 }
  0xb2   : > { %3166 = vmatprep.mubr.msk.bf16.mxu1 %vm707_vm3, %v3624_v19 }
  0xb5   : > { %3191 = vmatmul.mubr.msk.bf16.gmra.mxu0 %vm707_vm3, %v3861_v60 }
  0xb6   : > { %3194 = vmatprep.mubr.msk.bf16.mxu0 %vm707_vm3, %v3825_v63 }
  0xb9   : > { %3167 = vmatmul.mubr.msk.bf16.gmra.mxu1 %vm707_vm3, %v3680_v18 }
  0xba   : > { %3170 = vmatprep.mubr.msk.bf16.mxu1 %vm707_vm3, %v3836_v6 }
  0xbd   : > { %3195 = vmatmul.mubr.msk.bf16.gmra.mxu0 %vm707_vm3, %v2815_v44 }
  0xc1   : > { %3171 = vmatmul.mubr.msk.bf16.gmra.mxu1 %vm707_vm3, %v3883_v14 }
  0xec   : > { %v2992_v9 = vpop.f32.mrf.mxu0 }
  0xee   : > { %v766_v47 = vpop.f32.mrf.mxu0 }
  0xf0   : > { %v2993_v51 = vpop.f32.mrf.mxu0 }
  0xf1   : > { %v3000_v17 = vpop.f32.mrf.mxu1 }
  0xf2   : > { %v769_v5 = vpop.f32.mrf.mxu0 }
  0xf3   : > { %v798_v19 = vpop.f32.mrf.mxu1 }
  0xf5   : > { %v3001_v28 = vpop.f32.mrf.mxu1 }
  0xf7   : > { %v801_v45 = vpop.f32.mrf.mxu1 }
  0xfd   : > { %v2996_v18 = vpop.f32.mrf.mxu0 }
  0xff   : > { %v782_v49 = vpop.f32.mrf.mxu0 }
 0x101   : > { %v3004_v54 = vpop.f32.mrf.mxu1  ;;  %v2997_v55 = vpop.f32.mrf.mxu0 }
 0x103   : > { %v814_v52 = vpop.f32.mrf.mxu1  ;;  %v785_v57 = vpop.f32.mrf.mxu0 }
 0x105   : > { %v3005_v63 = vpop.f32.mrf.mxu1  ;;  %v3040_v0 = vpop.f32.mrf.mxu0 }
 0x107   : > { %v4027_v62 = vpop.f32.mrf.mxu1  ;;  %v1196_v6 = vpop.f32.mrf.mxu0 }
 0x109   : > { %v3016_v7 = vpop.f32.mrf.mxu1  ;;  %v3041_v2 = vpop.f32.mrf.mxu0 }
 0x10a   : > { %v960_v56 = vadd.f32 %v3016_v7, %v2992_v9 }
 0x10b   : > { %v951_v1 = vpop.f32.mrf.mxu1  ;;  %v1199_v26 = vpop.f32.mrf.mxu0 }
 0x10c   : > { %v4029_v35 = vadd.f32 %v3040_v0, %v960_v56  ;;  %v952_v61 = vadd.f32 %v951_v1, %v766_v47 }
 0x10d   : > { %v3017_v50 = vpop.f32.mrf.mxu1  ;;  %v3044_v11 = vpop.f32.mrf.mxu0 }
 0x10e   : > { %v4031_v12 = vadd.f32 %v1196_v6, %v952_v61  ;;  %v963_v8 = vadd.f32 %v3017_v50, %v2993_v51 }
 0x10f   : > { %v954_v58 = vpop.f32.mrf.mxu1  ;;  %v1212_v20 = vpop.f32.mrf.mxu0 }
 0x110   : > { %v4033_v21 = vadd.f32 %v3041_v2, %v963_v8  ;;  %v955_v25 = vadd.f32 %v954_v58, %v769_v5 }
 0x111   : > { %v3020_v27 = vpop.f32.mrf.mxu1  ;;  %v3045_v13 = vpop.f32.mrf.mxu0 }
 0x112   : > { %v4035_v15 = vadd.f32 %v1199_v26, %v955_v25  ;;  %v976_v37 = vadd.f32 %v3020_v27, %v2996_v18 }
 0x113   : > { %v967_v60 = vpop.f32.mrf.mxu1  ;;  %v1215_v39 = vpop.f32.mrf.mxu0 }
 0x114   : > { %v4037_v41 = vadd.f32 %v3044_v11, %v976_v37  ;;  %v968_v42 = vadd.f32 %v967_v60, %v782_v49 }
 0x115   : > { %v3021_v43 = vpop.f32.mrf.mxu1  ;;  %v3048_v44 = vpop.f32.mrf.mxu0 }
 0x116   : > { %v4039_v29 = vadd.f32 %v1212_v20, %v968_v42  ;;  %v979_v30 = vadd.f32 %v3021_v43, %v2997_v55 }
 0x117   : > { %v970_v3 = vpop.f32.mrf.mxu1  ;;  %v1228_v38 = vpop.f32.mrf.mxu0 }
 0x118   : > { %v4041_v14 = vadd.f32 %v3045_v13, %v979_v30  ;;  %v971_v23 = vadd.f32 %v970_v3, %v785_v57 }
 0x119   : > { %v3024_v31 = vpop.f32.mrf.mxu1  ;;  %v3049_v36 = vpop.f32.mrf.mxu0 }
 0x11a   : > { %v4043_v32 = vadd.f32 %v1215_v39, %v971_v23  ;;  %v992_v34 = vadd.f32 %v3024_v31, %v3000_v17 }
 0x11b   : > { %v983_v10 = vpop.f32.mrf.mxu1  ;;  %v1231_v22 = vpop.f32.mrf.mxu0 }
 0x11c   : > { %v4045_v48 = vadd.f32 %v3048_v44, %v992_v34  ;;  %v984_v53 = vadd.f32 %v983_v10, %v798_v19 }
 0x11d   : > { %v3025_v59 = vpop.f32.mrf.mxu1  ;;  %v3052_v16 = vpop.f32.mrf.mxu0 }
 0x11e   : > { %v4047_v24 = vadd.f32 %v1228_v38, %v984_v53  ;;  %v995_v46 = vadd.f32 %v3025_v59, %v3001_v28 }
 0x11f   : > { %v986_v4 = vpop.f32.mrf.mxu1  ;;  %v1244_v33 = vpop.f32.mrf.mxu0 }
 0x120   : > { %v4049_v40 = vadd.f32 %v3049_v36, %v995_v46  ;;  %v987_v9 = vadd.f32 %v986_v4, %v801_v45 }
 0x121   : > { %v3028_v47 = vpop.f32.mrf.mxu1  ;;  %v3053_v51 = vpop.f32.mrf.mxu0 }
 0x122   : > { %v4051_v5 = vadd.f32 %v1231_v22, %v987_v9  ;;  %v1008_v17 = vadd.f32 %v3028_v47, %v3004_v54 }
 0x123   : > { %v999_v18 = vpop.f32.mrf.mxu1  ;;  %v1247_v49 = vpop.f32.mrf.mxu0 }
 0x124   : > { %v4053_v55 = vadd.f32 %v3052_v16, %v1008_v17  ;;  %v1000_v19 = vadd.f32 %v999_v18, %v814_v52 }
 0x125   : > { %v3029_v57 = vpop.f32.mrf.mxu1  ;;  %v4055_v0 = vpop.f32.mrf.mxu0 }
 0x126   : > { %v4057_v6 = vadd.f32 %v1244_v33, %v1000_v19  ;;  %v1011_v28 = vadd.f32 %v3029_v57, %v3005_v63 }
 0x127   : > { %v1002_v7 = vpop.f32.mrf.mxu1  ;;  %v4059_v2 = vpop.f32.mrf.mxu0 }
 0x128   : > { %v4061_v45 = vadd.f32 %v3053_v51, %v1011_v28  ;;  %v1003_v56 = vadd.f32 %v1002_v7, %v4027_v62 }
 0x129   : > { %v3064_v1 = vpop.f32.mrf.mxu1  ;;  %v4064_v54 = vpop.f32.mrf.mxu0 }
 0x12a   : > { %v4066_v26 = vadd.f32 %v1247_v49, %v1003_v56 }
 0x12b   : > { %v1350_v61 = vpop.f32.mrf.mxu1  ;;  %v4068_v52 = vpop.f32.mrf.mxu0 }
 0x12d   : > { %v3065_v50 = vpop.f32.mrf.mxu1  ;;  %v4070_v11 = vpop.f32.mrf.mxu0 }
 0x12f   : > { %v1353_v8 = vpop.f32.mrf.mxu1  ;;  %v4072_v63 = vpop.f32.mrf.mxu0 }
 0x131   : > { %v3068_v58 = vpop.f32.mrf.mxu1  ;;  %v4074_v20 = vpop.f32.mrf.mxu0 }
 0x133   : > { %v1366_v25 = vpop.f32.mrf.mxu1  ;;  %v4076_v27 = vpop.f32.mrf.mxu0 }
 0x135   : > { %v3069_v62 = vpop.f32.mrf.mxu1  ;;  %v4078_v13 = vpop.f32.mrf.mxu0 }
 0x137   : > { %v1369_v37 = vpop.f32.mrf.mxu1  ;;  %v4080_v60 = vpop.f32.mrf.mxu0 }
 0x139   : > { %v3072_v39 = vpop.f32.mrf.mxu1  ;;  %v4082_v42 = vpop.f32.mrf.mxu0 }
 0x13b   : > { %v1382_v43 = vpop.f32.mrf.mxu1  ;;  %v4084_v44 = vpop.f32.mrf.mxu0 }
 0x13d   : > { %v3073_v30 = vpop.f32.mrf.mxu1  ;;  %v4086_v3 = vpop.f32.mrf.mxu0 }
 0x13f   : > { %v1385_v38 = vpop.f32.mrf.mxu1  ;;  %v4088_v23 = vpop.f32.mrf.mxu0 }
 0x141   : > { %v3076_v31 = vpop.f32.mrf.mxu1  ;;  %v4090_v36 = vpop.f32.mrf.mxu0 }
 0x143   : > { %v4092_v34 = vpop.f32.mrf.mxu1  ;;  %v4094_v10 = vpop.f32.mrf.mxu0 }
 0x144   : > { %4353 = vst [vmem:[#allocation2_spill] sm:$0xff] %v4094_v10 }
 0x145   : > { %v3077_v22 = vpop.f32.mrf.mxu1  ;;  %v4096_v53 = vpop.f32.mrf.mxu0 }
 0x147   : > { %v1401_v59 = vpop.f32.mrf.mxu1  ;;  %v4098_v16 = vpop.f32.mrf.mxu0 }
 0x149   : > { %v3112_v46 = vpop.f32.mrf.mxu1  ;;  %v4100_v4 = vpop.f32.mrf.mxu0 }
 0x14a   : > { %4354 = vst [vmem:[#allocation3_spill] sm:$0xff] %v4100_v4 }
 0x14b   : > { %v1686_v33 = vpop.f32.mrf.mxu1  ;;  %v4102_v9 = vpop.f32.mrf.mxu0 }
 0x14c   : > { %4355 = vst [vmem:[#allocation4_spill] sm:$0xff] %v4102_v9 }
 0x14d   : > { %v4104_v47 = vpop.f32.mrf.mxu1  ;;  %v4106_v51 = vpop.f32.mrf.mxu0 }
 0x14e   : > { %4356 = vst [vmem:[#allocation5_spill] sm:$0xff] %v4106_v51 }
 0x14f   : > { %v4108_v17 = vpop.f32.mrf.mxu1  ;;  %v4110_v18 = vpop.f32.mrf.mxu0 }
 0x150   : > { %4357 = vst [vmem:[#allocation6_spill] sm:$0xff] %v4110_v18 }
 0x151   : > { %v4112_v49 = vpop.f32.mrf.mxu1  ;;  %v4114_v19 = vpop.f32.mrf.mxu0 }
 0x152   : > { %4358 = vst [vmem:[#allocation7_spill] sm:$0xff] %v4114_v19 }
 0x153   : > { %v4116_v57 = vpop.f32.mrf.mxu1  ;;  %v4118_v28 = vpop.f32.mrf.mxu0 }
 0x154   : > { %4359 = vst [vmem:[#allocation8_spill] sm:$0xff] %v4116_v57  ;;  %4360 = vst [vmem:[#allocation9_spill] sm:$0xff] %v4118_v28 }
 0x155   : > { %v4120_v7 = vpop.f32.mrf.mxu1  ;;  %v4122_v56 = vpop.f32.mrf.mxu0 }
 0x156   : > { %4361 = vst [vmem:[#allocation10_spill] sm:$0xff] %v4120_v7  ;;  %4362 = vst [vmem:[#allocation11_spill] sm:$0xff] %v4122_v56  ;;  %v1415_v56 = vadd.f32 %v3064_v1, %v4029_v35 }
 0x157   : > { %v4124_v9 = vpop.f32.mrf.mxu1  ;;  %v4126_v51 = vpop.f32.mrf.mxu0 }
 0x158   : > { %4363 = vst [vmem:[#allocation12_spill] sm:$0xff] %v4124_v9  ;;  %4364 = vst [vmem:[#allocation13_spill] sm:$0xff] %v4126_v51  ;;  %v1413_v51 = vadd.f32 %v1350_v61, %v4031_v12  ;;  %v1417_v12 = vadd.f32 %v1366_v25, %v4039_v29  ;;  %v1418_v61 = vadd.f32 %v1369_v37, %v4043_v32 }
 0x159   : > { %v4128_v4 = vpop.f32.mrf.mxu1  ;;  %v4130_v10 = vpop.f32.mrf.mxu0  ;;  %v1424_v29 = vadd.f32 %v3073_v30, %v4049_v40  ;;  %v1427_v32 = vadd.f32 %v3076_v31, %v4053_v55  ;;  %v1428_v40 = vadd.f32 %v3077_v22, %v4061_v45 }
 0x15a   : > { %4365 = vst [vmem:[#allocation14_spill] sm:$0xff] %v4128_v4  ;;  %4366 = vst [vmem:[#allocation15_spill] sm:$0xff] %v4130_v10  ;;  %v1416_v10 = vadd.f32 %v3065_v50, %v4033_v21  ;;  %v1589_v35 = vadd.f32 %v4059_v2, %v1413_v51  ;;  %v1421_v2 = vadd.f32 %v1382_v43, %v4047_v24 }
 0x15b   : > { %v4133_v18 = vpop.f32.mrf.mxu1  ;;  %v4135_v19 = vpop.f32.mrf.mxu0  ;;  %v1425_v24 = vadd.f32 %v4092_v34, %v4057_v6  ;;  %v1594_v55 = vadd.f32 %v4076_v27, %v1418_v61  ;;  %v1600_v6 = vadd.f32 %v4082_v42, %v1424_v29  ;;  %v4372_v42 = vld [vmem:[#allocation2_spill] sm:$0xff] }
 0x15c   : > { %4367 = vst [vmem:[#allocation16_spill] sm:$0xff] %v4133_v18  ;;  %4368 = vst [vmem:[#allocation17_spill] sm:$0xff] %v4135_v19  ;;  %v1414_v19 = vadd.f32 %v1353_v8, %v4035_v15  ;;  %v1420_v15 = vadd.f32 %v3069_v62, %v4041_v14  ;;  %v1592_v50 = vadd.f32 %v4064_v54, %v1416_v10 }
 0x15d   : > { %v4140_v28 = vpop.f32.mrf.mxu1  ;;  %v4142_v7 = vpop.f32.mrf.mxu0  ;;  %v1422_v14 = vadd.f32 %v1385_v38, %v4051_v5  ;;  %v1593_v54 = vadd.f32 %v4072_v63, %v1417_v12  ;;  %v1597_v63 = vadd.f32 %v4080_v60, %v1421_v2  ;;  %v4206_v60 = vadd.f32 %v4090_v36, %v1428_v40 }
 0x15e   : > { %4369 = vst [vmem:[#allocation18_spill] sm:$0xff] %v4140_v28  ;;  %4370 = vst [vmem:[#allocation19_spill] sm:$0xff] %v4142_v7  ;;  %v1591_v28 = vadd.f32 %v4055_v0, %v1415_v56  ;;  %v1419_v7 = vadd.f32 %v3068_v58, %v4037_v41  ;;  %v1423_v0 = vadd.f32 %v3072_v39, %v4045_v48 }
 0x15f   : > { %v4146_v9 = vpop.f32.mrf.mxu1  ;;  %v4148_v4 = vpop.f32.mrf.mxu0  ;;  %v1590_v8 = vadd.f32 %v4068_v52, %v1414_v19  ;;  %v1749_v48 = vadd.f32 %v1686_v33, %v1589_v35  ;;  %v1426_v52 = vadd.f32 %v1401_v59, %v4066_v26  ;;  %v1596_v5 = vadd.f32 %v4074_v20, %v1420_v15  ;;  %v4377_v36 = vld [vmem:[#allocation12_spill] sm:$0xff] }
 0x160   : > { %v1751_v41 = vadd.f32 %v3112_v46, %v1591_v28  ;;  %v1595_v51 = vadd.f32 %v4070_v11, %v1419_v7  ;;  %v1599_v37 = vadd.f32 %v4078_v13, %v1423_v0  ;;  %v1752_v45 = vadd.f32 %v4104_v47, %v1592_v50  ;;  %v4375_v47 = vld [vmem:[#allocation3_spill] sm:$0xff] }
 0x161   : > { %v4153_v18 = vpop.f32.mrf.mxu1  ;;  %v4155_v57 = vpop.f32.mrf.mxu0  ;;  %v1750_v26 = vadd.f32 %v4108_v17, %v1590_v8  ;;  %v1598_v38 = vadd.f32 %v4084_v44, %v1422_v14  ;;  %v1603_v20 = vadd.f32 %v4086_v3, %v1427_v32  ;;  %v1903_v27 = vadd.f32 %v4098_v16, %v1749_v48  ;;  %v4373_v44 = vld [vmem:[#allocation8_spill] sm:$0xff]  ;;  %v4374_v3 = vld [vmem:[#allocation10_spill] sm:$0xff]  ;;  %v4381_v8 = vld [vmem:[#allocation5_spill] sm:$0xff] }
 0x162   : > { %v1905_v39 = vadd.f32 %v4096_v53, %v1751_v41  ;;  %v1601_v13 = vadd.f32 %v4088_v23, %v1425_v24  ;;  %v4209_v34 = vadd.f32 %v4372_v42, %v1426_v52  ;;  %v1755_v10 = vadd.f32 %v4112_v49, %v1595_v51  ;;  %v4376_v23 = vld [vmem:[#allocation4_spill] sm:$0xff]  ;;  %v4378_v7 = vld [vmem:[#allocation14_spill] sm:$0xff]  ;;  %v4383_v24 = vld [vmem:[#allocation7_spill] sm:$0xff] }
 0x163   : > { %v4165_v1 = vpop.f32.mrf.mxu1  ;;  %v4167_v21 = vpop.f32.mrf.mxu0  ;;  %v1753_v59 = vadd.f32 %v4373_v44, %v1593_v54  ;;  %v1756_v46 = vadd.f32 %v4374_v3, %v1596_v5  ;;  %v1906_v17 = vadd.f32 %v4375_v47, %v1752_v45  ;;  %v1904_v19 = vadd.f32 %v4376_v23, %v1750_v26  ;;  %v4379_v12 = vld [vmem:[#allocation16_spill] sm:$0xff]  ;;  %v4382_v48 = vld [vmem:[#allocation6_spill] sm:$0xff]  ;;  %v4386_v45 = vld [vmem:[#allocation13_spill] sm:$0xff] }
 0x164   : > { %v1754_v28 = vadd.f32 %v4377_v36, %v1594_v55  ;;  %v1759_v56 = vadd.f32 %v4378_v7, %v1599_v37  ;;  %v1757_v15 = vadd.f32 %v4379_v12, %v1597_v63  ;;  %v1909_v2 = vadd.f32 %v4381_v8, %v1755_v10  ;;  %v4385_v37 = vld [vmem:[#allocation11_spill] sm:$0xff] }
 0x165   : > { %v4176_v58 = vpop.f32.mrf.mxu1  ;;  %v3184_v25 = vpop.f32.mrf.mxu0  ;;  %v4380_v61 = vld [vmem:[#allocation18_spill] sm:$0xff]  ;;  %v1758_v29 = vadd.f32 %v4146_v9, %v1598_v38  ;;  %v1907_v54 = vadd.f32 %v4382_v48, %v1753_v59  ;;  %v1910_v40 = vadd.f32 %v4383_v24, %v1756_v46  ;;  %v1761_v52 = vadd.f32 %v4165_v1, %v1601_v13  ;;  %v4389_v13 = vld [vmem:[#allocation19_spill] sm:$0xff] }
 0x166   : > { %v1760_v0 = vadd.f32 %v4380_v61, %v1600_v6  ;;  %v4236_v26 = vadd.f32 %v4386_v45, %v1757_v15 }
 0x167   : > { %v4190_v62 = vpop.f32.mrf.mxu1  ;;  %v2176_v11 = vpop.f32.mrf.mxu0  ;;  %v4250_v59 = vadd.f32 %v4148_v4, %v1761_v52 }
 0x169   : > { %v3160_v43 = vpop.f32.mrf.mxu1  ;;  %v3185_v30 = vpop.f32.mrf.mxu0 }
 0x16a   : > { %v2081_v31 = vadd.f32 %v3160_v43, %v1905_v39  ;;  %v1913_v39 = vadd.f32 %v4385_v37, %v1759_v56  ;;  %v4387_v43 = vld [vmem:[#allocation15_spill] sm:$0xff] }
 0x16b   : > { %v2016_v22 = vpop.f32.mrf.mxu1  ;;  %v2179_v53 = vpop.f32.mrf.mxu0  ;;  %v4239_v38 = vadd.f32 %v4387_v43, %v1760_v0 }
 0x16c   : > { %v2241_v16 = vadd.f32 %v3184_v25, %v2081_v31  ;;  %v2079_v33 = vadd.f32 %v2016_v22, %v1903_v27  ;;  %v1763_v25 = vadd.f32 %v4153_v18, %v1603_v20  ;;  %v4388_v27 = vld [vmem:[#allocation17_spill] sm:$0xff] }
 0x16d   : > { %v3161_v49 = vpop.f32.mrf.mxu1  ;;  %v3188_v35 = vpop.f32.mrf.mxu0  ;;  %v4244_v31 = vadd.f32 %v4388_v27, %v1758_v29 }
 0x16e   : > { %v2860_v41 = vpack.c.bf16 %v2241_v16, %v2241_v16  ;;  %v2239_v50 = vadd.f32 %v2176_v11, %v2079_v33  ;;  %v2082_v51 = vadd.f32 %v3161_v49, %v1906_v17  ;;  %v4384_v11 = vld [vmem:[#allocation9_spill] sm:$0xff]  ;;  %v4247_v42 = vadd.f32 %v4389_v13, %v1763_v25 }
 0x16f   : > { %v2019_v14 = vpop.f32.mrf.mxu1  ;;  %v2192_v32 = vpop.f32.mrf.mxu0  ;;  %v1908_v55 = vadd.f32 %v4384_v11, %v1754_v28  ;;  %v2378_v3 = vmul.f32 %v2241_v16, %v2241_v16  ;;  %v2340_v28 = vsel %vm2336_vm8, %v2241_v16, 0.0  ;;  %v1764_v13 = vadd.f32 %v4176_v58, %v4206_v60 }
 0x170   : > { %2322 = vst.msk [vmem:[%s4221_s15 + $0x8] sm:$0xf] %vm2319_vm7, %v2860_v41  ;;  %v2858_v5 = vpack.c.bf16 %v2239_v50, %v2239_v50  ;;  %v2242_v9 = vadd.f32 %v3185_v30, %v2082_v51  ;;  %v2080_v63 = vadd.f32 %v2019_v14, %v1904_v19  ;;  %v2376_v1 = vmul.f32 %v2239_v50, %v2239_v50 }
 0x171   : > { %v3164_v18 = vpop.f32.mrf.mxu1  ;;  %v3189_v6 = vpop.f32.mrf.mxu0  ;;  %v2337_v47 = vsel %vm2336_vm8, %v2239_v50, 0.0  ;;  %v2395_v41 = vsel %vm2336_vm8, %v2378_v3, 0.0  ;;  %v1762_v58 = vadd.f32 %v4190_v62, %v4209_v34 }
 0x172   : > { %2320 = vst.msk [vmem:[%s4221_s15] sm:$0xf] %vm2319_vm7, %v2858_v5  ;;  %v2085_v20 = vadd.f32 %v3164_v18, %v1909_v2  ;;  %v2861_v30 = vpack.c.bf16 %v2242_v9, %v2242_v9  ;;  %v2240_v10 = vadd.f32 %v2179_v53, %v2080_v63  ;;  %v2392_v4 = vsel %vm2336_vm8, %v2376_v1, 0.0 }
 0x173   : > { %v2032_v22 = vpop.f32.mrf.mxu1  ;;  %v2195_v44 = vpop.f32.mrf.mxu0  ;;  %v2379_v49 = vmul.f32 %v2242_v9, %v2242_v9  ;;  %v2342_v2 = vsel %vm2336_vm8, %v2242_v9, 0.0 }
 0x174   : > { %v2245_v46 = vadd.f32 %v3188_v35, %v2085_v20  ;;  %v2083_v33 = vadd.f32 %v2032_v22, %v1907_v54  ;;  %2323 = vst.msk [vmem:[%s4221_s15 + $0xc] sm:$0xf] %vm2319_vm7, %v2861_v30  ;;  %v2859_v17 = vpack.c.bf16 %v2240_v10, %v2240_v10  ;;  %v2338_v23 = vsel %vm2336_vm8, %v2240_v10, 0.0 }
 0x175   : > { %v2377_v19 = vmul.f32 %v2240_v10, %v2240_v10  ;;  %v3165_v36 = vpop.f32.mrf.mxu1  ;;  %v3192_v53 = vpop.f32.mrf.mxu0  ;;  %v2339_v7 = vadd.f32 %v2338_v23, %v2337_v47  ;;  %v2397_v52 = vsel %vm2336_vm8, %v2379_v49, 0.0 }
 0x176   : > { %v2864_v56 = vpack.c.bf16 %v2245_v46, %v2245_v46  ;;  %2321 = vst.msk [vmem:[%s4221_s15 + $0x4] sm:$0xf] %vm2319_vm7, %v2859_v17  ;;  %v2243_v12 = vadd.f32 %v2192_v32, %v2083_v33  ;;  %v2086_v15 = vadd.f32 %v3165_v36, %v1910_v40  ;;  %v2382_v5 = vmul.f32 %v2245_v46, %v2245_v46 }
 0x177   : > { %v2393_v35 = vsel %vm2336_vm8, %v2377_v19, 0.0  ;;  %v2035_v61 = vpop.f32.mrf.mxu1  ;;  %v2208_v0 = vpop.f32.mrf.mxu0  ;;  %v2341_v50 = vadd.f32 %v2340_v28, %v2339_v7  ;;  %v2348_v3 = vsel %vm2336_vm8, %v2245_v46, 0.0 }
 0x178   : > { %v2394_v8 = vadd.f32 %v2393_v35, %v2392_v4  ;;  %2326 = vst.msk [vmem:[%s4221_s15 + $0x18] sm:$0xf] %vm2319_vm7, %v2864_v56  ;;  %v2084_v16 = vadd.f32 %v2035_v61, %v1908_v55  ;;  %v2862_v29 = vpack.c.bf16 %v2243_v12, %v2243_v12  ;;  %v2380_v25 = vmul.f32 %v2243_v12, %v2243_v12 }
 0x179   : > { %v2246_v51 = vadd.f32 %v3189_v6, %v2086_v15  ;;  %v3168_v14 = vpop.f32.mrf.mxu1  ;;  %v3193_v48 = vpop.f32.mrf.mxu0  ;;  %v2343_v32 = vadd.f32 %v2342_v2, %v2341_v50  ;;  %v2344_v11 = vsel %vm2336_vm8, %v2243_v12, 0.0  ;;  %v2403_v60 = vsel %vm2336_vm8, %v2382_v5, 0.0 }
 0x17a   : > { %v2396_v54 = vadd.f32 %v2395_v41, %v2394_v8  ;;  %v2244_v24 = vadd.f32 %v2195_v44, %v2084_v16  ;;  %v2089_v40 = vadd.f32 %v3168_v14, %v1913_v39  ;;  %2324 = vst.msk [vmem:[%s4221_s15 + $0x10] sm:$0xf] %vm2319_vm7, %v2862_v29  ;;  %v2399_v43 = vsel %vm2336_vm8, %v2380_v25, 0.0 }
 0x17b   : > { %v2865_v55 = vpack.c.bf16 %v2246_v51, %v2246_v51  ;;  %v2048_v37 = vpop.f32.mrf.mxu1  ;;  %v2211_v9 = vpop.f32.mrf.mxu0  ;;  %v2345_v63 = vadd.f32 %v2344_v11, %v2343_v32  ;;  %v2383_v33 = vmul.f32 %v2246_v51, %v2246_v51  ;;  %v1918_v4 = vadd.f32 %v4155_v57, %v1764_v13 }
 0x17c   : > { %v2398_v18 = vadd.f32 %v2397_v52, %v2396_v54  ;;  %v2863_v6 = vpack.c.bf16 %v2244_v24, %v2244_v24  ;;  %v2346_v45 = vsel %vm2336_vm8, %v2244_v24, 0.0  ;;  %v2381_v39 = vmul.f32 %v2244_v24, %v2244_v24 }
 0x17d   : > { %2327 = vst.msk [vmem:[%s4221_s15 + $0x1c] sm:$0xf] %vm2319_vm7, %v2865_v55  ;;  %v2249_v1 = vadd.f32 %v3192_v53, %v2089_v40  ;;  %v2087_v20 = vadd.f32 %v2048_v37, %v4236_v26  ;;  %v3169_v27 = vpop.f32.mrf.mxu1  ;;  %v2347_v10 = vadd.f32 %v2346_v45, %v2345_v63  ;;  %v3196_v44 = vpop.f32.mrf.mxu0  ;;  %v2405_v12 = vsel %vm2336_vm8, %v2383_v33, 0.0 }
 0x17e   : > { %v2400_v30 = vadd.f32 %v2399_v43, %v2398_v18  ;;  %2325 = vst.msk [vmem:[%s4221_s15 + $0x14] sm:$0xf] %vm2319_vm7, %v2863_v6  ;;  %v2090_v22 = vadd.f32 %v3169_v27, %v4239_v38  ;;  %v2401_v47 = vsel %vm2336_vm8, %v2381_v39, 0.0  ;;  %v2350_v38 = vsel %vm2336_vm8, %v2246_v51, 0.0 }
 0x17f   : > { %v2868_v17 = vpack.c.bf16 %v2249_v1, %v2249_v1  ;;  %v2051_v23 = vpop.f32.mrf.mxu1  ;;  %v2349_v26 = vadd.f32 %v2348_v3, %v2347_v10  ;;  %v2247_v36 = vadd.f32 %v2208_v0, %v2087_v20  ;;  %v2224_v35 = vpop.f32.mrf.mxu0  ;;  %v1916_v57 = vadd.f32 %v4167_v21, %v1762_v58 }
 0x180   : > { %v2402_v19 = vadd.f32 %v2401_v47, %v2400_v30  ;;  %v2250_v53 = vadd.f32 %v3193_v48, %v2090_v22  ;;  %v2088_v46 = vadd.f32 %v2051_v23, %v4244_v31  ;;  %v2386_v8 = vmul.f32 %v2249_v1, %v2249_v1 }
 0x181   : > { %2330 = vst.msk [vmem:[%s4221_s15 + $0x28] sm:$0xf] %vm2319_vm7, %v2868_v17  ;;  %v3172_v28 = vpop.f32.mrf.mxu1  ;;  %v2866_v56 = vpack.c.bf16 %v2247_v36, %v2247_v36  ;;  %v2351_v49 = vadd.f32 %v2350_v38, %v2349_v26  ;;  %v2352_v62 = vsel %vm2336_vm8, %v2247_v36, 0.0  ;;  %v2384_v34 = vmul.f32 %v2247_v36, %v2247_v36  ;;  %v3197_v54 = vpop.f32.mrf.mxu0 }
 0x182   : > { %v2404_v7 = vadd.f32 %v2403_v60, %v2402_v19  ;;  %v2869_v15 = vpack.c.bf16 %v2250_v53, %v2250_v53  ;;  %v2248_v31 = vadd.f32 %v2211_v9, %v2088_v46  ;;  %v2093_v50 = vadd.f32 %v3172_v28, %v4247_v42 }
 0x183   : > { %v2064_v61 = vpop.f32.mrf.mxu1  ;;  %2328 = vst.msk [vmem:[%s4221_s15 + $0x20] sm:$0xf] %vm2319_vm7, %v2866_v56  ;;  %v2353_v0 = vadd.f32 %v2352_v62, %v2351_v49  ;;  %v2407_v16 = vsel %vm2336_vm8, %v2384_v34, 0.0  ;;  %v2356_v52 = vsel %vm2336_vm8, %v2249_v1, 0.0  ;;  %v2387_v5 = vmul.f32 %v2250_v53, %v2250_v53  ;;  %v2227_v43 = vpop.f32.mrf.mxu0 }
 0x184   : > { %v2406_v41 = vadd.f32 %v2405_v12, %v2404_v7  ;;  %2331 = vst.msk [vmem:[%s4221_s15 + $0x2c] sm:$0xf] %vm2319_vm7, %v2869_v15  ;;  %v2091_v2 = vadd.f32 %v2064_v61, %v4250_v59  ;;  %v2867_v51 = vpack.c.bf16 %v2248_v31, %v2248_v31  ;;  %v2354_v14 = vsel %vm2336_vm8, %v2248_v31, 0.0 }
 0x185   : > { %v3173_v29 = vpop.f32.mrf.mxu1  ;;  %v2385_v48 = vmul.f32 %v2248_v31, %v2248_v31  ;;  %v2355_v32 = vadd.f32 %v2354_v14, %v2353_v0  ;;  %v2253_v24 = vadd.f32 %v3196_v44, %v2093_v50  ;;  %v2411_v63 = vsel %vm2336_vm8, %v2386_v8, 0.0 }
 0x186   : > { %v2408_v25 = vadd.f32 %v2407_v16, %v2406_v41  ;;  %v2251_v42 = vadd.f32 %v2224_v35, %v2091_v2  ;;  %v2094_v40 = vadd.f32 %v3173_v29, %v1918_v4  ;;  %2329 = vst.msk [vmem:[%s4221_s15 + $0x24] sm:$0xf] %vm2319_vm7, %v2867_v51  ;;  %v2358_v18 = vsel %vm2336_vm8, %v2250_v53, 0.0 }
 0x187   : > { %v2067_v21 = vpop.f32.mrf.mxu1  ;;  %v2409_v59 = vsel %vm2336_vm8, %v2385_v48, 0.0  ;;  %v2357_v55 = vadd.f32 %v2356_v52, %v2355_v32  ;;  %v2872_v9 = vpack.c.bf16 %v2253_v24, %v2253_v24  ;;  %v2413_v13 = vsel %vm2336_vm8, %v2387_v5, 0.0 }
 0x188   : > { %v2092_v11 = vadd.f32 %v2067_v21, %v1916_v57  ;;  %v2410_v37 = vadd.f32 %v2409_v59, %v2408_v25  ;;  %v2870_v6 = vpack.c.bf16 %v2251_v42, %v2251_v42  ;;  %v2388_v45 = vmul.f32 %v2251_v42, %v2251_v42 }
 0x189   : > { %2334 = vst.msk [vmem:[%s4221_s15 + $0x38] sm:$0xf] %vm2319_vm7, %v2872_v9  ;;  %v2359_v1 = vadd.f32 %v2358_v18, %v2357_v55  ;;  %v2254_v20 = vadd.f32 %v3197_v54, %v2094_v40  ;;  %v2360_v30 = vsel %vm2336_vm8, %v2251_v42, 0.0  ;;  %v2390_v10 = vmul.f32 %v2253_v24, %v2253_v24 }
 0x18a   : > { %v2412_v39 = vadd.f32 %v2411_v63, %v2410_v37  ;;  %v2252_v27 = vadd.f32 %v2227_v43, %v2092_v11  ;;  %2332 = vst.msk [vmem:[%s4221_s15 + $0x30] sm:$0xf] %vm2319_vm7, %v2870_v6  ;;  %v2415_v33 = vsel %vm2336_vm8, %v2388_v45, 0.0  ;;  %v2364_v36 = vsel %vm2336_vm8, %v2253_v24, 0.0 }
 0x18b   : > { %v2361_v22 = vadd.f32 %v2360_v30, %v2359_v1  ;;  %v2873_v3 = vpack.c.bf16 %v2254_v20, %v2254_v20  ;;  %v2391_v53 = vmul.f32 %v2254_v20, %v2254_v20  ;;  %v2419_v46 = vsel %vm2336_vm8, %v2390_v10, 0.0 }
 0x18c   : > { %v2414_v44 = vadd.f32 %v2413_v13, %v2412_v39  ;;  %v2871_v47 = vpack.c.bf16 %v2252_v27, %v2252_v27  ;;  %v2362_v17 = vsel %vm2336_vm8, %v2252_v27, 0.0  ;;  %v2389_v23 = vmul.f32 %v2252_v27, %v2252_v27 }
 0x18d   : > { %2335 = vst.msk [vmem:[%s4221_s15 + $0x3c] sm:$0xf] %vm2319_vm7, %v2873_v3  ;;  %v2363_v19 = vadd.f32 %v2362_v17, %v2361_v22  ;;  %v2366_v28 = vsel %vm2336_vm8, %v2254_v20, 0.0  ;;  %v2421_v56 = vsel %vm2336_vm8, %v2391_v53, 0.0 }
 0x18e   : > { %v2416_v26 = vadd.f32 %v2415_v33, %v2414_v44  ;;  %2333 = vst.msk [vmem:[%s4221_s15 + $0x34] sm:$0xf] %vm2319_vm7, %v2871_v47  ;;  %v2417_v58 = vsel %vm2336_vm8, %v2389_v23, 0.0 }
 0x18f   : > { %v2365_v60 = vadd.f32 %v2364_v36, %v2363_v19 }
 0x190   : > { %v2418_v38 = vadd.f32 %v2417_v58, %v2416_v26 }
 0x191   : > { %v2367_v4 = vadd.f32 %v2366_v28, %v2365_v60 }
 0x192   : > { %v2420_v7 = vadd.f32 %v2419_v46, %v2418_v38 }
 0x193   : > { %v2368_v49 = vrot.slane %v2367_v4, 4 }
 0x194   : > { %v2422_v35 = vadd.f32 %v2421_v56, %v2420_v7 }
 0x195   : > { %v2369_v12 = vadd.f32 %v2368_v49, %v2367_v4 }
 0x196   : > { %v2423_v62 = vrot.slane %v2422_v35, 4 }
 0x197   : > { %v2370_v34 = vrot.slane %v2369_v12, 2 }
 0x198   : > { %v2424_v15 = vadd.f32 %v2423_v62, %v2422_v35 }
 0x199   : > { %v2371_v61 = vadd.f32 %v2370_v34, %v2369_v12 }
 0x19a   : > { %v2425_v0 = vrot.slane %v2424_v15, 2 }
 0x19b   : > { %v2372_v41 = vrot.slane %v2371_v61, 1 }
 0x19c   : > { %v2426_v31 = vadd.f32 %v2425_v0, %v2424_v15 }
 0x19d   : > { %v2373_v50 = vadd.f32 %v2372_v41, %v2371_v61 }
 0x19e   : > { %v2427_v57 = vrot.slane %v2426_v31, 1 }
 0x19f   : > { %2375 = vst.msk [vmem:[%s413_s26] sm:$0x1] %vm2374_vm9, %v2373_v50 }
 0x1a0   : > { %v2428_v8 = vadd.f32 %v2427_v57, %v2426_v31 }
 0x1a2   : > { %2429 = vst.msk [vmem:[%s413_s26 + $0x1] sm:$0x1] %vm2374_vm9, %v2428_v8 }
 0x1a3 PF: > { %s16_s22 = sadd.s32 1, %s3334_s22   ;;  %s4390_s18 = smov %s3326_s20 }
 0x1a4   : > { %p13_p11 = scmp.ge.s32.totalorder %s16_s22, 6   ;;  %s4391_s19 = smov %s3330_s21 }
 0x1a5   : > { %s4392_s20 = smov %s4395_s23  ;;  %s4393_s21 = smov %s4399_s24 }
 0x1a6   :  { %15 = sbr.rel (!%p13_p11) target bundleno = 3 (0x3), region = 92 }

</bundles_post_ra>
